<compile_context>
chip_gen: v7x
topology: tpu7x:2x2x1
jax: 0.10.0
libtpu: 0.0.40
codegen_flags: <defaults>
</compile_context>

<pallas_src>
import math

import jax
import jax.numpy as jnp
from jax import lax
from jax.experimental import pallas as pl
from jax.experimental.pallas import tpu as pltpu


_KRON_MAX_HW = 1024          # fused Kronecker path while the (HW, 2HW) matrix fits VMEM
_HIGH = lax.Precision.HIGHEST


def _round_up(x, m):
    return ((x + m - 1) // m) * m


def _cdiv(a, b):
    return -(-a // b)


def _vmem_capacity_bytes():
    try:
        cap = int(pltpu.get_tpu_info().vmem_capacity_bytes)
        if cap > 0:
            return cap
    except Exception:
        pass
    return 64 * 1024 * 1024  # conservative default: v7x has 64 MiB per TensorCore


def _vmem_limit_bytes():
    cap = _vmem_capacity_bytes()
    return max(32 << 20, min(cap - (8 << 20), 112 << 20))


def _pick_bt(b, bt_max, unit=8):
    """Pick a batch-tile size bt (multiple of `unit`, or == b) and padded batch bpad.

    Preference order: no padding (bt divides b), >= 2 grid steps when the batch allows
    (so both v7x TensorCores get work), largest tile that fits the VMEM budget.
    """
    bt_max = max(1, bt_max)
    if bt_max >= b:
        half = b // 2
        if b >= 2 and half * 2 == b and half % unit == 0:
            return half, b            # 2 parallel grid steps, no padding
        return b, b                   # one block covering the whole batch
    bt_cap = max(unit, (bt_max // unit) * unit)
    min_grid = _cdiv(b, bt_cap)
    for bt in range(bt_cap, unit - 1, -unit):
        if b % bt == 0 and _cdiv(b, bt) <= 4 * min_grid:
            return bt, b              # exact divisor: no pad / output slice needed
    return bt_cap, _round_up(b, bt_cap)   # rare fallback (awkward batch sizes)


# ----------------------------------------------------------------------------
# Shifted, ortho-normalized DFT matrices (fftshift baked in).
# ----------------------------------------------------------------------------
def _shifted_dft_matrices(h, w):
    """Fh[k, m] (left multiply, rows = shifted freq) and Fw[m, l] (right multiply)."""
    kh = (jnp.arange(h, dtype=jnp.int32) - h // 2) % h
    ph = (kh[:, None] * jnp.arange(h, dtype=jnp.int32)[None, :]) % h   # keep angles small
    ang_h = (-2.0 * jnp.pi / h) * ph.astype(jnp.float32)
    sh = 1.0 / math.sqrt(h)
    fh_re, fh_im = jnp.cos(ang_h) * sh, jnp.sin(ang_h) * sh

    lw = (jnp.arange(w, dtype=jnp.int32) - w // 2) % w
    pw = (jnp.arange(w, dtype=jnp.int32)[:, None] * lw[None, :]) % w
    ang_w = (-2.0 * jnp.pi / w) * pw.astype(jnp.float32)
    sw = 1.0 / math.sqrt(w)
    fw_re, fw_im = jnp.cos(ang_w) * sw, jnp.sin(ang_w) * sw
    return fh_re, fh_im, fw_re, fw_im


def _kron_dft_matrices(h, w):
    """Right-multiply matrices (HW, HW): vec(F) = vec(D) @ (M_re + i*M_im),
    with F = Fh @ D @ Fw (shifted ortho 2D DFT) and vec() row-major."""
    fh_re, fh_im, fw_re, fw_im = _shifted_dft_matrices(h, w)
    a_re, a_im = fh_re.T, fh_im.T          # [m, k]
    hw = h * w
    m_re = (a_re[:, None, :, None] * fw_re[None, :, None, :]
            - a_im[:, None, :, None] * fw_im[None, :, None, :]).reshape(hw, hw)
    m_im = (a_re[:, None, :, None] * fw_im[None, :, None, :]
            + a_im[:, None, :, None] * fw_re[None, :, None, :]).reshape(hw, hw)
    return m_re, m_im


# ----------------------------------------------------------------------------
# Kernels
# ----------------------------------------------------------------------------
def _make_kron_kernel(hw, fused):
    if fused:
        # Single (bt, hw) @ (hw, 2*hw) matmul; re/im are lane-aligned column halves.
        def kernel(pred_ref, target_ref, m_ref, out_ref):
            d = pred_ref[...].astype(jnp.float32) - target_ref[...].astype(jnp.float32)
            mm = jnp.dot(d, m_ref[...], precision=_HIGH,
                         preferred_element_type=jnp.float32)
            re, im = mm[:, :hw], mm[:, hw:]
            out_ref[...] = jnp.sqrt(re * re + im * im + 1e-12)
        return kernel

    def kernel(pred_ref, target_ref, m_re_ref, m_im_ref, out_ref):
        d = pred_ref[...].astype(jnp.float32) - target_ref[...].astype(jnp.float32)
        re = jnp.dot(d, m_re_ref[...], precision=_HIGH, preferred_element_type=jnp.float32)
        im = jnp.dot(d, m_im_ref[...], precision=_HIGH, preferred_element_type=jnp.float32)
        out_ref[...] = jnp.sqrt(re * re + im * im + 1e-12)
    return kernel


def _make_sep_kernel(bt, h, w):
    def kernel(pred_ref, target_ref, fh_re_ref, fh_im_ref, fw_re_ref, fw_im_ref,
               out_ref, t_re_s, t_im_s):
        # Blocks are bt images stacked along rows: (bt*h, w).
        d = pred_ref[...].astype(jnp.float32) - target_ref[...].astype(jnp.float32)
        # Batched W-transform: one (bt*h, w) @ (w, w) matmul per component.
        t_re_s[...] = jnp.dot(d, fw_re_ref[...], precision=_HIGH,
                              preferred_element_type=jnp.float32)
        t_im_s[...] = jnp.dot(d, fw_im_ref[...], precision=_HIGH,
                              preferred_element_type=jnp.float32)
        fh_re = fh_re_ref[...]
        fh_im = fh_im_ref[...]

        # H-transform needs a per-image contraction over rows; fori_loop keeps the live
        # set to one image (no spills) and unroll=True keeps LLO scheduler visibility.
        def body(i, carry):
            r = i * h
            if h % 8 == 0:
                r = pl.multiple_of(r, 8)
            tr = t_re_s[pl.ds(r, h), :]
            ti = t_im_s[pl.ds(r, h), :]
            f_re = (jnp.dot(fh_re, tr, precision=_HIGH, preferred_element_type=jnp.float32)
                    - jnp.dot(fh_im, ti, precision=_HIGH, preferred_element_type=jnp.float32))
            f_im = (jnp.dot(fh_im, tr, precision=_HIGH, preferred_element_type=jnp.float32)
                    + jnp.dot(fh_re, ti, precision=_HIGH, preferred_element_type=jnp.float32))
            out_ref[pl.ds(r, h), :] = jnp.sqrt(f_re * f_re + f_im * f_im + 1e-12)
            return carry

        lax.fori_loop(0, bt, body, 0, unroll=True)
    return kernel


# ----------------------------------------------------------------------------
# pallas_call wrappers
# ----------------------------------------------------------------------------
def _freq_loss_kron(pred_flat, target_flat, h, w):
    b, hw = pred_flat.shape
    vmem_limit = _vmem_limit_bytes()
    # TODO(synk): single-buffer the grid-invariant matrix specs (pl.Buffered(1)) once
    # verified; until then the budget charges them as double-buffered.
    mat_bytes = 2 * (hw * 2 * hw * 4)          # DFT matrix (pair), double-buffered
    per_image = 12 * hw * 4                    # 2 in x2buf + out x2buf + ~6 f32 temps
    budget = max(8 * per_image, vmem_limit - mat_bytes - (6 << 20))
    bt_max = min(2048, budget // per_image)
    bt, bpad = _pick_bt(b, int(bt_max), unit=8)
    if bpad != b:                              # rare fallback; normally bt divides b
        pred_flat = jnp.pad(pred_flat, ((0, bpad - b), (0, 0)))
        target_flat = jnp.pad(target_flat, ((0, bpad - b), (0, 0)))

    fused = (hw % 128 == 0)                    # re/im column slices stay lane-aligned
    m_re, m_im = _kron_dft_matrices(h, w)
    if fused:
        mats = (jnp.concatenate([m_re, m_im], axis=1),)
        mat_specs = [pl.BlockSpec((hw, 2 * hw), lambda i: (0, 0))]
    else:
        mats = (m_re, m_im)
        mat_specs = [pl.BlockSpec((hw, hw), lambda i: (0, 0)),
                     pl.BlockSpec((hw, hw), lambda i: (0, 0))]

    img_spec = pl.BlockSpec((bt, hw), lambda i: (i, 0))
    out = pl.pallas_call(
        _make_kron_kernel(hw, fused),
        out_shape=jax.ShapeDtypeStruct((bpad, hw), jnp.float32),
        grid_spec=pltpu.PrefetchScalarGridSpec(
            num_scalar_prefetch=0,
            grid=(bpad // bt,),
            in_specs=[img_spec, img_spec] + mat_specs,
            out_specs=img_spec,
        ),
        compiler_params=pltpu.CompilerParams(
            dimension_semantics=("parallel",),
            vmem_limit_bytes=int(vmem_limit)),
    )(pred_flat, target_flat, *mats)
    if bpad != b:
        out = out[:b]
    return out                                  # (b, hw)


def _freq_loss_sep(pred2, target2, h, w):
    bh = pred2.shape[0]
    b = bh // h
    vmem_limit = _vmem_limit_bytes()
    mat_bytes = 2 * 2 * (h * h + w * w) * 4     # fh_re/im + fw_re/im, double-buffered
    per_image = 16 * h * w * 4                  # in/out double-buffers, scratch, temps
    budget = max(per_image, vmem_limit - mat_bytes - (6 << 20))
    bt_max = min(8, budget // per_image)        # cap the unrolled per-image H-loop
    unit = 8 // math.gcd(h, 8)                  # keep (bt*h) a sublane multiple
    bt, bpad = _pick_bt(b, int(max(1, bt_max)), unit=unit)
    if bpad != b:
        pred2 = jnp.pad(pred2, ((0, (bpad - b) * h), (0, 0)))
        target2 = jnp.pad(target2, ((0, (bpad - b) * h), (0, 0)))

    fh_re, fh_im, fw_re, fw_im = _shifted_dft_matrices(h, w)

    img_spec = pl.BlockSpec((bt * h, w), lambda i: (i, 0))
    fh_spec = pl.BlockSpec((h, h), lambda i: (0, 0))
    fw_spec = pl.BlockSpec((w, w), lambda i: (0, 0))

    out = pl.pallas_call(
        _make_sep_kernel(bt, h, w),
        out_shape=jax.ShapeDtypeStruct((bpad * h, w), jnp.float32),
        grid_spec=pltpu.PrefetchScalarGridSpec(
            num_scalar_prefetch=0,
            grid=(bpad // bt,),
            in_specs=[img_spec, img_spec, fh_spec, fh_spec, fw_spec, fw_spec],
            out_specs=img_spec,
            scratch_shapes=[pltpu.VMEM((bt * h, w), jnp.float32),
                            pltpu.VMEM((bt * h, w), jnp.float32)],
        ),
        compiler_params=pltpu.CompilerParams(
            dimension_semantics=("parallel",),
            vmem_limit_bytes=int(vmem_limit)),
    )(pred2, target2, fh_re, fh_im, fw_re, fw_im)
    if bpad != b:
        out = out[: b * h]
    return out                                  # (b*h, w)


@jax.jit
def frequency_loss1(pred, target):
    """FrequencyLoss1.forward with default hyper-parameters.

    Args:
      pred, target: (N, C, H, W) arrays.
    Returns:
      (N, 1, C, H, W) float32 loss map (the "1" is the patch axis, patch_factor=1).
    """
    n, c, h, w = pred.shape
    b = n * c
    if h * w <= _KRON_MAX_HW:
        out = _freq_loss_kron(pred.reshape(b, h * w), target.reshape(b, h * w), h, w)
    else:
        out = _freq_loss_sep(pred.reshape(b * h, w), target.reshape(b * h, w), h, w)
    return out.reshape(n, 1, c, h, w)


# TODO(synk): with_matrix / ave_spectrum / patch_factor>1 / loss_gamma!=1 branches of the
# PyTorch module are not kernelized; only the default forward is implemented.


# ----------------------------------------------------------------------------
# Reference + test
# ----------------------------------------------------------------------------
def _reference(pred, target):
    def t2f(x):
        f = jnp.fft.fft2(x.astype(jnp.float32), norm="ortho")
        return jnp.fft.fftshift(f, axes=(-2, -1))
    diff = t2f(pred) - t2f(target)
    loss = jnp.sqrt(diff.real ** 2 + diff.imag ** 2 + 1e-12)
    n, c, h, w = pred.shape
    return loss.reshape(n, 1, c, h, w)


if __name__ == "__main__":
    key = jax.random.PRNGKey(0)
    k1, k2, k3, k4 = jax.random.split(key, 4)

    # Main test (small images -> fused Kronecker path, matches the module's usual shapes).
    N, C, H, W = 2, 4, 16, 16
    pred = jax.random.normal(k1, (N, C, H, W), dtype=jnp.float32)
    target = jax.random.normal(k2, (N, C, H, W), dtype=jnp.float32)
    loss = jax.block_until_ready(frequency_loss1(pred, target))
    ref = jax.block_until_ready(_reference(pred, target))
    assert loss.shape == (N, 1, C, H, W)
    assert float(jnp.max(jnp.abs(loss - ref))) < 1e-3, "mismatch vs FFT reference (kron)"

    # Secondary test (larger images -> batched separable path).
    N2, C2, H2, W2 = 1, 2, 64, 64
    pred2 = jax.random.normal(k3, (N2, C2, H2, W2), dtype=jnp.float32)
    target2 = jax.random.normal(k4, (N2, C2, H2, W2), dtype=jnp.float32)
    loss2 = jax.block_until_ready(frequency_loss1(pred2, target2))
    ref2 = jax.block_until_ready(_reference(pred2, target2))
    assert loss2.shape == (N2, 1, C2, H2, W2)
    assert float(jnp.max(jnp.abs(loss2 - ref2))) < 1e-3, "mismatch vs FFT reference (sep)"

    print("KERNEL_OK")
</pallas_src>

<mosaic_0001>
module attributes {stable_mosaic.version = 11 : i64} {
  func.func @kernel(%arg0: i32, %arg1: memref<8x256xf32, #tpu.memory_space<vmem>>, %arg2: memref<8x256xf32, #tpu.memory_space<vmem>>, %arg3: memref<256x512xf32, #tpu.memory_space<vmem>>, %arg4: memref<8x256xf32, #tpu.memory_space<vmem>>) attributes {dimension_semantics = [#tpu.dimension_semantics<parallel>], iteration_bounds = array<i64: 1>, scalar_prefetch = 0 : i64, scratch_operands = 0 : i64, tpu.core_type = #tpu.core_type<tc>, window_params = [{transform_indices = @transform_0, window_bounds = array<i64: 8, 256>}, {transform_indices = @transform_1, window_bounds = array<i64: 8, 256>}, {pipeline_mode = #tpu.pipeline_mode<synchronous>, transform_indices = @transform_2, window_bounds = array<i64: 256, 512>}, {transform_indices = @transform_3, window_bounds = array<i64: 8, 256>}]} {
    %c0 = arith.constant 0 : index
    %c0_0 = arith.constant 0 : index
    %0 = vector.load %arg1[%c0, %c0_0] : memref<8x256xf32, #tpu.memory_space<vmem>>, vector<8x256xf32>
    %c0_1 = arith.constant 0 : index
    %c0_2 = arith.constant 0 : index
    %1 = vector.load %arg2[%c0_1, %c0_2] : memref<8x256xf32, #tpu.memory_space<vmem>>, vector<8x256xf32>
    %2 = arith.subf %0, %1 : vector<8x256xf32>
    %c0_3 = arith.constant 0 : index
    %c0_4 = arith.constant 0 : index
    %3 = vector.load %arg3[%c0_3, %c0_4] : memref<256x512xf32, #tpu.memory_space<vmem>>, vector<256x512xf32>
    %cst = arith.constant dense<0.000000e+00> : vector<8x512xf32>
    %4 = tpu.matmul %2, %3, %cst {dimension_numbers = #tpu.dot_dimension_numbers<[1], [0], [0], [1], [0, 0, 1, 1], [], []>, precision = #tpu.contract_precision<fp32>} : vector<8x256xf32>, vector<256x512xf32>, vector<8x512xf32> -> vector<8x512xf32>
    %5 = vector.extract_strided_slice %4 {offsets = [0, 0], sizes = [8, 256], strides = [1, 1]} : vector<8x512xf32> to vector<8x256xf32>
    %6 = vector.extract_strided_slice %4 {offsets = [0, 256], sizes = [8, 256], strides = [1, 1]} : vector<8x512xf32> to vector<8x256xf32>
    %7 = arith.mulf %5, %5 : vector<8x256xf32>
    %8 = arith.mulf %6, %6 : vector<8x256xf32>
    %9 = arith.addf %7, %8 : vector<8x256xf32>
    %cst_5 = arith.constant 9.99999996E-13 : f32
    %10 = vector.broadcast %cst_5 : f32 to vector<8x256xf32>
    %11 = arith.addf %9, %10 : vector<8x256xf32>
    %12 = math.sqrt %11 : vector<8x256xf32>
    %c0_6 = arith.constant 0 : index
    %c0_7 = arith.constant 0 : index
    %13 = vector.load %arg4[%c0_6, %c0_7] : memref<8x256xf32, #tpu.memory_space<vmem>>, vector<8x256xf32>
    tpu.vector_store %arg4[%c0_6, %c0_7], %12 {strides = array<i32>} : memref<8x256xf32, #tpu.memory_space<vmem>>, vector<8x256xf32>,
    return
  }
  func.func @transform_0(%arg0: i32) -> (i32, i32) {
    %c0_i32 = arith.constant 0 : i32
    %c0_i32_0 = arith.constant 0 : i32
    return %arg0, %c0_i32 : i32, i32
  }
  func.func @transform_1(%arg0: i32) -> (i32, i32) {
    %c0_i32 = arith.constant 0 : i32
    %c0_i32_0 = arith.constant 0 : i32
    return %arg0, %c0_i32 : i32, i32
  }
  func.func @transform_2(%arg0: i32) -> (i32, i32) {
    %c0_i32 = arith.constant 0 : i32
    %c0_i32_0 = arith.constant 0 : i32
    %c0_i32_1 = arith.constant 0 : i32
    return %c0_i32, %c0_i32_0 : i32, i32
  }
  func.func @transform_3(%arg0: i32) -> (i32, i32) {
    %c0_i32 = arith.constant 0 : i32
    %c0_i32_0 = arith.constant 0 : i32
    return %arg0, %c0_i32 : i32, i32
  }
}

</mosaic_0001>

<bundles_post_ra>
// kernel: frequency_loss1.1
= control target key start
LH: loop header
LB: loop body
LE: loop exit
PB: predicated region body
PF: predicated region fallthrough
CT: control target
= control target key end

     0   :  { %s5560_s2 = inlined_call_operand.vmem [shape: f32[256,512], index: 2, kind: input, shape index: {}]   ;;  %s5561_s0 = inlined_call_operand.vmem [shape: f32[8,256], index: 0, kind: input, shape index: {}]   ;;  %s5562_s1 = inlined_call_operand.vmem [shape: f32[8,256], index: 1, kind: input, shape index: {}]   ;;  %s5563_s3 = inlined_call_operand.vmem [shape: f32[8,256], index: 3, kind: output, shape index: {}]  }
   0x1   :  { %v21_v0 = vld [vmem:[%s5560_s2 + $0x8] sm:$0xff]  ;;  %v23_v2 = vld [vmem:[%s5560_s2 + $0x18] sm:$0xff]  ;;  %v20_v7 = vld [vmem:[%s5560_s2] sm:$0xff] }
   0x2   :  { %v25_v1 = vld [vmem:[%s5560_s2 + $0x28] sm:$0xff]  ;;  %v148_v3 = vand.u32 4294901760, %v21_v0  ;;  %v27_v5 = vld [vmem:[%s5560_s2 + $0x38] sm:$0xff]  ;;  %v1432_v6 = vand.u32 4294901760, %v23_v2  ;;  %v24_v8 = vld [vmem:[%s5560_s2 + $0x20] sm:$0xff]  ;;  %v150_v10 = vand.u32 4294901760, %v20_v7 }
   0x3   :  { %v152_v4 = vand.u32 4294901760, %v25_v1  ;;  %v1436_v9 = vand.u32 4294901760, %v27_v5  ;;  %v154_v11 = vand.u32 4294901760, %v24_v8  ;;  %v22_v12 = vld [vmem:[%s5560_s2 + $0x10] sm:$0xff]  ;;  %v29_v14 = vld [vmem:[%s5560_s2 + $0x48] sm:$0xff]  ;;  %v31_v20 = vld [vmem:[%s5560_s2 + $0x58] sm:$0xff] }
   0x4   :  { %v26_v13 = vld [vmem:[%s5560_s2 + $0x30] sm:$0xff]  ;;  %v3585_v16 = vsub.f32 %v21_v0, %v148_v3  ;;  %v3589_v18 = vsub.f32 %v23_v2, %v1432_v6  ;;  %v33_v19 = vld [vmem:[%s5560_s2 + $0x68] sm:$0xff]  ;;  %v35_v21 = vld [vmem:[%s5560_s2 + $0x78] sm:$0xff]  ;;  %v3606_v25 = vsub.f32 %v20_v7, %v150_v10  ;;  %v1434_v28 = vand.u32 4294901760, %v22_v12 }
   0x5   :  { %v3583_v15 = vpack.c.bf16 %v152_v4, %v148_v3  ;;  %v3587_v17 = vsub.f32 %v25_v1, %v152_v4  ;;  %v3600_v22 = vpack.c.bf16 %v1436_v9, %v1432_v6  ;;  %v3602_v23 = vsub.f32 %v27_v5, %v1436_v9  ;;  %v28_v26 = vld [vmem:[%s5560_s2 + $0x40] sm:$0xff]  ;;  %v30_v36 = vld [vmem:[%s5560_s2 + $0x50] sm:$0xff]  ;;  %v37_v42 = vld [vmem:[%s5560_s2 + $0x88] sm:$0xff] }
   0x6   :  { %6072 = vst [vmem:[#allocation3_spill] sm:$0xff] %v3585_v16  ;;  %6074 = vst [vmem:[#allocation5_spill] sm:$0xff] %v3589_v18  ;;  %v3604_v24 = vpack.c.bf16 %v154_v11, %v150_v10  ;;  %v3612_v27 = vsub.f32 %v24_v8, %v154_v11  ;;  %v1438_v29 = vand.u32 4294901760, %v26_v13  ;;  %v156_v30 = vand.u32 4294901760, %v29_v14  ;;  %v32_v31 = vld [vmem:[%s5560_s2 + $0x60] sm:$0xff]  ;;  %v34_v37 = vld [vmem:[%s5560_s2 + $0x70] sm:$0xff] }
   0x7   :  { %6071 = vst [vmem:[#allocation2_spill] sm:$0xff] %v3583_v15  ;;  %6073 = vst [vmem:[#allocation4_spill] sm:$0xff] %v3587_v17  ;;  %2745 = vmatprep.subr.bf16.mxu0 %v3583_v15  ;;  %3129 = vmatprep.subr.bf16.mxu1 %v3600_v22  ;;  %v160_v32 = vand.u32 4294901760, %v33_v19  ;;  %v1440_v33 = vand.u32 4294901760, %v31_v20  ;;  %v1444_v34 = vand.u32 4294901760, %v35_v21  ;;  %v158_v35 = vand.u32 4294901760, %v28_v26 }
   0x8   :  { %6075 = vst [vmem:[#allocation6_spill] sm:$0xff] %v3600_v22  ;;  %6076 = vst [vmem:[#allocation7_spill] sm:$0xff] %v3602_v23  ;;  %2747 = vmatpush1.bf16.msra.mxu0 %v3604_v24  ;;  %v3625_v38 = vpack.c.bf16 %v1438_v29, %v1434_v28  ;;  %v3627_v39 = vsub.f32 %v22_v12, %v1434_v28  ;;  %v3629_v40 = vsub.f32 %v26_v13, %v1438_v29  ;;  %v41_v43 = vld [vmem:[%s5560_s2 + $0xa8] sm:$0xff]  ;;  %v39_v44 = vld [vmem:[%s5560_s2 + $0x98] sm:$0xff] }
   0x9   :  { %6077 = vst [vmem:[#allocation8_spill] sm:$0xff] %v3604_v24  ;;  %6078 = vst [vmem:[#allocation9_spill] sm:$0xff] %v3606_v25  ;;  %v3631_v41 = vsub.f32 %v29_v14, %v156_v30  ;;  %v3642_v45 = vpack.c.bf16 %v160_v32, %v156_v30  ;;  %v3644_v46 = vsub.f32 %v33_v19, %v160_v32  ;;  %v43_v49 = vld [vmem:[%s5560_s2 + $0xb8] sm:$0xff]  ;;  %v162_v51 = vand.u32 4294901760, %v32_v31  ;;  %v36_v58 = vld [vmem:[%s5560_s2 + $0x80] sm:$0xff] }
   0xa   :  { %6079 = vst [vmem:[#allocation10_spill] sm:$0xff] %v3612_v27  ;;  %6080 = vst [vmem:[#allocation11_spill] sm:$0xff] %v3625_v38  ;;  %v3646_v47 = vpack.c.bf16 %v1444_v34, %v1440_v33  ;;  %v3648_v48 = vsub.f32 %v31_v20, %v1440_v33  ;;  %3131 = vmatpush1.bf16.msra.mxu1 %v3625_v38  ;;  %v3654_v50 = vsub.f32 %v35_v21, %v1444_v34  ;;  %v40_v59 = vld [vmem:[%s5560_s2 + $0xa0] sm:$0xff]  ;;  %v38_v0 = vld [vmem:[%s5560_s2 + $0x90] sm:$0xff] }
   0xb   :  { %6081 = vst [vmem:[#allocation12_spill] sm:$0xff] %v3627_v39  ;;  %6082 = vst [vmem:[#allocation13_spill] sm:$0xff] %v3629_v40  ;;  %v3656_v52 = vsub.f32 %v28_v26, %v158_v35  ;;  %v1442_v53 = vand.u32 4294901760, %v30_v36  ;;  %2749 = vmatprep.subr.bf16.mxu0 %v3642_v45  ;;  %v1446_v54 = vand.u32 4294901760, %v34_v37  ;;  %v164_v55 = vand.u32 4294901760, %v37_v42  ;;  %v42_v1 = vld [vmem:[%s5560_s2 + $0xb0] sm:$0xff] }
   0xc   :  { %6083 = vst [vmem:[#allocation14_spill] sm:$0xff] %v3631_v41  ;;  %6084 = vst [vmem:[#allocation15_spill] sm:$0xff] %v3642_v45  ;;  %3133 = vmatprep.subr.bf16.mxu1 %v3646_v47  ;;  %v168_v56 = vand.u32 4294901760, %v41_v43  ;;  %v1448_v57 = vand.u32 4294901760, %v39_v44  ;;  %v3666_v60 = vpack.c.bf16 %v162_v51, %v158_v35  ;;  %v3668_v61 = vsub.f32 %v32_v31, %v162_v51  ;;  %v45_v2 = vld [vmem:[%s5560_s2 + $0xc8] sm:$0xff]  ;;  %v47_v8 = vld [vmem:[%s5560_s2 + $0xd8] sm:$0xff] }
   0xd   :  { %6085 = vst [vmem:[#allocation16_spill] sm:$0xff] %v3644_v46  ;;  %6086 = vst [vmem:[#allocation17_spill] sm:$0xff] %v3646_v47  ;;  %v3670_v62 = vsub.f32 %v30_v36, %v1442_v53  ;;  %v1452_v63 = vand.u32 4294901760, %v43_v49  ;;  %v3681_v3 = vpack.c.bf16 %v1446_v54, %v1442_v53  ;;  %v3683_v4 = vsub.f32 %v34_v37, %v1446_v54  ;;  %v49_v7 = vld [vmem:[%s5560_s2 + $0xe8] sm:$0xff]  ;;  %v51_v9 = vld [vmem:[%s5560_s2 + $0xf8] sm:$0xff] }
   0xe   :  { %6087 = vst [vmem:[#allocation18_spill] sm:$0xff] %v3648_v48  ;;  %6088 = vst [vmem:[#allocation19_spill] sm:$0xff] %v3654_v50  ;;  %v3685_v5 = vpack.c.bf16 %v168_v56, %v164_v55  ;;  %v3687_v6 = vsub.f32 %v37_v42, %v164_v55  ;;  %2751 = vmatpush1.bf16.msra.mxu0 %v3666_v60  ;;  %v3699_v10 = vsub.f32 %v41_v43, %v168_v56  ;;  %v44_v31 = vld [vmem:[%s5560_s2 + $0xc0] sm:$0xff]  ;;  %v46_v37 = vld [vmem:[%s5560_s2 + $0xd0] sm:$0xff] }
   0xf   :  { %6089 = vst [vmem:[#allocation20_spill] sm:$0xff] %v3656_v52  ;;  %6090 = vst [vmem:[#allocation21_spill] sm:$0xff] %v3666_v60  ;;  %v3701_v11 = vpack.c.bf16 %v1452_v63, %v1448_v57  ;;  %v3703_v12 = vsub.f32 %v39_v44, %v1448_v57  ;;  %v3705_v13 = vsub.f32 %v43_v49, %v1452_v63  ;;  %3135 = vmatpush1.bf16.msra.mxu1 %v3681_v3  ;;  %v48_v36 = vld [vmem:[%s5560_s2 + $0xe0] sm:$0xff]  ;;  %v50_v42 = vld [vmem:[%s5560_s2 + $0xf0] sm:$0xff] }
  0x10   :  { %6091 = vst [vmem:[#allocation22_spill] sm:$0xff] %v3668_v61  ;;  %6092 = vst [vmem:[#allocation23_spill] sm:$0xff] %v3670_v62  ;;  %2753 = vmatprep.subr.bf16.mxu0 %v3685_v5  ;;  %v166_v14 = vand.u32 4294901760, %v36_v58  ;;  %v170_v19 = vand.u32 4294901760, %v40_v59  ;;  %v1450_v20 = vand.u32 4294901760, %v38_v0  ;;  %v1454_v21 = vand.u32 4294901760, %v42_v1 }
  0x11   :  { %6093 = vst [vmem:[#allocation24_spill] sm:$0xff] %v3681_v3  ;;  %6094 = vst [vmem:[#allocation25_spill] sm:$0xff] %v3683_v4  ;;  %3137 = vmatprep.subr.bf16.mxu1 %v3701_v11  ;;  %v172_v26 = vand.u32 4294901760, %v45_v2  ;;  %v176_v28 = vand.u32 4294901760, %v49_v7  ;;  %v1456_v29 = vand.u32 4294901760, %v47_v8  ;;  %v1460_v30 = vand.u32 4294901760, %v51_v9 }
  0x12   :  { %6095 = vst [vmem:[#allocation26_spill] sm:$0xff] %v3685_v5  ;;  %6096 = vst [vmem:[#allocation27_spill] sm:$0xff] %v3687_v6  ;;  %v3713_v32 = vpack.c.bf16 %v170_v19, %v166_v14  ;;  %v3715_v33 = vsub.f32 %v36_v58, %v166_v14  ;;  %v3717_v34 = vsub.f32 %v40_v59, %v170_v19  ;;  %v53_v53 = vld [vmem:[%s5560_s2 + $0x108] sm:$0xff]  ;;  %v55_v55 = vld [vmem:[%s5560_s2 + $0x118] sm:$0xff]  ;;  %v174_v59 = vand.u32 4294901760, %v44_v31 }
  0x13   :  { %6097 = vst [vmem:[#allocation28_spill] sm:$0xff] %v3699_v10  ;;  %6098 = vst [vmem:[#allocation29_spill] sm:$0xff] %v3701_v11  ;;  %v3719_v35 = vpack.c.bf16 %v1454_v21, %v1450_v20  ;;  %v3730_v43 = vsub.f32 %v38_v0, %v1450_v20  ;;  %v3732_v44 = vsub.f32 %v42_v1, %v1454_v21  ;;  %v57_v54 = vld [vmem:[%s5560_s2 + $0x128] sm:$0xff]  ;;  %v178_v0 = vand.u32 4294901760, %v48_v36  ;;  %v59_v14 = vld [vmem:[%s5560_s2 + $0x138] sm:$0xff] }
  0x14   :  { %6099 = vst [vmem:[#allocation30_spill] sm:$0xff] %v3703_v12  ;;  %6100 = vst [vmem:[#allocation31_spill] sm:$0xff] %v3705_v13  ;;  %v3734_v49 = vpack.c.bf16 %v176_v28, %v172_v26  ;;  %v3736_v51 = vsub.f32 %v45_v2, %v172_v26  ;;  %2755 = vmatpush1.bf16.msra.mxu0 %v3713_v32  ;;  %v3749_v56 = vsub.f32 %v49_v7, %v176_v28  ;;  %v52_v21 = vld [vmem:[%s5560_s2 + $0x100] sm:$0xff]  ;;  %v54_v26 = vld [vmem:[%s5560_s2 + $0x110] sm:$0xff] }
  0x15   :  { %6101 = vst [vmem:[#allocation32_spill] sm:$0xff] %v3713_v32  ;;  %6102 = vst [vmem:[#allocation33_spill] sm:$0xff] %v3715_v33  ;;  %3139 = vmatpush1.bf16.msra.mxu1 %v3719_v35  ;;  %v3751_v57 = vpack.c.bf16 %v1460_v30, %v1456_v29  ;;  %v3753_v58 = vsub.f32 %v47_v8, %v1456_v29  ;;  %v3756_v63 = vsub.f32 %v51_v9, %v1460_v30  ;;  %v56_v9 = vld [vmem:[%s5560_s2 + $0x120] sm:$0xff]  ;;  %v62_v47 = vld [vmem:[%s5560_s2 + $0x150] sm:$0xff] }
  0x16   :  { %6103 = vst [vmem:[#allocation34_spill] sm:$0xff] %v3717_v34  ;;  %6104 = vst [vmem:[#allocation35_spill] sm:$0xff] %v3719_v35  ;;  %2757 = vmatprep.subr.bf16.mxu0 %v3734_v49  ;;  %v1458_v1 = vand.u32 4294901760, %v46_v37  ;;  %v1462_v2 = vand.u32 4294901760, %v50_v42  ;;  %v3762_v7 = vsub.f32 %v44_v31, %v174_v59  ;;  %v180_v19 = vand.u32 4294901760, %v53_v53  ;;  %v61_v35 = vld [vmem:[%s5560_s2 + $0x148] sm:$0xff] }
  0x17   :  { %6105 = vst [vmem:[#allocation36_spill] sm:$0xff] %v3730_v43  ;;  %6106 = vst [vmem:[#allocation37_spill] sm:$0xff] %v3732_v44  ;;  %3141 = vmatprep.subr.bf16.mxu1 %v3751_v57  ;;  %v184_v20 = vand.u32 4294901760, %v57_v54  ;;  %v1464_v8 = vand.u32 4294901760, %v55_v55  ;;  %v3773_v28 = vpack.c.bf16 %v178_v0, %v174_v59  ;;  %v3775_v29 = vsub.f32 %v48_v36, %v178_v0  ;;  %v69_v38 = vld [vmem:[%s5560_s2 + $0x188] sm:$0xff] }
  0x18   :  { %6107 = vst [vmem:[#allocation38_spill] sm:$0xff] %v3734_v49  ;;  %6108 = vst [vmem:[#allocation39_spill] sm:$0xff] %v3736_v51  ;;  %v3777_v30 = vpack.c.bf16 %v1462_v2, %v1458_v1  ;;  %v3779_v31 = vsub.f32 %v46_v37, %v1458_v1  ;;  %v65_v49 = vld [vmem:[%s5560_s2 + $0x168] sm:$0xff]  ;;  %v3790_v59 = vsub.f32 %v50_v42, %v1462_v2  ;;  %v1468_v1 = vand.u32 4294901760, %v59_v14 }
  0x19   :  { %6109 = vst [vmem:[#allocation40_spill] sm:$0xff] %v3749_v56  ;;  %6110 = vst [vmem:[#allocation41_spill] sm:$0xff] %v3751_v57  ;;  %v58_v57 = vld [vmem:[%s5560_s2 + $0x130] sm:$0xff]  ;;  %v3792_v36 = vpack.c.bf16 %v184_v20, %v180_v19  ;;  %v3794_v0 = vsub.f32 %v53_v53, %v180_v19  ;;  %v3796_v37 = vsub.f32 %v57_v54, %v184_v20  ;;  %2759 = vmatpush1.bf16.msra.mxu0 %v3773_v28  ;;  %v63_v53 = vld [vmem:[%s5560_s2 + $0x158] sm:$0xff] }
  0x1a   :  { %6111 = vst [vmem:[#allocation42_spill] sm:$0xff] %v3753_v58  ;;  %6112 = vst [vmem:[#allocation43_spill] sm:$0xff] %v3756_v63  ;;  %3143 = vmatpush1.bf16.msra.mxu1 %v3777_v30  ;;  %v3800_v32 = vsub.f32 %v55_v55, %v1464_v8  ;;  %v182_v11 = vand.u32 4294901760, %v52_v21  ;;  %v186_v3 = vand.u32 4294901760, %v56_v9  ;;  %v1466_v5 = vand.u32 4294901760, %v54_v26  ;;  %v67_v54 = vld [vmem:[%s5560_s2 + $0x178] sm:$0xff] }
  0x1b   :  { %6113 = vst [vmem:[#allocation44_spill] sm:$0xff] %v3762_v7  ;;  %6114 = vst [vmem:[#allocation45_spill] sm:$0xff] %v3773_v28  ;;  %2761 = vmatprep.subr.bf16.mxu0 %v3792_v36  ;;  %v1470_v42 = vand.u32 4294901760, %v58_v57  ;;  %v188_v2 = vand.u32 4294901760, %v61_v35  ;;  %v192_v60 = vand.u32 4294901760, %v65_v49  ;;  %v3809_v19 = vpack.c.bf16 %v1468_v1, %v1464_v8  ;;  %v64_v28 = vld [vmem:[%s5560_s2 + $0x160] sm:$0xff] }
  0x1c   :  { %6115 = vst [vmem:[#allocation46_spill] sm:$0xff] %v3775_v29  ;;  %6116 = vst [vmem:[#allocation47_spill] sm:$0xff] %v3777_v30  ;;  %v3811_v55 = vsub.f32 %v59_v14, %v1468_v1  ;;  %v3813_v20 = vpack.c.bf16 %v186_v3, %v182_v11  ;;  %v3815_v30 = vsub.f32 %v52_v21, %v182_v11  ;;  %v66_v21 = vld [vmem:[%s5560_s2 + $0x170] sm:$0xff]  ;;  %v73_v45 = vld [vmem:[%s5560_s2 + $0x1a8] sm:$0xff]  ;;  %v194_v24 = vand.u32 4294901760, %v64_v28 }
  0x1d   :  { %6117 = vst [vmem:[#allocation48_spill] sm:$0xff] %v3779_v31  ;;  %6118 = vst [vmem:[#allocation49_spill] sm:$0xff] %v3790_v59  ;;  %v3826_v8 = vsub.f32 %v56_v9, %v186_v3  ;;  %v3828_v14 = vpack.c.bf16 %v1470_v42, %v1466_v5  ;;  %v3830_v1 = vsub.f32 %v54_v26, %v1466_v5  ;;  %3145 = vmatprep.subr.bf16.mxu1 %v3809_v19 }
  0x1e   :  { %6119 = vst [vmem:[#allocation50_spill] sm:$0xff] %v3792_v36  ;;  %6120 = vst [vmem:[#allocation51_spill] sm:$0xff] %v3794_v0  ;;  %v60_v36 = vld [vmem:[%s5560_s2 + $0x140] sm:$0xff]  ;;  %v3832_v11 = vsub.f32 %v58_v57, %v1470_v42  ;;  %2763 = vmatpush1.bf16.msra.mxu0 %v3813_v20  ;;  %v3845_v3 = vpack.c.bf16 %v192_v60, %v188_v2  ;;  %v3847_v5 = vsub.f32 %v61_v35, %v188_v2  ;;  %v71_v35 = vld [vmem:[%s5560_s2 + $0x198] sm:$0xff] }
  0x1f   :  { %6121 = vst [vmem:[#allocation52_spill] sm:$0xff] %v3796_v37  ;;  %6122 = vst [vmem:[#allocation53_spill] sm:$0xff] %v3800_v32  ;;  %v3849_v57 = vsub.f32 %v65_v49, %v192_v60  ;;  %v1472_v9 = vand.u32 4294901760, %v63_v53  ;;  %3147 = vmatpush1.bf16.msra.mxu1 %v3828_v14  ;;  %v1476_v26 = vand.u32 4294901760, %v67_v54  ;;  %v190_v42 = vand.u32 4294901760, %v60_v36  ;;  %v75_v60 = vld [vmem:[%s5560_s2 + $0x1b8] sm:$0xff] }
  0x20   :  { %6123 = vst [vmem:[#allocation54_spill] sm:$0xff] %v3809_v19  ;;  %6124 = vst [vmem:[#allocation55_spill] sm:$0xff] %v3811_v55  ;;  %v1474_v22 = vand.u32 4294901760, %v62_v47  ;;  %2765 = vmatprep.subr.bf16.mxu0 %v3845_v3  ;;  %v1478_v19 = vand.u32 4294901760, %v66_v21 }
  0x21   :  { %6125 = vst [vmem:[#allocation56_spill] sm:$0xff] %v3813_v20  ;;  %6126 = vst [vmem:[#allocation57_spill] sm:$0xff] %v3815_v30  ;;  %v3853_v15 = vsub.f32 %v63_v53, %v1472_v9  ;;  %v200_v20 = vand.u32 4294901760, %v73_v45  ;;  %v3861_v49 = vpack.c.bf16 %v1476_v26, %v1472_v9  ;;  %v3863_v2 = vsub.f32 %v67_v54, %v1476_v26  ;;  %v68_v53 = vld [vmem:[%s5560_s2 + $0x180] sm:$0xff] }
  0x22   :  { %6127 = vst [vmem:[#allocation58_spill] sm:$0xff] %v3826_v8  ;;  %6128 = vst [vmem:[#allocation59_spill] sm:$0xff] %v3828_v14  ;;  %v3865_v14 = vpack.c.bf16 %v194_v24, %v190_v42  ;;  %v3878_v9 = vsub.f32 %v64_v28, %v194_v24  ;;  %v3880_v54 = vpack.c.bf16 %v1478_v19, %v1474_v22  ;;  %v1480_v28 = vand.u32 4294901760, %v71_v35 }
  0x23   :  { %6129 = vst [vmem:[#allocation60_spill] sm:$0xff] %v3830_v1  ;;  %6130 = vst [vmem:[#allocation61_spill] sm:$0xff] %v3832_v11  ;;  %v196_v11 = vand.u32 4294901760, %v69_v38  ;;  %v3882_v26 = vsub.f32 %v62_v47, %v1474_v22  ;;  %3149 = vmatprep.subr.bf16.mxu1 %v3861_v49  ;;  %v3901_v47 = vsub.f32 %v73_v45, %v200_v20  ;;  %v83_v45 = vld [vmem:[%s5560_s2 + $0x1f8] sm:$0xff] }
  0x24   :  { %6131 = vst [vmem:[#allocation62_spill] sm:$0xff] %v3845_v3  ;;  %6132 = vst [vmem:[#allocation63_spill] sm:$0xff] %v3847_v5  ;;  %v3867_v3 = vsub.f32 %v60_v36, %v190_v42  ;;  %v3884_v36 = vsub.f32 %v66_v21, %v1478_v19  ;;  %v74_v42 = vld [vmem:[%s5560_s2 + $0x1b0] sm:$0xff]  ;;  %2767 = vmatpush1.bf16.msra.mxu0 %v3865_v14  ;;  %3151 = vmatpush1.bf16.msra.mxu1 %v3880_v54  ;;  %v1484_v19 = vand.u32 4294901760, %v75_v60 }
  0x25   :  { %6133 = vst [vmem:[#allocation64_spill] sm:$0xff] %v3849_v57  ;;  %6134 = vst [vmem:[#allocation65_spill] sm:$0xff] %v3853_v15  ;;  %v72_v15 = vld [vmem:[%s5560_s2 + $0x1a0] sm:$0xff]  ;;  %v70_v57 = vld [vmem:[%s5560_s2 + $0x190] sm:$0xff]  ;;  %v3897_v22 = vpack.c.bf16 %v200_v20, %v196_v11  ;;  %v3899_v24 = vsub.f32 %v69_v38, %v196_v11  ;;  %v198_v21 = vand.u32 4294901760, %v68_v53 }
  0x26   :  { %6135 = vst [vmem:[#allocation66_spill] sm:$0xff] %v3861_v49  ;;  %6136 = vst [vmem:[#allocation67_spill] sm:$0xff] %v3863_v2  ;;  %v81_v2 = vld [vmem:[%s5560_s2 + $0x1e8] sm:$0xff]  ;;  %v1486_v49 = vand.u32 4294901760, %v74_v42  ;;  %v79_v38 = vld [vmem:[%s5560_s2 + $0x1d8] sm:$0xff]  ;;  %v3913_v20 = vpack.c.bf16 %v1484_v19, %v1480_v28  ;;  %v3915_v11 = vsub.f32 %v75_v60, %v1484_v19 }
  0x27   :  { %6137 = vst [vmem:[#allocation68_spill] sm:$0xff] %v3865_v14  ;;  %6138 = vst [vmem:[#allocation69_spill] sm:$0xff] %v3867_v3  ;;  %v77_v3 = vld [vmem:[%s5560_s2 + $0x1c8] sm:$0xff]  ;;  %2769 = vmatprep.subr.bf16.mxu0 %v3897_v22  ;;  %v208_v14 = vand.u32 4294901760, %v81_v2 }
  0x28   :  { %6139 = vst [vmem:[#allocation70_spill] sm:$0xff] %v3878_v9  ;;  %6140 = vst [vmem:[#allocation71_spill] sm:$0xff] %v3880_v54  ;;  %v3905_v9 = vsub.f32 %v71_v35, %v1480_v28  ;;  %v204_v5 = vand.u32 4294901760, %v77_v3  ;;  %v76_v35 = vld [vmem:[%s5560_s2 + $0x1c0] sm:$0xff]  ;;  %3153 = vmatprep.subr.bf16.mxu1 %v3913_v20 }
  0x29   :  { %6141 = vst [vmem:[#allocation72_spill] sm:$0xff] %v3882_v26  ;;  %6142 = vst [vmem:[#allocation73_spill] sm:$0xff] %v3884_v36  ;;  %v202_v36 = vand.u32 4294901760, %v72_v15  ;;  %v1482_v26 = vand.u32 4294901760, %v70_v57 }
  0x2a   :  { %6143 = vst [vmem:[#allocation74_spill] sm:$0xff] %v3897_v22  ;;  %6144 = vst [vmem:[#allocation75_spill] sm:$0xff] %v3899_v24  ;;  %v3919_v22 = vsub.f32 %v68_v53, %v198_v21  ;;  %v3936_v53 = vsub.f32 %v74_v42, %v1486_v49  ;;  %v206_v42 = vand.u32 4294901760, %v76_v35 }
  0x2b   :  { %6145 = vst [vmem:[#allocation76_spill] sm:$0xff] %v3901_v47  ;;  %6146 = vst [vmem:[#allocation77_spill] sm:$0xff] %v3905_v9  ;;  %v3917_v54 = vpack.c.bf16 %v202_v36, %v198_v21  ;;  %v80_v9 = vld [vmem:[%s5560_s2 + $0x1e0] sm:$0xff]  ;;  %v78_v47 = vld [vmem:[%s5560_s2 + $0x1d0] sm:$0xff]  ;;  %v3930_v28 = vsub.f32 %v72_v15, %v202_v36  ;;  %v3932_v60 = vpack.c.bf16 %v1486_v49, %v1482_v26  ;;  %v1492_v36 = vand.u32 4294901760, %v83_v45 }
  0x2c   :  { %6147 = vst [vmem:[#allocation78_spill] sm:$0xff] %v3913_v20  ;;  %6148 = vst [vmem:[#allocation79_spill] sm:$0xff] %v3915_v11  ;;  %v3934_v19 = vsub.f32 %v70_v57, %v1482_v26  ;;  %v82_v21 = vld [vmem:[%s5560_s2 + $0x1f0] sm:$0xff]  ;;  %v89_v11 = vld [vmem:[%s5560_s2 + $0x228] sm:$0xff]  ;;  %v3949_v15 = vpack.c.bf16 %v208_v14, %v204_v5  ;;  %v3951_v57 = vsub.f32 %v77_v3, %v204_v5  ;;  %v1488_v26 = vand.u32 4294901760, %v79_v38 }
  0x2d   :  { %6149 = vst [vmem:[#allocation80_spill] sm:$0xff] %v3917_v54  ;;  %6150 = vst [vmem:[#allocation81_spill] sm:$0xff] %v3919_v22  ;;  %v85_v22 = vld [vmem:[%s5560_s2 + $0x208] sm:$0xff]  ;;  %2771 = vmatpush1.bf16.msra.mxu0 %v3917_v54  ;;  %v3953_v49 = vsub.f32 %v81_v2, %v208_v14  ;;  %3155 = vmatpush1.bf16.msra.mxu1 %v3932_v60  ;;  %v1494_v20 = vand.u32 4294901760, %v82_v21  ;;  %v216_v54 = vand.u32 4294901760, %v89_v11  ;;  %v87_v3 = vld [vmem:[%s5560_s2 + $0x218] sm:$0xff] }
  0x2e   :  { %6151 = vst [vmem:[#allocation82_spill] sm:$0xff] %v3930_v28  ;;  %6152 = vst [vmem:[#allocation83_spill] sm:$0xff] %v3932_v60  ;;  %2773 = vmatprep.subr.bf16.mxu0 %v3949_v15  ;;  %v3957_v28 = vsub.f32 %v79_v38, %v1488_v26  ;;  %v212_v24 = vand.u32 4294901760, %v85_v22  ;;  %v91_v14 = vld [vmem:[%s5560_s2 + $0x238] sm:$0xff]  ;;  %v3965_v5 = vpack.c.bf16 %v1492_v36, %v1488_v26  ;;  %v84_v38 = vld [vmem:[%s5560_s2 + $0x200] sm:$0xff] }
  0x2f   :  { %6153 = vst [vmem:[#allocation84_spill] sm:$0xff] %v3934_v19  ;;  %6154 = vst [vmem:[#allocation85_spill] sm:$0xff] %v3936_v53  ;;  %v210_v53 = vand.u32 4294901760, %v80_v9  ;;  %v1490_v19 = vand.u32 4294901760, %v78_v47  ;;  %v3967_v2 = vsub.f32 %v83_v45, %v1492_v36 }
  0x30   :  { %6155 = vst [vmem:[#allocation86_spill] sm:$0xff] %v3949_v15  ;;  %6156 = vst [vmem:[#allocation87_spill] sm:$0xff] %v3951_v57  ;;  %v3971_v15 = vsub.f32 %v76_v35, %v206_v42  ;;  %v3988_v35 = vsub.f32 %v82_v21, %v1494_v20  ;;  %3157 = vmatprep.subr.bf16.mxu1 %v3965_v5  ;;  %v214_v21 = vand.u32 4294901760, %v84_v38 }
  0x31   :  { %6157 = vst [vmem:[#allocation88_spill] sm:$0xff] %v3953_v49  ;;  %6158 = vst [vmem:[#allocation89_spill] sm:$0xff] %v3957_v28  ;;  %v3969_v60 = vpack.c.bf16 %v210_v53, %v206_v42  ;;  %v88_v28 = vld [vmem:[%s5560_s2 + $0x220] sm:$0xff]  ;;  %v86_v49 = vld [vmem:[%s5560_s2 + $0x210] sm:$0xff]  ;;  %v3982_v26 = vsub.f32 %v80_v9, %v210_v53  ;;  %v3984_v45 = vpack.c.bf16 %v1494_v20, %v1490_v19  ;;  %v1500_v53 = vand.u32 4294901760, %v91_v14 }
  0x32   :  { %6159 = vst [vmem:[#allocation90_spill] sm:$0xff] %v3965_v5  ;;  %6160 = vst [vmem:[#allocation91_spill] sm:$0xff] %v3967_v2  ;;  %v3986_v36 = vsub.f32 %v78_v47, %v1490_v19  ;;  %v90_v42 = vld [vmem:[%s5560_s2 + $0x230] sm:$0xff]  ;;  %v97_v2 = vld [vmem:[%s5560_s2 + $0x268] sm:$0xff]  ;;  %v4001_v9 = vpack.c.bf16 %v216_v54, %v212_v24  ;;  %v4003_v47 = vsub.f32 %v85_v22, %v212_v24  ;;  %v1496_v19 = vand.u32 4294901760, %v87_v3 }
  0x33   :  { %6161 = vst [vmem:[#allocation92_spill] sm:$0xff] %v3969_v60  ;;  %6162 = vst [vmem:[#allocation93_spill] sm:$0xff] %v3971_v15  ;;  %v93_v15 = vld [vmem:[%s5560_s2 + $0x248] sm:$0xff]  ;;  %2775 = vmatpush1.bf16.msra.mxu0 %v3969_v60  ;;  %v4005_v20 = vsub.f32 %v89_v11, %v216_v54  ;;  %3159 = vmatpush1.bf16.msra.mxu1 %v3984_v45  ;;  %v1502_v5 = vand.u32 4294901760, %v90_v42  ;;  %v224_v60 = vand.u32 4294901760, %v97_v2  ;;  %v95_v22 = vld [vmem:[%s5560_s2 + $0x258] sm:$0xff] }
  0x34   :  { %6163 = vst [vmem:[#allocation94_spill] sm:$0xff] %v3982_v26  ;;  %6164 = vst [vmem:[#allocation95_spill] sm:$0xff] %v3984_v45  ;;  %2777 = vmatprep.subr.bf16.mxu0 %v4001_v9  ;;  %v4009_v26 = vsub.f32 %v87_v3, %v1496_v19  ;;  %v220_v57 = vand.u32 4294901760, %v93_v15  ;;  %v99_v54 = vld [vmem:[%s5560_s2 + $0x278] sm:$0xff]  ;;  %v4017_v24 = vpack.c.bf16 %v1500_v53, %v1496_v19  ;;  %v92_v3 = vld [vmem:[%s5560_s2 + $0x240] sm:$0xff] }
  0x35   :  { %6165 = vst [vmem:[#allocation96_spill] sm:$0xff] %v3986_v36  ;;  %6166 = vst [vmem:[#allocation97_spill] sm:$0xff] %v3988_v35  ;;  %v218_v35 = vand.u32 4294901760, %v88_v28  ;;  %v1498_v36 = vand.u32 4294901760, %v86_v49  ;;  %v4019_v11 = vsub.f32 %v91_v14, %v1500_v53 }
  0x36   :  { %6167 = vst [vmem:[#allocation98_spill] sm:$0xff] %v4001_v9  ;;  %6168 = vst [vmem:[#allocation99_spill] sm:$0xff] %v4003_v47  ;;  %v4023_v9 = vsub.f32 %v84_v38, %v214_v21  ;;  %v4040_v38 = vsub.f32 %v90_v42, %v1502_v5  ;;  %3161 = vmatprep.subr.bf16.mxu1 %v4017_v24  ;;  %v222_v42 = vand.u32 4294901760, %v92_v3 }
  0x37   :  { %6169 = vst [vmem:[#allocation100_spill] sm:$0xff] %v4005_v20  ;;  %6170 = vst [vmem:[#allocation101_spill] sm:$0xff] %v4009_v26  ;;  %v4021_v45 = vpack.c.bf16 %v218_v35, %v214_v21  ;;  %v96_v26 = vld [vmem:[%s5560_s2 + $0x260] sm:$0xff]  ;;  %v94_v20 = vld [vmem:[%s5560_s2 + $0x250] sm:$0xff]  ;;  %v4034_v19 = vsub.f32 %v88_v28, %v218_v35  ;;  %v4036_v14 = vpack.c.bf16 %v1502_v5, %v1498_v36  ;;  %v1508_v35 = vand.u32 4294901760, %v99_v54 }
  0x38   :  { %6171 = vst [vmem:[#allocation102_spill] sm:$0xff] %v4017_v24  ;;  %6172 = vst [vmem:[#allocation103_spill] sm:$0xff] %v4019_v11  ;;  %v4038_v53 = vsub.f32 %v86_v49, %v1498_v36  ;;  %v98_v21 = vld [vmem:[%s5560_s2 + $0x270] sm:$0xff]  ;;  %v105_v11 = vld [vmem:[%s5560_s2 + $0x2a8] sm:$0xff]  ;;  %v4053_v28 = vpack.c.bf16 %v224_v60, %v220_v57  ;;  %v4055_v49 = vsub.f32 %v93_v15, %v220_v57  ;;  %v1504_v36 = vand.u32 4294901760, %v95_v22 }
  0x39   :  { %6173 = vst [vmem:[#allocation104_spill] sm:$0xff] %v4021_v45  ;;  %6174 = vst [vmem:[#allocation105_spill] sm:$0xff] %v4023_v9  ;;  %v101_v9 = vld [vmem:[%s5560_s2 + $0x288] sm:$0xff]  ;;  %2779 = vmatpush1.bf16.msra.mxu0 %v4021_v45  ;;  %v4057_v5 = vsub.f32 %v97_v2, %v224_v60  ;;  %3163 = vmatpush1.bf16.msra.mxu1 %v4036_v14  ;;  %v1510_v24 = vand.u32 4294901760, %v98_v21  ;;  %v232_v45 = vand.u32 4294901760, %v105_v11  ;;  %v103_v15 = vld [vmem:[%s5560_s2 + $0x298] sm:$0xff] }
  0x3a   :  { %6175 = vst [vmem:[#allocation106_spill] sm:$0xff] %v4034_v19  ;;  %6176 = vst [vmem:[#allocation107_spill] sm:$0xff] %v4036_v14  ;;  %2781 = vmatprep.subr.bf16.mxu0 %v4053_v28  ;;  %v4061_v19 = vsub.f32 %v95_v22, %v1504_v36  ;;  %v228_v47 = vand.u32 4294901760, %v101_v9  ;;  %v107_v60 = vld [vmem:[%s5560_s2 + $0x2b8] sm:$0xff]  ;;  %v4069_v57 = vpack.c.bf16 %v1508_v35, %v1504_v36  ;;  %v100_v22 = vld [vmem:[%s5560_s2 + $0x280] sm:$0xff] }
  0x3b   :  { %6177 = vst [vmem:[#allocation108_spill] sm:$0xff] %v4038_v53  ;;  %6178 = vst [vmem:[#allocation109_spill] sm:$0xff] %v4040_v38  ;;  %v226_v38 = vand.u32 4294901760, %v96_v26  ;;  %v1506_v53 = vand.u32 4294901760, %v94_v20  ;;  %v4071_v2 = vsub.f32 %v99_v54, %v1508_v35 }
  0x3c   :  { %6179 = vst [vmem:[#allocation110_spill] sm:$0xff] %v4053_v28  ;;  %6180 = vst [vmem:[#allocation111_spill] sm:$0xff] %v4055_v49  ;;  %v4075_v28 = vsub.f32 %v92_v3, %v222_v42  ;;  %v4092_v3 = vsub.f32 %v98_v21, %v1510_v24  ;;  %3165 = vmatprep.subr.bf16.mxu1 %v4069_v57  ;;  %v230_v21 = vand.u32 4294901760, %v100_v22 }
  0x3d   :  { %6181 = vst [vmem:[#allocation112_spill] sm:$0xff] %v4057_v5  ;;  %6182 = vst [vmem:[#allocation113_spill] sm:$0xff] %v4061_v19  ;;  %v4073_v14 = vpack.c.bf16 %v226_v38, %v222_v42  ;;  %v104_v19 = vld [vmem:[%s5560_s2 + $0x2a0] sm:$0xff]  ;;  %v102_v5 = vld [vmem:[%s5560_s2 + $0x290] sm:$0xff]  ;;  %v4086_v36 = vsub.f32 %v96_v26, %v226_v38  ;;  %v4088_v54 = vpack.c.bf16 %v1510_v24, %v1506_v53  ;;  %v1516_v38 = vand.u32 4294901760, %v107_v60 }
  0x3e   :  { %6183 = vst [vmem:[#allocation114_spill] sm:$0xff] %v4069_v57  ;;  %6184 = vst [vmem:[#allocation115_spill] sm:$0xff] %v4071_v2  ;;  %v4090_v35 = vsub.f32 %v94_v20, %v1506_v53  ;;  %v106_v42 = vld [vmem:[%s5560_s2 + $0x2b0] sm:$0xff]  ;;  %v113_v2 = vld [vmem:[%s5560_s2 + $0x2e8] sm:$0xff]  ;;  %v4105_v26 = vpack.c.bf16 %v232_v45, %v228_v47  ;;  %v4107_v20 = vsub.f32 %v101_v9, %v228_v47  ;;  %v1512_v53 = vand.u32 4294901760, %v103_v15 }
  0x3f   :  { %6185 = vst [vmem:[#allocation116_spill] sm:$0xff] %v4073_v14  ;;  %6186 = vst [vmem:[#allocation117_spill] sm:$0xff] %v4075_v28  ;;  %v109_v28 = vld [vmem:[%s5560_s2 + $0x2c8] sm:$0xff]  ;;  %2783 = vmatpush1.bf16.msra.mxu0 %v4073_v14  ;;  %v4109_v24 = vsub.f32 %v105_v11, %v232_v45  ;;  %3167 = vmatpush1.bf16.msra.mxu1 %v4088_v54  ;;  %v1518_v57 = vand.u32 4294901760, %v106_v42  ;;  %v240_v14 = vand.u32 4294901760, %v113_v2  ;;  %v111_v9 = vld [vmem:[%s5560_s2 + $0x2d8] sm:$0xff] }
  0x40   :  { %6187 = vst [vmem:[#allocation118_spill] sm:$0xff] %v4086_v36  ;;  %6188 = vst [vmem:[#allocation119_spill] sm:$0xff] %v4088_v54  ;;  %2785 = vmatprep.subr.bf16.mxu0 %v4105_v26  ;;  %v4113_v36 = vsub.f32 %v103_v15, %v1512_v53  ;;  %v236_v49 = vand.u32 4294901760, %v109_v28  ;;  %v115_v45 = vld [vmem:[%s5560_s2 + $0x2f8] sm:$0xff]  ;;  %v4121_v47 = vpack.c.bf16 %v1516_v38, %v1512_v53  ;;  %v108_v15 = vld [vmem:[%s5560_s2 + $0x2c0] sm:$0xff] }
  0x41   :  { %6189 = vst [vmem:[#allocation120_spill] sm:$0xff] %v4090_v35  ;;  %6190 = vst [vmem:[#allocation121_spill] sm:$0xff] %v4092_v3  ;;  %v234_v3 = vand.u32 4294901760, %v104_v19  ;;  %v1514_v35 = vand.u32 4294901760, %v102_v5  ;;  %v4123_v11 = vsub.f32 %v107_v60, %v1516_v38 }
  0x42   :  { %6191 = vst [vmem:[#allocation122_spill] sm:$0xff] %v4105_v26  ;;  %6192 = vst [vmem:[#allocation123_spill] sm:$0xff] %v4107_v20  ;;  %v4127_v26 = vsub.f32 %v100_v22, %v230_v21  ;;  %v4144_v22 = vsub.f32 %v106_v42, %v1518_v57  ;;  %3169 = vmatprep.subr.bf16.mxu1 %v4121_v47  ;;  %v238_v42 = vand.u32 4294901760, %v108_v15 }
  0x43   :  { %6193 = vst [vmem:[#allocation124_spill] sm:$0xff] %v4109_v24  ;;  %6194 = vst [vmem:[#allocation125_spill] sm:$0xff] %v4113_v36  ;;  %v4125_v54 = vpack.c.bf16 %v234_v3, %v230_v21  ;;  %v112_v36 = vld [vmem:[%s5560_s2 + $0x2e0] sm:$0xff]  ;;  %v110_v24 = vld [vmem:[%s5560_s2 + $0x2d0] sm:$0xff]  ;;  %v4138_v53 = vsub.f32 %v104_v19, %v234_v3  ;;  %v4140_v60 = vpack.c.bf16 %v1518_v57, %v1514_v35  ;;  %v1524_v3 = vand.u32 4294901760, %v115_v45 }
  0x44   :  { %6195 = vst [vmem:[#allocation126_spill] sm:$0xff] %v4121_v47  ;;  %6196 = vst [vmem:[#allocation127_spill] sm:$0xff] %v4123_v11  ;;  %v4142_v38 = vsub.f32 %v102_v5, %v1514_v35  ;;  %v114_v21 = vld [vmem:[%s5560_s2 + $0x2f0] sm:$0xff]  ;;  %v121_v11 = vld [vmem:[%s5560_s2 + $0x328] sm:$0xff]  ;;  %v4157_v19 = vpack.c.bf16 %v240_v14, %v236_v49  ;;  %v4159_v5 = vsub.f32 %v109_v28, %v236_v49  ;;  %v1520_v35 = vand.u32 4294901760, %v111_v9 }
  0x45   :  { %6197 = vst [vmem:[#allocation128_spill] sm:$0xff] %v4125_v54  ;;  %6198 = vst [vmem:[#allocation129_spill] sm:$0xff] %v4127_v26  ;;  %v117_v26 = vld [vmem:[%s5560_s2 + $0x308] sm:$0xff]  ;;  %2787 = vmatpush1.bf16.msra.mxu0 %v4125_v54  ;;  %v4161_v57 = vsub.f32 %v113_v2, %v240_v14  ;;  %3171 = vmatpush1.bf16.msra.mxu1 %v4140_v60  ;;  %v1526_v47 = vand.u32 4294901760, %v114_v21  ;;  %v248_v54 = vand.u32 4294901760, %v121_v11  ;;  %v119_v28 = vld [vmem:[%s5560_s2 + $0x318] sm:$0xff] }
  0x46   :  { %6199 = vst [vmem:[#allocation130_spill] sm:$0xff] %v4138_v53  ;;  %6200 = vst [vmem:[#allocation131_spill] sm:$0xff] %v4140_v60  ;;  %2789 = vmatprep.subr.bf16.mxu0 %v4157_v19  ;;  %v4165_v53 = vsub.f32 %v111_v9, %v1520_v35  ;;  %v244_v20 = vand.u32 4294901760, %v117_v26  ;;  %v123_v14 = vld [vmem:[%s5560_s2 + $0x338] sm:$0xff]  ;;  %v4173_v49 = vpack.c.bf16 %v1524_v3, %v1520_v35  ;;  %v116_v9 = vld [vmem:[%s5560_s2 + $0x300] sm:$0xff] }
  0x47   :  { %6201 = vst [vmem:[#allocation132_spill] sm:$0xff] %v4142_v38  ;;  %6202 = vst [vmem:[#allocation133_spill] sm:$0xff] %v4144_v22  ;;  %v242_v22 = vand.u32 4294901760, %v112_v36  ;;  %v1522_v38 = vand.u32 4294901760, %v110_v24  ;;  %v4175_v2 = vsub.f32 %v115_v45, %v1524_v3 }
  0x48   :  { %6203 = vst [vmem:[#allocation134_spill] sm:$0xff] %v4157_v19  ;;  %6204 = vst [vmem:[#allocation135_spill] sm:$0xff] %v4159_v5  ;;  %v4179_v19 = vsub.f32 %v108_v15, %v238_v42  ;;  %v4196_v15 = vsub.f32 %v114_v21, %v1526_v47  ;;  %3173 = vmatprep.subr.bf16.mxu1 %v4173_v49  ;;  %v246_v21 = vand.u32 4294901760, %v116_v9 }
  0x49   :  { %6205 = vst [vmem:[#allocation136_spill] sm:$0xff] %v4161_v57  ;;  %6206 = vst [vmem:[#allocation137_spill] sm:$0xff] %v4165_v53  ;;  %v4177_v60 = vpack.c.bf16 %v242_v22, %v238_v42  ;;  %v120_v53 = vld [vmem:[%s5560_s2 + $0x320] sm:$0xff]  ;;  %v118_v57 = vld [vmem:[%s5560_s2 + $0x310] sm:$0xff]  ;;  %v4190_v35 = vsub.f32 %v112_v36, %v242_v22  ;;  %v4192_v45 = vpack.c.bf16 %v1526_v47, %v1522_v38  ;;  %v1532_v22 = vand.u32 4294901760, %v123_v14 }
  0x4a   :  { %6207 = vst [vmem:[#allocation138_spill] sm:$0xff] %v4173_v49  ;;  %6208 = vst [vmem:[#allocation139_spill] sm:$0xff] %v4175_v2  ;;  %v4194_v3 = vsub.f32 %v110_v24, %v1522_v38  ;;  %v122_v42 = vld [vmem:[%s5560_s2 + $0x330] sm:$0xff]  ;;  %v129_v2 = vld [vmem:[%s5560_s2 + $0x368] sm:$0xff]  ;;  %v4209_v36 = vpack.c.bf16 %v248_v54, %v244_v20  ;;  %v4211_v24 = vsub.f32 %v117_v26, %v244_v20  ;;  %v1528_v38 = vand.u32 4294901760, %v119_v28 }
  0x4b   :  { %6209 = vst [vmem:[#allocation140_spill] sm:$0xff] %v4177_v60  ;;  %6210 = vst [vmem:[#allocation141_spill] sm:$0xff] %v4179_v19  ;;  %v125_v19 = vld [vmem:[%s5560_s2 + $0x348] sm:$0xff]  ;;  %2791 = vmatpush1.bf16.msra.mxu0 %v4177_v60  ;;  %v4213_v47 = vsub.f32 %v121_v11, %v248_v54  ;;  %3175 = vmatpush1.bf16.msra.mxu1 %v4192_v45  ;;  %v1534_v49 = vand.u32 4294901760, %v122_v42  ;;  %v256_v60 = vand.u32 4294901760, %v129_v2  ;;  %v127_v26 = vld [vmem:[%s5560_s2 + $0x358] sm:$0xff] }
  0x4c   :  { %6211 = vst [vmem:[#allocation142_spill] sm:$0xff] %v4190_v35  ;;  %6212 = vst [vmem:[#allocation143_spill] sm:$0xff] %v4192_v45  ;;  %2793 = vmatprep.subr.bf16.mxu0 %v4209_v36  ;;  %v4217_v35 = vsub.f32 %v119_v28, %v1528_v38  ;;  %v252_v5 = vand.u32 4294901760, %v125_v19  ;;  %v131_v54 = vld [vmem:[%s5560_s2 + $0x378] sm:$0xff]  ;;  %v4225_v20 = vpack.c.bf16 %v1532_v22, %v1528_v38  ;;  %v124_v28 = vld [vmem:[%s5560_s2 + $0x340] sm:$0xff] }
  0x4d   :  { %6213 = vst [vmem:[#allocation144_spill] sm:$0xff] %v4194_v3  ;;  %6214 = vst [vmem:[#allocation145_spill] sm:$0xff] %v4196_v15  ;;  %v250_v15 = vand.u32 4294901760, %v120_v53  ;;  %v1530_v3 = vand.u32 4294901760, %v118_v57  ;;  %v4227_v11 = vsub.f32 %v123_v14, %v1532_v22 }
  0x4e   :  { %6215 = vst [vmem:[#allocation146_spill] sm:$0xff] %v4209_v36  ;;  %6216 = vst [vmem:[#allocation147_spill] sm:$0xff] %v4211_v24  ;;  %v4231_v36 = vsub.f32 %v116_v9, %v246_v21  ;;  %v4248_v9 = vsub.f32 %v122_v42, %v1534_v49  ;;  %3177 = vmatprep.subr.bf16.mxu1 %v4225_v20  ;;  %v254_v42 = vand.u32 4294901760, %v124_v28 }
  0x4f   :  { %6217 = vst [vmem:[#allocation148_spill] sm:$0xff] %v4213_v47  ;;  %6218 = vst [vmem:[#allocation149_spill] sm:$0xff] %v4217_v35  ;;  %v4229_v45 = vpack.c.bf16 %v250_v15, %v246_v21  ;;  %v128_v35 = vld [vmem:[%s5560_s2 + $0x360] sm:$0xff]  ;;  %v126_v47 = vld [vmem:[%s5560_s2 + $0x350] sm:$0xff]  ;;  %v4242_v38 = vsub.f32 %v120_v53, %v250_v15  ;;  %v4244_v14 = vpack.c.bf16 %v1534_v49, %v1530_v3  ;;  %v1540_v15 = vand.u32 4294901760, %v131_v54 }
  0x50   :  { %6219 = vst [vmem:[#allocation150_spill] sm:$0xff] %v4225_v20  ;;  %6220 = vst [vmem:[#allocation151_spill] sm:$0xff] %v4227_v11  ;;  %v4246_v22 = vsub.f32 %v118_v57, %v1530_v3  ;;  %v130_v21 = vld [vmem:[%s5560_s2 + $0x370] sm:$0xff]  ;;  %v137_v11 = vld [vmem:[%s5560_s2 + $0x3a8] sm:$0xff]  ;;  %v4261_v53 = vpack.c.bf16 %v256_v60, %v252_v5  ;;  %v4263_v57 = vsub.f32 %v125_v19, %v252_v5  ;;  %v1536_v3 = vand.u32 4294901760, %v127_v26 }
  0x51   :  { %6221 = vst [vmem:[#allocation152_spill] sm:$0xff] %v4229_v45  ;;  %6222 = vst [vmem:[#allocation153_spill] sm:$0xff] %v4231_v36  ;;  %v133_v36 = vld [vmem:[%s5560_s2 + $0x388] sm:$0xff]  ;;  %2795 = vmatpush1.bf16.msra.mxu0 %v4229_v45  ;;  %v4265_v49 = vsub.f32 %v129_v2, %v256_v60  ;;  %3179 = vmatpush1.bf16.msra.mxu1 %v4244_v14  ;;  %v1542_v20 = vand.u32 4294901760, %v130_v21  ;;  %v264_v45 = vand.u32 4294901760, %v137_v11  ;;  %v135_v19 = vld [vmem:[%s5560_s2 + $0x398] sm:$0xff] }
  0x52   :  { %6223 = vst [vmem:[#allocation154_spill] sm:$0xff] %v4242_v38  ;;  %6224 = vst [vmem:[#allocation155_spill] sm:$0xff] %v4244_v14  ;;  %2797 = vmatprep.subr.bf16.mxu0 %v4261_v53  ;;  %v4269_v38 = vsub.f32 %v127_v26, %v1536_v3  ;;  %v260_v24 = vand.u32 4294901760, %v133_v36  ;;  %v139_v60 = vld [vmem:[%s5560_s2 + $0x3b8] sm:$0xff]  ;;  %v4277_v5 = vpack.c.bf16 %v1540_v15, %v1536_v3  ;;  %v132_v26 = vld [vmem:[%s5560_s2 + $0x380] sm:$0xff] }
  0x53   :  { %6225 = vst [vmem:[#allocation156_spill] sm:$0xff] %v4246_v22  ;;  %6226 = vst [vmem:[#allocation157_spill] sm:$0xff] %v4248_v9  ;;  %v258_v9 = vand.u32 4294901760, %v128_v35  ;;  %v1538_v22 = vand.u32 4294901760, %v126_v47  ;;  %v4279_v2 = vsub.f32 %v131_v54, %v1540_v15 }
  0x54   :  { %6227 = vst [vmem:[#allocation158_spill] sm:$0xff] %v4261_v53  ;;  %6228 = vst [vmem:[#allocation159_spill] sm:$0xff] %v4263_v57  ;;  %v4283_v53 = vsub.f32 %v124_v28, %v254_v42  ;;  %v4300_v28 = vsub.f32 %v130_v21, %v1542_v20  ;;  %3181 = vmatprep.subr.bf16.mxu1 %v4277_v5  ;;  %v262_v21 = vand.u32 4294901760, %v132_v26 }
  0x55   :  { %6229 = vst [vmem:[#allocation160_spill] sm:$0xff] %v4265_v49  ;;  %6230 = vst [vmem:[#allocation161_spill] sm:$0xff] %v4269_v38  ;;  %v4281_v14 = vpack.c.bf16 %v258_v9, %v254_v42  ;;  %v136_v38 = vld [vmem:[%s5560_s2 + $0x3a0] sm:$0xff]  ;;  %v134_v49 = vld [vmem:[%s5560_s2 + $0x390] sm:$0xff]  ;;  %v4294_v3 = vsub.f32 %v128_v35, %v258_v9  ;;  %v4296_v54 = vpack.c.bf16 %v1542_v20, %v1538_v22  ;;  %v1548_v9 = vand.u32 4294901760, %v139_v60 }
  0x56   :  { %6231 = vst [vmem:[#allocation162_spill] sm:$0xff] %v4277_v5  ;;  %6232 = vst [vmem:[#allocation163_spill] sm:$0xff] %v4279_v2  ;;  %v4298_v15 = vsub.f32 %v126_v47, %v1538_v22  ;;  %v138_v42 = vld [vmem:[%s5560_s2 + $0x3b0] sm:$0xff]  ;;  %v145_v2 = vld [vmem:[%s5560_s2 + $0x3e8] sm:$0xff]  ;;  %v4313_v35 = vpack.c.bf16 %v264_v45, %v260_v24  ;;  %v4315_v47 = vsub.f32 %v133_v36, %v260_v24  ;;  %v1544_v22 = vand.u32 4294901760, %v135_v19 }
  0x57   :  { %6233 = vst [vmem:[#allocation164_spill] sm:$0xff] %v4281_v14  ;;  %6234 = vst [vmem:[#allocation165_spill] sm:$0xff] %v4283_v53  ;;  %v141_v53 = vld [vmem:[%s5560_s2 + $0x3c8] sm:$0xff]  ;;  %2799 = vmatpush1.bf16.msra.mxu0 %v4281_v14  ;;  %v4317_v20 = vsub.f32 %v137_v11, %v264_v45  ;;  %3183 = vmatpush1.bf16.msra.mxu1 %v4296_v54  ;;  %v1550_v5 = vand.u32 4294901760, %v138_v42  ;;  %v272_v14 = vand.u32 4294901760, %v145_v2  ;;  %v143_v36 = vld [vmem:[%s5560_s2 + $0x3d8] sm:$0xff] }
  0x58   :  { %6235 = vst [vmem:[#allocation166_spill] sm:$0xff] %v4294_v3  ;;  %6236 = vst [vmem:[#allocation167_spill] sm:$0xff] %v4296_v54  ;;  %2801 = vmatprep.subr.bf16.mxu0 %v4313_v35  ;;  %v4321_v3 = vsub.f32 %v135_v19, %v1544_v22  ;;  %v268_v57 = vand.u32 4294901760, %v141_v53  ;;  %v147_v45 = vld [vmem:[%s5560_s2 + $0x3f8] sm:$0xff]  ;;  %v4329_v24 = vpack.c.bf16 %v1548_v9, %v1544_v22  ;;  %v140_v19 = vld [vmem:[%s5560_s2 + $0x3c0] sm:$0xff] }
  0x59   :  { %6237 = vst [vmem:[#allocation168_spill] sm:$0xff] %v4298_v15  ;;  %6238 = vst [vmem:[#allocation169_spill] sm:$0xff] %v4300_v28  ;;  %v266_v28 = vand.u32 4294901760, %v136_v38  ;;  %v1546_v15 = vand.u32 4294901760, %v134_v49  ;;  %v4331_v11 = vsub.f32 %v139_v60, %v1548_v9 }
  0x5a   :  { %6239 = vst [vmem:[#allocation170_spill] sm:$0xff] %v4313_v35  ;;  %6240 = vst [vmem:[#allocation171_spill] sm:$0xff] %v4315_v47  ;;  %v4335_v35 = vsub.f32 %v132_v26, %v262_v21  ;;  %v4352_v26 = vsub.f32 %v138_v42, %v1550_v5  ;;  %3185 = vmatprep.subr.bf16.mxu1 %v4329_v24  ;;  %v270_v42 = vand.u32 4294901760, %v140_v19 }
  0x5b   :  { %6241 = vst [vmem:[#allocation172_spill] sm:$0xff] %v4317_v20  ;;  %6242 = vst [vmem:[#allocation173_spill] sm:$0xff] %v4321_v3  ;;  %v4333_v54 = vpack.c.bf16 %v266_v28, %v262_v21  ;;  %v144_v3 = vld [vmem:[%s5560_s2 + $0x3e0] sm:$0xff]  ;;  %v142_v20 = vld [vmem:[%s5560_s2 + $0x3d0] sm:$0xff]  ;;  %v4346_v22 = vsub.f32 %v136_v38, %v266_v28  ;;  %v4348_v60 = vpack.c.bf16 %v1550_v5, %v1546_v15  ;;  %v1556_v28 = vand.u32 4294901760, %v147_v45 }
  0x5c   :  { %6243 = vst [vmem:[#allocation174_spill] sm:$0xff] %v4329_v24  ;;  %6244 = vst [vmem:[#allocation175_spill] sm:$0xff] %v4331_v11  ;;  %v4350_v9 = vsub.f32 %v134_v49, %v1546_v15  ;;  %v146_v21 = vld [vmem:[%s5560_s2 + $0x3f0] sm:$0xff]  ;;  %v17_v11 = vld [vmem:[%s5562_s1 + $0x8] sm:$0xff]  ;;  %v4365_v38 = vpack.c.bf16 %v272_v14, %v268_v57  ;;  %v4367_v49 = vsub.f32 %v141_v53, %v268_v57  ;;  %v1552_v15 = vand.u32 4294901760, %v143_v36 }
  0x5d   :  { %6245 = vst [vmem:[#allocation176_spill] sm:$0xff] %v4333_v54  ;;  %6246 = vst [vmem:[#allocation177_spill] sm:$0xff] %v4335_v35  ;;  %v15_v35 = vld [vmem:[%s5561_s0 + $0x8] sm:$0xff]  ;;  %2803 = vmatpush1.bf16.msra.mxu0 %v4333_v54  ;;  %v4369_v5 = vsub.f32 %v145_v2, %v272_v14  ;;  %3187 = vmatpush1.bf16.msra.mxu1 %v4348_v60  ;;  %v1558_v24 = vand.u32 4294901760, %v146_v21  ;;  %v5766_v54 = vand.u32 4294901760, %v3585_v16  ;;  %v14_v2 = vld [vmem:[%s5561_s0] sm:$0xff] }
  0x5e   :  { %6247 = vst [vmem:[#allocation178_spill] sm:$0xff] %v4346_v22  ;;  %6248 = vst [vmem:[#allocation179_spill] sm:$0xff] %v4348_v60  ;;  %2805 = vmatprep.subr.bf16.mxu0 %v4365_v38  ;;  %v4373_v22 = vsub.f32 %v143_v36, %v1552_v15  ;;  %v19_v47 = vsub.f32 %v15_v35, %v17_v11  ;;  %v4376_v1 = vpack.c.bf16 %v1556_v28, %v1552_v15  ;;  %v16_v36 = vld [vmem:[%s5562_s1] sm:$0xff] }
  0x5f   :  { %6249 = vst [vmem:[#allocation180_spill] sm:$0xff] %v4350_v9  ;;  %6250 = vst [vmem:[#allocation181_spill] sm:$0xff] %v4352_v26  ;;  %v274_v26 = vand.u32 4294901760, %v144_v3  ;;  %v1554_v9 = vand.u32 4294901760, %v142_v20  ;;  %v4378_v53 = vsub.f32 %v147_v45, %v1556_v28  ;;  %v4382_v57 = vsub.f32 %v140_v19, %v270_v42 }
  0x60   :  { %6251 = vst [vmem:[#allocation182_spill] sm:$0xff] %v4365_v38  ;;  %6252 = vst [vmem:[#allocation183_spill] sm:$0xff] %v4367_v49  ;;  %v4396_v45 = vsub.f32 %v146_v21, %v1558_v24  ;;  %3189 = vmatprep.subr.bf16.mxu1 %v4376_v1  ;;  %v4400_v19 = vand.u32 4294901760, %v19_v47  ;;  %v296_v15 = vsub.f32 %v3585_v16, %v5766_v54  ;;  %v5769_v28 = vand.u32 4294901760, %v3587_v17 }
  0x61   :  { %6253 = vst [vmem:[#allocation184_spill] sm:$0xff] %v4369_v5  ;;  %6254 = vst [vmem:[#allocation185_spill] sm:$0xff] %v4373_v22  ;;  %v4380_v14 = vpack.c.bf16 %v274_v26, %v270_v42  ;;  %v4390_v60 = vsub.f32 %v144_v3, %v274_v26  ;;  %v4392_v35 = vpack.c.bf16 %v1558_v24, %v1554_v9  ;;  %v5774_v3 = vand.u32 4294901760, %v3589_v18 }
  0x62   :  { %6255 = vst [vmem:[#allocation186_spill] sm:$0xff] %v4376_v1  ;;  %6256 = vst [vmem:[#allocation187_spill] sm:$0xff] %v4378_v53  ;;  %v4394_v11 = vsub.f32 %v142_v20, %v1554_v9  ;;  %v5777_v20 = vand.u32 4294901760, %v3602_v23  ;;  %v18_v24 = vsub.f32 %v14_v2, %v16_v36  ;;  %v5782_v9 = vand.u32 4294901760, %v3606_v25 }
  0x63   :  { %6257 = vst [vmem:[#allocation188_spill] sm:$0xff] %v4380_v14  ;;  %6258 = vst [vmem:[#allocation189_spill] sm:$0xff] %v4382_v57  ;;  %2807 = vmatpush1.bf16.msra.mxu0 %v4380_v14  ;;  %3191 = vmatpush1.bf16.msra.mxu1 %v4392_v35  ;;  %v5785_v26 = vand.u32 4294901760, %v3612_v27  ;;  %v4412_v21 = vsub.f32 %v19_v47, %v4400_v19  ;;  %v297_v42 = vand.u32 4294901760, %v296_v15 }
  0x64   :  { %6259 = vst [vmem:[#allocation190_spill] sm:$0xff] %v4390_v60  ;;  %6260 = vst [vmem:[#allocation191_spill] sm:$0xff] %v4392_v35  ;;  %v308_v54 = vsub.f32 %v3587_v17, %v5769_v28  ;;  %v1580_v14 = vsub.f32 %v3589_v18, %v5774_v3  ;;  %v1592_v2 = vsub.f32 %v3602_v23, %v5777_v20  ;;  %v4423_v36 = vand.u32 4294901760, %v18_v24 }
  0x65   :  { %6261 = vst [vmem:[#allocation192_spill] sm:$0xff] %v4394_v11  ;;  %6262 = vst [vmem:[#allocation193_spill] sm:$0xff] %v4396_v45  ;;  %v302_v47 = vsub.f32 %v3606_v25, %v5782_v9  ;;  %v314_v15 = vsub.f32 %v3612_v27, %v5785_v26  ;;  %v4432_v28 = vand.u32 4294901760, %v4412_v21  ;;  %v5791_v3 = vand.u32 4294901760, %v3627_v39 }
  0x66   :  { %6263 = vst [vmem:[#allocation194_spill] sm:$0xff] %v4400_v19  ;;  %6264 = vst [vmem:[#allocation195_spill] sm:$0xff] %v4412_v21  ;;  %v309_v35 = vand.u32 4294901760, %v308_v54  ;;  %v1581_v1 = vand.u32 4294901760, %v1580_v14  ;;  %v1593_v38 = vand.u32 4294901760, %v1592_v2  ;;  %v4436_v20 = vsub.f32 %v18_v24, %v4423_v36 }
  0x67   :  { %6265 = vst [vmem:[#allocation196_spill] sm:$0xff] %v4423_v36  ;;  %6266 = vst [vmem:[#allocation197_spill] sm:$0xff] %v4432_v28  ;;  %v303_v23 = vand.u32 4294901760, %v302_v47  ;;  %v315_v18 = vand.u32 4294901760, %v314_v15  ;;  %v279_v9 = vsub.f32 %v4412_v21, %v4432_v28  ;;  %v1586_v26 = vsub.f32 %v3627_v39, %v5791_v3 }
  0x68   :  { %6267 = vst [vmem:[#allocation198_spill] sm:$0xff] %v4436_v20  ;;  %v2808_v25 = vpack.c.bf16 %v309_v35, %v297_v42  ;;  %v5790_v27 = vand.u32 4294901760, %v3629_v40  ;;  %v3192_v54 = vpack.c.bf16 %v1593_v38, %v1581_v1  ;;  %v4445_v14 = vand.u32 4294901760, %v4436_v20 }
  0x69   :  { %v2810_v2 = vpack.c.bf16 %v315_v18, %v303_v23  ;;  %v5792_v24 = vand.u32 4294901760, %v3631_v41  ;;  %v280_v36 = vand.u32 4294901760, %v279_v9  ;;  %v1587_v47 = vand.u32 4294901760, %v1586_v26 }
  0x6a   :  { %6268 = vst [vmem:[#allocation199_spill] sm:$0xff] %v4445_v14  ;;  %2809 = vmatprep.subr.bf16.mxu0 %v2808_v25  ;;  %v1598_v35 = vsub.f32 %v3629_v40, %v5790_v27  ;;  %v5793_v42 = vand.u32 4294901760, %v3644_v46  ;;  %3193 = vmatprep.subr.bf16.mxu1 %v3192_v54  ;;  %v285_v15 = vsub.f32 %v4436_v20, %v4445_v14  ;;  %v5796_v18 = vand.u32 4294901760, %v3648_v48 }
  0x6b   :  { %v320_v1 = vsub.f32 %v3631_v41, %v5792_v24  ;;  %v5799_v23 = vand.u32 4294901760, %v3654_v50  ;;  %281 = vmatprep.mubr.f32.mxu0 %v280_v36  ;;  %1565 = vmatprep.mubr.f32.mxu1 %v280_v36  ;;  %v5800_v9 = vand.u32 4294901760, %v3656_v52  ;;  %v5801_v26 = vand.u32 4294901760, %v3668_v61 }
  0x6c   :  { %v1599_v25 = vand.u32 4294901760, %v1598_v35  ;;  %v332_v38 = vsub.f32 %v3644_v46, %v5793_v42  ;;  %v286_v54 = vand.u32 4294901760, %v285_v15  ;;  %v1604_v3 = vsub.f32 %v3648_v48, %v5796_v18 }
  0x6d   :  { %v321_v27 = vand.u32 4294901760, %v320_v1  ;;  %v1616_v24 = vsub.f32 %v3654_v50, %v5799_v23  ;;  %v326_v42 = vsub.f32 %v3656_v52, %v5800_v9  ;;  %v338_v14 = vsub.f32 %v3668_v61, %v5801_v26 }
  0x6e   :  { %v3194_v36 = vpack.c.bf16 %v1599_v25, %v1587_v47  ;;  %v333_v35 = vand.u32 4294901760, %v332_v38  ;;  %287 = vmatmul.mubr.f32.vlgmr.msra.gmra.mrb[0].mxu0 %v286_v54  ;;  %1571 = vmatmul.mubr.f32.vlgmr.msra.gmra.mrb[0].mxu1 %v286_v54  ;;  %v1605_v15 = vand.u32 4294901760, %v1604_v3  ;;  %v5804_v18 = vand.u32 4294901760, %v3670_v62 }
  0x6f   :  { %v1617_v1 = vand.u32 4294901760, %v1616_v24  ;;  %v5802_v28 = vand.u32 4294901760, %v3683_v4  ;;  %2811 = vmatpush1.bf16.msra.mxu0 %v2810_v2  ;;  %v327_v25 = vand.u32 4294901760, %v326_v42  ;;  %v339_v38 = vand.u32 4294901760, %v338_v14  ;;  %678 = vmatprep.mubr.f32.mxu0 %v4400_v19 }
  0x70   :  { %3195 = vmatpush1.bf16.msra.mxu1 %v3194_v36  ;;  %v2812_v47 = vpack.c.bf16 %v333_v35, %v321_v27  ;;  %v5815_v23 = vand.u32 4294901760, %v3687_v6  ;;  %v1610_v26 = vsub.f32 %v3670_v62, %v5804_v18  ;;  %v5806_v24 = vand.u32 4294901760, %v3699_v10  ;;  %1962 = vmatprep.mubr.f32.mxu1 %v4400_v19 }
  0x71   :  { %v3196_v9 = vpack.c.bf16 %v1617_v1, %v1605_v15  ;;  %v1622_v3 = vsub.f32 %v3683_v4, %v5802_v28  ;;  %v2814_v27 = vpack.c.bf16 %v339_v38, %v327_v25  ;;  %v5803_v2 = vand.u32 4294901760, %v3703_v12 }
  0x72   :  { %2813 = vmatprep.subr.bf16.mxu0 %v2812_v47  ;;  %v344_v14 = vsub.f32 %v3687_v6, %v5815_v23  ;;  %v5805_v42 = vand.u32 4294901760, %v3705_v13  ;;  %v1611_v54 = vand.u32 4294901760, %v1610_v26  ;;  %v356_v35 = vsub.f32 %v3699_v10, %v5806_v24 }
  0x73   :  { %3197 = vmatprep.subr.bf16.mxu1 %v3196_v9  ;;  %v1623_v36 = vand.u32 4294901760, %v1622_v3  ;;  %v5807_v15 = vand.u32 4294901760, %v3715_v33  ;;  %2815 = vmatpush1.bf16.msra.mxu0 %v2814_v27  ;;  %v1628_v47 = vsub.f32 %v3703_v12, %v5803_v2  ;;  %v5808_v9 = vand.u32 4294901760, %v3717_v34 }
  0x74   :  { %v345_v1 = vand.u32 4294901760, %v344_v14  ;;  %v1640_v25 = vsub.f32 %v3705_v13, %v5805_v42  ;;  %v357_v38 = vand.u32 4294901760, %v356_v35  ;;  %v5810_v28 = vand.u32 4294901760, %v3730_v43 }
  0x75   :  { %v3198_v26 = vpack.c.bf16 %v1623_v36, %v1611_v54  ;;  %v350_v3 = vsub.f32 %v3715_v33, %v5807_v15  ;;  %v1629_v27 = vand.u32 4294901760, %v1628_v47  ;;  %v362_v2 = vsub.f32 %v3717_v34, %v5808_v9 }
  0x76   :  { %v1641_v14 = vand.u32 4294901760, %v1640_v25  ;;  %v5809_v18 = vand.u32 4294901760, %v3732_v44  ;;  %v2816_v42 = vpack.c.bf16 %v357_v38, %v345_v1  ;;  %v1634_v54 = vsub.f32 %v3730_v43, %v5810_v28 }
  0x77   :  { %3199 = vmatpush1.bf16.msra.mxu1 %v3198_v26  ;;  %v351_v24 = vand.u32 4294901760, %v350_v3  ;;  %v5813_v36 = vand.u32 4294901760, %v3736_v51  ;;  %v363_v15 = vand.u32 4294901760, %v362_v2  ;;  %v5811_v25 = vand.u32 4294901760, %v3749_v56 }
  0x78   :  { %v3200_v35 = vpack.c.bf16 %v1641_v14, %v1629_v27  ;;  %v1646_v47 = vsub.f32 %v3732_v44, %v5809_v18  ;;  %2817 = vmatprep.subr.bf16.mxu0 %v2816_v42  ;;  %v1635_v9 = vand.u32 4294901760, %v1634_v54  ;;  %v5812_v26 = vand.u32 4294901760, %v3753_v58 }
  0x79   :  { %v368_v1 = vsub.f32 %v3736_v51, %v5813_v36  ;;  %v5814_v38 = vand.u32 4294901760, %v3756_v63  ;;  %v2818_v3 = vpack.c.bf16 %v363_v15, %v351_v24  ;;  %v380_v2 = vsub.f32 %v3749_v56, %v5811_v25 }
  0x7a   :  { %3201 = vmatprep.subr.bf16.mxu1 %v3200_v35  ;;  %v1647_v27 = vand.u32 4294901760, %v1646_v47  ;;  %v5822_v14 = vand.u32 4294901760, %v3762_v7  ;;  %v1652_v42 = vsub.f32 %v3753_v58, %v5812_v26  ;;  %v5816_v28 = vand.u32 4294901760, %v3775_v29 }
  0x7b   :  { %v369_v18 = vand.u32 4294901760, %v368_v1  ;;  %v1664_v54 = vsub.f32 %v3756_v63, %v5814_v38  ;;  %2819 = vmatpush1.bf16.msra.mxu0 %v2818_v3  ;;  %v381_v15 = vand.u32 4294901760, %v380_v2  ;;  %v5818_v47 = vand.u32 4294901760, %v3779_v31 }
  0x7c   :  { %v3202_v24 = vpack.c.bf16 %v1647_v27, %v1635_v9  ;;  %v374_v35 = vsub.f32 %v3762_v7, %v5822_v14  ;;  %v1653_v1 = vand.u32 4294901760, %v1652_v42  ;;  %v386_v26 = vsub.f32 %v3775_v29, %v5816_v28  ;;  %v6270_v14 = vld [vmem:[#allocation61_spill] sm:$0xff] }
  0x7d   :  { %v1665_v25 = vand.u32 4294901760, %v1664_v54  ;;  %v5817_v36 = vand.u32 4294901760, %v3790_v59  ;;  %v2820_v38 = vpack.c.bf16 %v381_v15, %v369_v18  ;;  %v1658_v9 = vsub.f32 %v3779_v31, %v5818_v47 }
  0x7e   :  { %3203 = vmatpush1.bf16.msra.mxu1 %v3202_v24  ;;  %v375_v23 = vand.u32 4294901760, %v374_v35  ;;  %v5820_v3 = vand.u32 4294901760, %v3794_v0  ;;  %v387_v2 = vand.u32 4294901760, %v386_v26  ;;  %v5819_v54 = vand.u32 4294901760, %v3796_v37 }
  0x7f   :  { %v3204_v27 = vpack.c.bf16 %v1665_v25, %v1653_v1  ;;  %v1670_v42 = vsub.f32 %v3790_v59, %v5817_v36  ;;  %2821 = vmatprep.subr.bf16.mxu0 %v2820_v38  ;;  %v1659_v28 = vand.u32 4294901760, %v1658_v9  ;;  %v5821_v24 = vand.u32 4294901760, %v3800_v32 }
  0x80   :  { %v392_v18 = vsub.f32 %v3794_v0, %v5820_v3  ;;  %v5825_v15 = vand.u32 4294901760, %v3811_v55  ;;  %v2822_v35 = vpack.c.bf16 %v387_v2, %v375_v23  ;;  %v404_v26 = vsub.f32 %v3796_v37, %v5819_v54 }
  0x81   :  { %3205 = vmatprep.subr.bf16.mxu1 %v3204_v27  ;;  %v1671_v25 = vand.u32 4294901760, %v1670_v42  ;;  %v5828_v1 = vand.u32 4294901760, %v3815_v30  ;;  %v1676_v38 = vsub.f32 %v3800_v32, %v5821_v24  ;;  %v5831_v47 = vand.u32 4294901760, %v3826_v8  ;;  %v6269_v42 = vld [vmem:[#allocation60_spill] sm:$0xff] }
  0x82   :  { %v393_v36 = vand.u32 4294901760, %v392_v18  ;;  %v1688_v9 = vsub.f32 %v3811_v55, %v5825_v15  ;;  %2823 = vmatpush1.bf16.msra.mxu0 %v2822_v35  ;;  %v405_v27 = vand.u32 4294901760, %v404_v26  ;;  %v5832_v54 = vand.u32 4294901760, %v6269_v42  ;;  %v6271_v35 = vld [vmem:[#allocation63_spill] sm:$0xff] }
  0x83   :  { %v3206_v23 = vpack.c.bf16 %v1671_v25, %v1659_v28  ;;  %v398_v2 = vsub.f32 %v3815_v30, %v5828_v1  ;;  %v1677_v18 = vand.u32 4294901760, %v1676_v38  ;;  %v410_v24 = vsub.f32 %v3826_v8, %v5831_v47 }
  0x84   :  { %v1689_v3 = vand.u32 4294901760, %v1688_v9  ;;  %v5834_v19 = vand.u32 4294901760, %v6270_v14  ;;  %v2824_v15 = vpack.c.bf16 %v405_v27, %v393_v36  ;;  %v1682_v28 = vsub.f32 %v6269_v42, %v5832_v54  ;;  %v6272_v9 = vld [vmem:[#allocation64_spill] sm:$0xff] }
  0x85   :  { %3207 = vmatpush1.bf16.msra.mxu1 %v3206_v23  ;;  %v399_v20 = vand.u32 4294901760, %v398_v2  ;;  %v5836_v25 = vand.u32 4294901760, %v6271_v35  ;;  %v411_v1 = vand.u32 4294901760, %v410_v24  ;;  %v5838_v30 = vand.u32 4294901760, %v6272_v9  ;;  %v6273_v23 = vld [vmem:[#allocation65_spill] sm:$0xff]  ;;  %v6274_v2 = vld [vmem:[#allocation67_spill] sm:$0xff] }
  0x86   :  { %v3208_v26 = vpack.c.bf16 %v1689_v3, %v1677_v18  ;;  %v1694_v38 = vsub.f32 %v6270_v14, %v5834_v19  ;;  %2825 = vmatprep.subr.bf16.mxu0 %v2824_v15  ;;  %v1683_v47 = vand.u32 4294901760, %v1682_v28  ;;  %v5840_v27 = vand.u32 4294901760, %v6273_v23  ;;  %v6275_v18 = vld [vmem:[#allocation69_spill] sm:$0xff] }
  0x87   :  { %v416_v36 = vsub.f32 %v6271_v35, %v5836_v25  ;;  %v5844_v54 = vand.u32 4294901760, %v6274_v2  ;;  %v2826_v42 = vpack.c.bf16 %v411_v1, %v399_v20  ;;  %v428_v24 = vsub.f32 %v6272_v9, %v5838_v30  ;;  %v6276_v25 = vld [vmem:[#allocation70_spill] sm:$0xff] }
  0x88   :  { %3209 = vmatprep.subr.bf16.mxu1 %v3208_v26  ;;  %v1695_v3 = vand.u32 4294901760, %v1694_v38  ;;  %v5846_v19 = vand.u32 4294901760, %v6275_v18  ;;  %v1700_v15 = vsub.f32 %v6273_v23, %v5840_v27  ;;  %v5848_v35 = vand.u32 4294901760, %v6276_v25  ;;  %v6277_v38 = vld [vmem:[#allocation72_spill] sm:$0xff]  ;;  %v6278_v23 = vld [vmem:[#allocation73_spill] sm:$0xff] }
  0x89   :  { %v417_v14 = vand.u32 4294901760, %v416_v36  ;;  %v1712_v28 = vsub.f32 %v6274_v2, %v5844_v54  ;;  %2827 = vmatpush1.bf16.msra.mxu0 %v2826_v42  ;;  %v429_v1 = vand.u32 4294901760, %v428_v24  ;;  %v5849_v30 = vand.u32 4294901760, %v6277_v38  ;;  %v6279_v42 = vld [vmem:[#allocation75_spill] sm:$0xff] }
  0x8a   :  { %v3210_v20 = vpack.c.bf16 %v1695_v3, %v1683_v47  ;;  %v422_v26 = vsub.f32 %v6275_v18, %v5846_v19  ;;  %v1701_v36 = vand.u32 4294901760, %v1700_v15  ;;  %v434_v27 = vsub.f32 %v6276_v25, %v5848_v35 }
  0x8b   :  { %v1713_v9 = vand.u32 4294901760, %v1712_v28  ;;  %v5851_v8 = vand.u32 4294901760, %v6278_v23  ;;  %v2828_v54 = vpack.c.bf16 %v429_v1, %v417_v14  ;;  %v1706_v47 = vsub.f32 %v6277_v38, %v5849_v30  ;;  %v6280_v28 = vld [vmem:[#allocation76_spill] sm:$0xff] }
  0x8c   :  { %3211 = vmatpush1.bf16.msra.mxu1 %v3210_v20  ;;  %v423_v2 = vand.u32 4294901760, %v422_v26  ;;  %v5853_v3 = vand.u32 4294901760, %v6279_v42  ;;  %v435_v19 = vand.u32 4294901760, %v434_v27  ;;  %v5855_v18 = vand.u32 4294901760, %v6280_v28  ;;  %v6281_v20 = vld [vmem:[#allocation77_spill] sm:$0xff]  ;;  %v6282_v26 = vld [vmem:[#allocation79_spill] sm:$0xff] }
  0x8d   :  { %v3212_v24 = vpack.c.bf16 %v1713_v9, %v1701_v36  ;;  %v1718_v15 = vsub.f32 %v6278_v23, %v5851_v8  ;;  %2829 = vmatprep.subr.bf16.mxu0 %v2828_v54  ;;  %v1707_v35 = vand.u32 4294901760, %v1706_v47  ;;  %v5857_v1 = vand.u32 4294901760, %v6281_v20  ;;  %v6283_v36 = vld [vmem:[#allocation81_spill] sm:$0xff] }
  0x8e   :  { %v440_v14 = vsub.f32 %v6279_v42, %v5853_v3  ;;  %v5860_v30 = vand.u32 4294901760, %v6282_v26  ;;  %v2830_v38 = vpack.c.bf16 %v435_v19, %v423_v2  ;;  %v452_v27 = vsub.f32 %v6280_v28, %v5855_v18  ;;  %v6284_v3 = vld [vmem:[#allocation82_spill] sm:$0xff] }
  0x8f   :  { %3213 = vmatprep.subr.bf16.mxu1 %v3212_v24  ;;  %v1719_v9 = vand.u32 4294901760, %v1718_v15  ;;  %v5862_v8 = vand.u32 4294901760, %v6283_v36  ;;  %v1724_v54 = vsub.f32 %v6281_v20, %v5857_v1  ;;  %v5864_v42 = vand.u32 4294901760, %v6284_v3  ;;  %v6285_v15 = vld [vmem:[#allocation84_spill] sm:$0xff]  ;;  %v6286_v20 = vld [vmem:[#allocation85_spill] sm:$0xff] }
  0x90   :  { %v441_v23 = vand.u32 4294901760, %v440_v14  ;;  %v1736_v47 = vsub.f32 %v6282_v26, %v5860_v30  ;;  %2831 = vmatpush1.bf16.msra.mxu0 %v2830_v38  ;;  %v453_v2 = vand.u32 4294901760, %v452_v27  ;;  %v5865_v18 = vand.u32 4294901760, %v6285_v15  ;;  %v6287_v38 = vld [vmem:[#allocation87_spill] sm:$0xff] }
  0x91   :  { %v3214_v19 = vpack.c.bf16 %v1719_v9, %v1707_v35  ;;  %v446_v24 = vsub.f32 %v6283_v36, %v5862_v8  ;;  %v1725_v14 = vand.u32 4294901760, %v1724_v54  ;;  %v458_v1 = vsub.f32 %v6284_v3, %v5864_v42 }
  0x92   :  { %v1737_v28 = vand.u32 4294901760, %v1736_v47  ;;  %v5867_v25 = vand.u32 4294901760, %v6286_v20  ;;  %v2832_v30 = vpack.c.bf16 %v453_v2, %v441_v23  ;;  %v1730_v35 = vsub.f32 %v6285_v15, %v5865_v18  ;;  %v6288_v47 = vld [vmem:[#allocation88_spill] sm:$0xff] }
  0x93   :  { %3215 = vmatpush1.bf16.msra.mxu1 %v3214_v19  ;;  %v447_v26 = vand.u32 4294901760, %v446_v24  ;;  %v5869_v9 = vand.u32 4294901760, %v6287_v38  ;;  %v459_v8 = vand.u32 4294901760, %v458_v1  ;;  %v5871_v36 = vand.u32 4294901760, %v6288_v47  ;;  %v6289_v19 = vld [vmem:[#allocation89_spill] sm:$0xff]  ;;  %v6290_v24 = vld [vmem:[#allocation91_spill] sm:$0xff] }
  0x94   :  { %v3216_v27 = vpack.c.bf16 %v1737_v28, %v1725_v14  ;;  %v1742_v54 = vsub.f32 %v6286_v20, %v5867_v25  ;;  %2833 = vmatprep.subr.bf16.mxu0 %v2832_v30  ;;  %v1731_v42 = vand.u32 4294901760, %v1730_v35  ;;  %v5873_v2 = vand.u32 4294901760, %v6289_v19  ;;  %v6291_v14 = vld [vmem:[#allocation93_spill] sm:$0xff] }
  0x95   :  { %v464_v23 = vsub.f32 %v6287_v38, %v5869_v9  ;;  %v5876_v18 = vand.u32 4294901760, %v6290_v24  ;;  %v2834_v15 = vpack.c.bf16 %v459_v8, %v447_v26  ;;  %v476_v1 = vsub.f32 %v6288_v47, %v5871_v36  ;;  %v6292_v9 = vld [vmem:[#allocation94_spill] sm:$0xff] }
  0x96   :  { %3217 = vmatprep.subr.bf16.mxu1 %v3216_v27  ;;  %v1743_v28 = vand.u32 4294901760, %v1742_v54  ;;  %v5878_v25 = vand.u32 4294901760, %v6291_v14  ;;  %v1748_v30 = vsub.f32 %v6289_v19, %v5873_v2  ;;  %v5880_v38 = vand.u32 4294901760, %v6292_v9  ;;  %v6293_v54 = vld [vmem:[#allocation96_spill] sm:$0xff]  ;;  %v6294_v19 = vld [vmem:[#allocation97_spill] sm:$0xff] }
  0x97   :  { %v465_v20 = vand.u32 4294901760, %v464_v23  ;;  %v1760_v35 = vsub.f32 %v6290_v24, %v5876_v18  ;;  %2835 = vmatpush1.bf16.msra.mxu0 %v2834_v15  ;;  %v477_v26 = vand.u32 4294901760, %v476_v1  ;;  %v5881_v36 = vand.u32 4294901760, %v6293_v54  ;;  %v6295_v15 = vld [vmem:[#allocation99_spill] sm:$0xff] }
  0x98   :  { %v3218_v8 = vpack.c.bf16 %v1743_v28, %v1731_v42  ;;  %v470_v27 = vsub.f32 %v6291_v14, %v5878_v25  ;;  %v1749_v23 = vand.u32 4294901760, %v1748_v30  ;;  %v482_v2 = vsub.f32 %v6292_v9, %v5880_v38 }
  0x99   :  { %v1761_v47 = vand.u32 4294901760, %v1760_v35  ;;  %v5883_v3 = vand.u32 4294901760, %v6294_v19  ;;  %v2836_v18 = vpack.c.bf16 %v477_v26, %v465_v20  ;;  %v1754_v42 = vsub.f32 %v6293_v54, %v5881_v36  ;;  %v6296_v35 = vld [vmem:[#allocation100_spill] sm:$0xff] }
  0x9a   :  { %3219 = vmatpush1.bf16.msra.mxu1 %v3218_v8  ;;  %v471_v24 = vand.u32 4294901760, %v470_v27  ;;  %v5885_v28 = vand.u32 4294901760, %v6295_v15  ;;  %v483_v25 = vand.u32 4294901760, %v482_v2  ;;  %v5887_v14 = vand.u32 4294901760, %v6296_v35  ;;  %v6297_v8 = vld [vmem:[#allocation101_spill] sm:$0xff]  ;;  %v6298_v27 = vld [vmem:[#allocation103_spill] sm:$0xff] }
  0x9b   :  { %v3220_v1 = vpack.c.bf16 %v1761_v47, %v1749_v23  ;;  %v1766_v30 = vsub.f32 %v6294_v19, %v5883_v3  ;;  %2837 = vmatprep.subr.bf16.mxu0 %v2836_v18  ;;  %v1755_v38 = vand.u32 4294901760, %v1754_v42  ;;  %v5889_v26 = vand.u32 4294901760, %v6297_v8  ;;  %v6299_v23 = vld [vmem:[#allocation105_spill] sm:$0xff] }
  0x9c   :  { %v488_v20 = vsub.f32 %v6295_v15, %v5885_v28  ;;  %v5892_v36 = vand.u32 4294901760, %v6298_v27  ;;  %v2838_v54 = vpack.c.bf16 %v483_v25, %v471_v24  ;;  %v500_v2 = vsub.f32 %v6296_v35, %v5887_v14  ;;  %v6300_v28 = vld [vmem:[#allocation106_spill] sm:$0xff] }
  0x9d   :  { %3221 = vmatprep.subr.bf16.mxu1 %v3220_v1  ;;  %v1767_v47 = vand.u32 4294901760, %v1766_v30  ;;  %v5894_v3 = vand.u32 4294901760, %v6299_v23  ;;  %v1772_v18 = vsub.f32 %v6297_v8, %v5889_v26  ;;  %v5897_v15 = vand.u32 4294901760, %v6300_v28  ;;  %v6301_v30 = vld [vmem:[#allocation108_spill] sm:$0xff]  ;;  %v6302_v8 = vld [vmem:[#allocation109_spill] sm:$0xff] }
  0x9e   :  { %v489_v19 = vand.u32 4294901760, %v488_v20  ;;  %v1784_v42 = vsub.f32 %v6298_v27, %v5892_v36  ;;  %2839 = vmatpush1.bf16.msra.mxu0 %v2838_v54  ;;  %v501_v24 = vand.u32 4294901760, %v500_v2  ;;  %v5898_v14 = vand.u32 4294901760, %v6301_v30  ;;  %v6303_v54 = vld [vmem:[#allocation111_spill] sm:$0xff] }
  0x9f   :  { %v3222_v25 = vpack.c.bf16 %v1767_v47, %v1755_v38  ;;  %v494_v1 = vsub.f32 %v6299_v23, %v5894_v3  ;;  %v1773_v20 = vand.u32 4294901760, %v1772_v18  ;;  %v506_v26 = vsub.f32 %v6300_v28, %v5897_v15 }
  0xa0   :  { %v1785_v35 = vand.u32 4294901760, %v1784_v42  ;;  %v5901_v9 = vand.u32 4294901760, %v6302_v8  ;;  %v2840_v36 = vpack.c.bf16 %v501_v24, %v489_v19  ;;  %v1778_v38 = vsub.f32 %v6301_v30, %v5898_v14  ;;  %v6304_v42 = vld [vmem:[#allocation112_spill] sm:$0xff] }
  0xa1   :  { %3223 = vmatpush1.bf16.msra.mxu1 %v3222_v25  ;;  %v495_v27 = vand.u32 4294901760, %v494_v1  ;;  %v5904_v47 = vand.u32 4294901760, %v6303_v54  ;;  %v507_v3 = vand.u32 4294901760, %v506_v26  ;;  %v5907_v55 = vand.u32 4294901760, %v6304_v42  ;;  %v6305_v25 = vld [vmem:[#allocation113_spill] sm:$0xff]  ;;  %v6306_v1 = vld [vmem:[#allocation115_spill] sm:$0xff] }
  0xa2   :  { %v3224_v2 = vpack.c.bf16 %v1785_v35, %v1773_v20  ;;  %v1790_v18 = vsub.f32 %v6302_v8, %v5901_v9  ;;  %2841 = vmatprep.subr.bf16.mxu0 %v2840_v36  ;;  %v1779_v15 = vand.u32 4294901760, %v1778_v38  ;;  %v5910_v24 = vand.u32 4294901760, %v6305_v25  ;;  %v6307_v20 = vld [vmem:[#allocation117_spill] sm:$0xff] }
  0xa3   :  { %v512_v19 = vsub.f32 %v6303_v54, %v5904_v47  ;;  %v5913_v14 = vand.u32 4294901760, %v6306_v1  ;;  %v2842_v32 = vpack.c.bf16 %v507_v3, %v495_v27  ;;  %v524_v26 = vsub.f32 %v6304_v42, %v5907_v55  ;;  %v6308_v47 = vld [vmem:[#allocation118_spill] sm:$0xff] }
  0xa4   :  { %3225 = vmatprep.subr.bf16.mxu1 %v3224_v2  ;;  %v1791_v35 = vand.u32 4294901760, %v1790_v18  ;;  %v5915_v9 = vand.u32 4294901760, %v6307_v20  ;;  %v1796_v36 = vsub.f32 %v6305_v25, %v5910_v24  ;;  %v5917_v59 = vand.u32 4294901760, %v6308_v47  ;;  %v6309_v18 = vld [vmem:[#allocation120_spill] sm:$0xff]  ;;  %v6310_v25 = vld [vmem:[#allocation121_spill] sm:$0xff] }
  0xa5   :  { %v513_v21 = vand.u32 4294901760, %v512_v19  ;;  %v1808_v38 = vsub.f32 %v6306_v1, %v5913_v14  ;;  %2843 = vmatpush1.bf16.msra.mxu0 %v2842_v32  ;;  %v525_v27 = vand.u32 4294901760, %v524_v26  ;;  %v5918_v55 = vand.u32 4294901760, %v6309_v18 }
  0xa6   :  { %v3226_v3 = vpack.c.bf16 %v1791_v35, %v1779_v15  ;;  %v518_v2 = vsub.f32 %v6307_v20, %v5915_v9  ;;  %v1797_v19 = vand.u32 4294901760, %v1796_v36  ;;  %v530_v24 = vsub.f32 %v6308_v47, %v5917_v59  ;;  %v6311_v15 = vld [vmem:[#allocation123_spill] sm:$0xff] }
  0xa7   :  { %v1809_v31 = vand.u32 4294901760, %v1808_v38  ;;  %v5920_v42 = vand.u32 4294901760, %v6310_v25  ;;  %v2844_v14 = vpack.c.bf16 %v525_v27, %v513_v21  ;;  %v1802_v32 = vsub.f32 %v6309_v18, %v5918_v55  ;;  %v6312_v38 = vld [vmem:[#allocation124_spill] sm:$0xff] }
  0xa8   :  { %3227 = vmatpush1.bf16.msra.mxu1 %v3226_v3  ;;  %v519_v1 = vand.u32 4294901760, %v518_v2  ;;  %v5922_v35 = vand.u32 4294901760, %v6311_v15  ;;  %v531_v9 = vand.u32 4294901760, %v530_v24  ;;  %v5924_v20 = vand.u32 4294901760, %v6312_v38  ;;  %v6313_v3 = vld [vmem:[#allocation125_spill] sm:$0xff]  ;;  %v6314_v2 = vld [vmem:[#allocation127_spill] sm:$0xff] }
  0xa9   :  { %v3228_v26 = vpack.c.bf16 %v1809_v31, %v1797_v19  ;;  %v1814_v36 = vsub.f32 %v6310_v25, %v5920_v42  ;;  %2845 = vmatprep.subr.bf16.mxu0 %v2844_v14  ;;  %v1803_v59 = vand.u32 4294901760, %v1802_v32  ;;  %v5926_v27 = vand.u32 4294901760, %v6313_v3  ;;  %v6315_v19 = vld [vmem:[#allocation129_spill] sm:$0xff] }
  0xaa   :  { %v536_v21 = vsub.f32 %v6311_v15, %v5922_v35  ;;  %v5929_v55 = vand.u32 4294901760, %v6314_v2  ;;  %v2846_v18 = vpack.c.bf16 %v531_v9, %v519_v1  ;;  %v548_v24 = vsub.f32 %v6312_v38, %v5924_v20  ;;  %v6316_v35 = vld [vmem:[#allocation130_spill] sm:$0xff] }
  0xab   :  { %3229 = vmatprep.subr.bf16.mxu1 %v3228_v26  ;;  %v1815_v31 = vand.u32 4294901760, %v1814_v36  ;;  %v5931_v42 = vand.u32 4294901760, %v6315_v19  ;;  %v1820_v14 = vsub.f32 %v6313_v3, %v5926_v27  ;;  %v5933_v15 = vand.u32 4294901760, %v6316_v35  ;;  %v6317_v36 = vld [vmem:[#allocation132_spill] sm:$0xff]  ;;  %v6318_v3 = vld [vmem:[#allocation133_spill] sm:$0xff] }
  0xac   :  { %v537_v25 = vand.u32 4294901760, %v536_v21  ;;  %v1832_v32 = vsub.f32 %v6314_v2, %v5929_v55  ;;  %2847 = vmatpush1.bf16.msra.mxu0 %v2846_v18  ;;  %v549_v1 = vand.u32 4294901760, %v548_v24  ;;  %v5934_v20 = vand.u32 4294901760, %v6317_v36  ;;  %v6319_v18 = vld [vmem:[#allocation135_spill] sm:$0xff] }
  0xad   :  { %v3230_v9 = vpack.c.bf16 %v1815_v31, %v1803_v59  ;;  %v542_v26 = vsub.f32 %v6315_v19, %v5931_v42  ;;  %v1821_v21 = vand.u32 4294901760, %v1820_v14  ;;  %v554_v27 = vsub.f32 %v6316_v35, %v5933_v15 }
  0xae   :  { %v1833_v38 = vand.u32 4294901760, %v1832_v32  ;;  %v5936_v47 = vand.u32 4294901760, %v6318_v3  ;;  %v2848_v55 = vpack.c.bf16 %v549_v1, %v537_v25  ;;  %v1826_v59 = vsub.f32 %v6317_v36, %v5934_v20  ;;  %v6320_v32 = vld [vmem:[#allocation136_spill] sm:$0xff] }
  0xaf   :  { %3231 = vmatpush1.bf16.msra.mxu1 %v3230_v9  ;;  %v543_v2 = vand.u32 4294901760, %v542_v26  ;;  %v5938_v31 = vand.u32 4294901760, %v6319_v18  ;;  %v555_v42 = vand.u32 4294901760, %v554_v27  ;;  %v5940_v19 = vand.u32 4294901760, %v6320_v32  ;;  %v6321_v9 = vld [vmem:[#allocation137_spill] sm:$0xff]  ;;  %v6322_v26 = vld [vmem:[#allocation139_spill] sm:$0xff] }
  0xb0   :  { %v3232_v24 = vpack.c.bf16 %v1833_v38, %v1821_v21  ;;  %v1838_v14 = vsub.f32 %v6318_v3, %v5936_v47  ;;  %2849 = vmatprep.subr.bf16.mxu0 %v2848_v55  ;;  %v1827_v15 = vand.u32 4294901760, %v1826_v59  ;;  %v5942_v1 = vand.u32 4294901760, %v6321_v9  ;;  %v6323_v21 = vld [vmem:[#allocation141_spill] sm:$0xff] }
  0xb1   :  { %v560_v25 = vsub.f32 %v6319_v18, %v5938_v31  ;;  %v5945_v20 = vand.u32 4294901760, %v6322_v26  ;;  %v2850_v36 = vpack.c.bf16 %v555_v42, %v543_v2  ;;  %v572_v27 = vsub.f32 %v6320_v32, %v5940_v19  ;;  %v6324_v31 = vld [vmem:[#allocation142_spill] sm:$0xff] }
  0xb2   :  { %3233 = vmatprep.subr.bf16.mxu1 %v3232_v24  ;;  %v1839_v38 = vand.u32 4294901760, %v1838_v14  ;;  %v5947_v47 = vand.u32 4294901760, %v6323_v21  ;;  %v1844_v55 = vsub.f32 %v6321_v9, %v5942_v1  ;;  %v5949_v18 = vand.u32 4294901760, %v6324_v31  ;;  %v6325_v14 = vld [vmem:[#allocation144_spill] sm:$0xff]  ;;  %v6326_v9 = vld [vmem:[#allocation145_spill] sm:$0xff] }
  0xb3   :  { %v561_v3 = vand.u32 4294901760, %v560_v25  ;;  %v1856_v59 = vsub.f32 %v6322_v26, %v5945_v20  ;;  %2851 = vmatpush1.bf16.msra.mxu0 %v2850_v36  ;;  %v573_v2 = vand.u32 4294901760, %v572_v27  ;;  %v5950_v19 = vand.u32 4294901760, %v6325_v14  ;;  %v6327_v36 = vld [vmem:[#allocation147_spill] sm:$0xff] }
  0xb4   :  { %v3234_v42 = vpack.c.bf16 %v1839_v38, %v1827_v15  ;;  %v566_v24 = vsub.f32 %v6323_v21, %v5947_v47  ;;  %v1845_v25 = vand.u32 4294901760, %v1844_v55  ;;  %v578_v1 = vsub.f32 %v6324_v31, %v5949_v18 }
  0xb5   :  { %v1857_v32 = vand.u32 4294901760, %v1856_v59  ;;  %v5952_v35 = vand.u32 4294901760, %v6326_v9  ;;  %v2852_v20 = vpack.c.bf16 %v573_v2, %v561_v3  ;;  %v1850_v15 = vsub.f32 %v6325_v14, %v5950_v19  ;;  %v6328_v59 = vld [vmem:[#allocation148_spill] sm:$0xff] }
  0xb6   :  { %3235 = vmatpush1.bf16.msra.mxu1 %v3234_v42  ;;  %v567_v26 = vand.u32 4294901760, %v566_v24  ;;  %v5954_v38 = vand.u32 4294901760, %v6327_v36  ;;  %v579_v47 = vand.u32 4294901760, %v578_v1  ;;  %v5956_v21 = vand.u32 4294901760, %v6328_v59  ;;  %v6329_v42 = vld [vmem:[#allocation149_spill] sm:$0xff]  ;;  %v6330_v24 = vld [vmem:[#allocation151_spill] sm:$0xff] }
  0xb7   :  { %v3236_v27 = vpack.c.bf16 %v1857_v32, %v1845_v25  ;;  %v1862_v55 = vsub.f32 %v6326_v9, %v5952_v35  ;;  %2853 = vmatprep.subr.bf16.mxu0 %v2852_v20  ;;  %v1851_v18 = vand.u32 4294901760, %v1850_v15  ;;  %v5958_v2 = vand.u32 4294901760, %v6329_v42  ;;  %v6331_v25 = vld [vmem:[#allocation153_spill] sm:$0xff] }
  0xb8   :  { %v584_v3 = vsub.f32 %v6327_v36, %v5954_v38  ;;  %v5961_v19 = vand.u32 4294901760, %v6330_v24  ;;  %v2854_v14 = vpack.c.bf16 %v579_v47, %v567_v26  ;;  %v596_v1 = vsub.f32 %v6328_v59, %v5956_v21  ;;  %v6332_v38 = vld [vmem:[#allocation154_spill] sm:$0xff] }
  0xb9   :  { %3237 = vmatprep.subr.bf16.mxu1 %v3236_v27  ;;  %v1863_v32 = vand.u32 4294901760, %v1862_v55  ;;  %v5963_v35 = vand.u32 4294901760, %v6331_v25  ;;  %v1868_v20 = vsub.f32 %v6329_v42, %v5958_v2  ;;  %v5965_v36 = vand.u32 4294901760, %v6332_v38  ;;  %v6333_v55 = vld [vmem:[#allocation156_spill] sm:$0xff]  ;;  %v6334_v42 = vld [vmem:[#allocation157_spill] sm:$0xff] }
  0xba   :  { %v585_v9 = vand.u32 4294901760, %v584_v3  ;;  %v1880_v15 = vsub.f32 %v6330_v24, %v5961_v19  ;;  %2855 = vmatpush1.bf16.msra.mxu0 %v2854_v14  ;;  %v597_v26 = vand.u32 4294901760, %v596_v1  ;;  %v5966_v21 = vand.u32 4294901760, %v6333_v55  ;;  %v6335_v14 = vld [vmem:[#allocation159_spill] sm:$0xff] }
  0xbb   :  { %v3238_v47 = vpack.c.bf16 %v1863_v32, %v1851_v18  ;;  %v590_v27 = vsub.f32 %v6331_v25, %v5963_v35  ;;  %v1869_v3 = vand.u32 4294901760, %v1868_v20  ;;  %v602_v2 = vsub.f32 %v6332_v38, %v5965_v36 }
  0xbc   :  { %v1881_v59 = vand.u32 4294901760, %v1880_v15  ;;  %v5968_v31 = vand.u32 4294901760, %v6334_v42  ;;  %v2856_v19 = vpack.c.bf16 %v597_v26, %v585_v9  ;;  %v1874_v18 = vsub.f32 %v6333_v55, %v5966_v21  ;;  %v6336_v15 = vld [vmem:[#allocation160_spill] sm:$0xff] }
  0xbd   :  { %3239 = vmatpush1.bf16.msra.mxu1 %v3238_v47  ;;  %v591_v24 = vand.u32 4294901760, %v590_v27  ;;  %v5970_v32 = vand.u32 4294901760, %v6335_v14  ;;  %v603_v35 = vand.u32 4294901760, %v602_v2  ;;  %v5972_v25 = vand.u32 4294901760, %v6336_v15  ;;  %v6337_v47 = vld [vmem:[#allocation161_spill] sm:$0xff]  ;;  %v6338_v27 = vld [vmem:[#allocation163_spill] sm:$0xff] }
  0xbe   :  { %v3240_v1 = vpack.c.bf16 %v1881_v59, %v1869_v3  ;;  %v1886_v20 = vsub.f32 %v6334_v42, %v5968_v31  ;;  %2857 = vmatprep.subr.bf16.mxu0 %v2856_v19  ;;  %v1875_v36 = vand.u32 4294901760, %v1874_v18  ;;  %v5974_v26 = vand.u32 4294901760, %v6337_v47  ;;  %v6339_v3 = vld [vmem:[#allocation165_spill] sm:$0xff] }
  0xbf   :  { %v608_v9 = vsub.f32 %v6335_v14, %v5970_v32  ;;  %v5977_v21 = vand.u32 4294901760, %v6338_v27  ;;  %v2858_v55 = vpack.c.bf16 %v603_v35, %v591_v24  ;;  %v620_v2 = vsub.f32 %v6336_v15, %v5972_v25  ;;  %v6340_v32 = vld [vmem:[#allocation166_spill] sm:$0xff] }
  0xc0   :  { %3241 = vmatprep.subr.bf16.mxu1 %v3240_v1  ;;  %v1887_v59 = vand.u32 4294901760, %v1886_v20  ;;  %v5979_v31 = vand.u32 4294901760, %v6339_v3  ;;  %v1892_v19 = vsub.f32 %v6337_v47, %v5974_v26  ;;  %v5981_v14 = vand.u32 4294901760, %v6340_v32  ;;  %v6341_v20 = vld [vmem:[#allocation168_spill] sm:$0xff]  ;;  %v6342_v47 = vld [vmem:[#allocation169_spill] sm:$0xff] }
  0xc1   :  { %v609_v42 = vand.u32 4294901760, %v608_v9  ;;  %v1904_v18 = vsub.f32 %v6338_v27, %v5977_v21  ;;  %2859 = vmatpush1.bf16.msra.mxu0 %v2858_v55  ;;  %v621_v24 = vand.u32 4294901760, %v620_v2  ;;  %v5982_v25 = vand.u32 4294901760, %v6341_v20  ;;  %v6343_v55 = vld [vmem:[#allocation171_spill] sm:$0xff] }
  0xc2   :  { %v3242_v35 = vpack.c.bf16 %v1887_v59, %v1875_v36  ;;  %v614_v1 = vsub.f32 %v6339_v3, %v5979_v31  ;;  %v1893_v9 = vand.u32 4294901760, %v1892_v19  ;;  %v626_v26 = vsub.f32 %v6340_v32, %v5981_v14 }
  0xc3   :  { %v1905_v15 = vand.u32 4294901760, %v1904_v18  ;;  %v5984_v38 = vand.u32 4294901760, %v6342_v47  ;;  %v2860_v21 = vpack.c.bf16 %v621_v24, %v609_v42  ;;  %v1898_v36 = vsub.f32 %v6341_v20, %v5982_v25  ;;  %v6344_v18 = vld [vmem:[#allocation172_spill] sm:$0xff] }
  0xc4   :  { %3243 = vmatpush1.bf16.msra.mxu1 %v3242_v35  ;;  %v615_v27 = vand.u32 4294901760, %v614_v1  ;;  %v5986_v59 = vand.u32 4294901760, %v6343_v55  ;;  %v627_v31 = vand.u32 4294901760, %v626_v26  ;;  %v5988_v3 = vand.u32 4294901760, %v6344_v18  ;;  %v6345_v35 = vld [vmem:[#allocation173_spill] sm:$0xff]  ;;  %v6346_v1 = vld [vmem:[#allocation175_spill] sm:$0xff] }
  0xc5   :  { %v3244_v2 = vpack.c.bf16 %v1905_v15, %v1893_v9  ;;  %v1910_v19 = vsub.f32 %v6342_v47, %v5984_v38  ;;  %2861 = vmatprep.subr.bf16.mxu0 %v2860_v21  ;;  %v1899_v14 = vand.u32 4294901760, %v1898_v36  ;;  %v5990_v24 = vand.u32 4294901760, %v6345_v35  ;;  %v6347_v9 = vld [vmem:[#allocation177_spill] sm:$0xff] }
  0xc6   :  { %v632_v42 = vsub.f32 %v6343_v55, %v5986_v59  ;;  %v5993_v25 = vand.u32 4294901760, %v6346_v1  ;;  %v2862_v20 = vpack.c.bf16 %v627_v31, %v615_v27  ;;  %v644_v26 = vsub.f32 %v6344_v18, %v5988_v3  ;;  %v6348_v59 = vld [vmem:[#allocation178_spill] sm:$0xff] }
  0xc7   :  { %3245 = vmatprep.subr.bf16.mxu1 %v3244_v2  ;;  %v1911_v15 = vand.u32 4294901760, %v1910_v19  ;;  %v6002_v38 = vand.u32 4294901760, %v6347_v9  ;;  %v1916_v21 = vsub.f32 %v6345_v35, %v5990_v24  ;;  %v5995_v55 = vand.u32 4294901760, %v6348_v59  ;;  %v6349_v19 = vld [vmem:[#allocation180_spill] sm:$0xff]  ;;  %v6350_v35 = vld [vmem:[#allocation181_spill] sm:$0xff] }
  0xc8   :  { %v633_v47 = vand.u32 4294901760, %v632_v42  ;;  %v1928_v36 = vsub.f32 %v6346_v1, %v5993_v25  ;;  %2863 = vmatpush1.bf16.msra.mxu0 %v2862_v20  ;;  %v645_v27 = vand.u32 4294901760, %v644_v26  ;;  %v5997_v3 = vand.u32 4294901760, %v6349_v19 }
  0xc9   :  { %v3246_v31 = vpack.c.bf16 %v1911_v15, %v1899_v14  ;;  %v638_v2 = vsub.f32 %v6347_v9, %v6002_v38  ;;  %v1917_v42 = vand.u32 4294901760, %v1916_v21  ;;  %v650_v24 = vsub.f32 %v6348_v59, %v5995_v55  ;;  %v6401_v9 = vld [vmem:[#allocation195_spill] sm:$0xff] }
  0xca   :  { %v1929_v18 = vand.u32 4294901760, %v1928_v36  ;;  %v5996_v32 = vand.u32 4294901760, %v6350_v35  ;;  %v2864_v25 = vpack.c.bf16 %v645_v27, %v633_v47  ;;  %v1922_v14 = vsub.f32 %v6349_v19, %v5997_v3 }
  0xcb   :  { %3247 = vmatpush1.bf16.msra.mxu1 %v3246_v31  ;;  %v639_v1 = vand.u32 4294901760, %v638_v2  ;;  %v6000_v20 = vand.u32 4294901760, %v4367_v49  ;;  %v651_v26 = vand.u32 4294901760, %v650_v24  ;;  %v5998_v36 = vand.u32 4294901760, %v4369_v5 }
  0xcc   :  { %v3248_v15 = vpack.c.bf16 %v1929_v18, %v1917_v42  ;;  %v1934_v21 = vsub.f32 %v6350_v35, %v5996_v32  ;;  %2865 = vmatprep.subr.bf16.mxu0 %v2864_v25  ;;  %v1923_v55 = vand.u32 4294901760, %v1922_v14  ;;  %v5999_v31 = vand.u32 4294901760, %v4373_v22 }
  0xcd   :  { %v656_v47 = vsub.f32 %v4367_v49, %v6000_v20  ;;  %v6001_v27 = vand.u32 4294901760, %v4378_v53  ;;  %v2866_v2 = vpack.c.bf16 %v651_v26, %v639_v1  ;;  %v668_v24 = vsub.f32 %v4369_v5, %v5998_v36 }
  0xce   :  { %3249 = vmatprep.subr.bf16.mxu1 %v3248_v15  ;;  %v1935_v18 = vand.u32 4294901760, %v1934_v21  ;;  %v6004_v42 = vand.u32 4294901760, %v4382_v57  ;;  %v1940_v25 = vsub.f32 %v4373_v22, %v5999_v31  ;;  %v6003_v3 = vand.u32 4294901760, %v4390_v60 }
  0xcf   :  { %v657_v32 = vand.u32 4294901760, %v656_v47  ;;  %v1952_v14 = vsub.f32 %v4378_v53, %v6001_v27  ;;  %2867 = vmatpush1.bf16.msra.mxu0 %v2866_v2  ;;  %v669_v15 = vand.u32 4294901760, %v668_v24  ;;  %v6005_v21 = vand.u32 4294901760, %v4394_v11 }
  0xd0   :  { %v3250_v1 = vpack.c.bf16 %v1935_v18, %v1923_v55  ;;  %v662_v26 = vsub.f32 %v4382_v57, %v6004_v42  ;;  %v1941_v47 = vand.u32 4294901760, %v1940_v25  ;;  %v674_v31 = vsub.f32 %v4390_v60, %v6003_v3  ;;  %v6407_v57 = vld [vmem:[#allocation64_spill] sm:$0xff] }
  0xd1   :  { %v1953_v36 = vand.u32 4294901760, %v1952_v14  ;;  %v6006_v20 = vand.u32 4294901760, %v4396_v45  ;;  %v2868_v27 = vpack.c.bf16 %v669_v15, %v657_v32  ;;  %v1946_v55 = vsub.f32 %v4394_v11, %v6005_v21  ;;  %v6351_v32 = vld [vmem:[#allocation5_spill] sm:$0xff]  ;;  %v6352_v15 = vld [vmem:[#allocation7_spill] sm:$0xff]  ;;  %v6415_v60 = vld [vmem:[#allocation76_spill] sm:$0xff] }
  0xd2   :  { %3251 = vmatpush1.bf16.msra.mxu1 %v3250_v1  ;;  %v663_v38 = vand.u32 4294901760, %v662_v26  ;;  %v675_v18 = vand.u32 4294901760, %v674_v31  ;;  %v2872_v14 = vpack.c.bf16 %v3587_v17, %v3585_v16  ;;  %v3256_v26 = vpack.c.bf16 %v6352_v15, %v6351_v32  ;;  %v6353_v21 = vld [vmem:[#allocation9_spill] sm:$0xff]  ;;  %v6388_v16 = vld [vmem:[#allocation160_spill] sm:$0xff] }
  0xd3   :  { %v3252_v2 = vpack.c.bf16 %v1953_v36, %v1941_v47  ;;  %v1958_v24 = vsub.f32 %v4396_v45, %v6006_v20  ;;  %2869 = vmatprep.subr.bf16.mxu0 %v2868_v27  ;;  %v1947_v25 = vand.u32 4294901760, %v1946_v55  ;;  %v6354_v36 = vld [vmem:[#allocation10_spill] sm:$0xff]  ;;  %v2876_v47 = vpack.c.bf16 %v3644_v46, %v3631_v41  ;;  %v6355_v55 = vld [vmem:[#allocation196_spill] sm:$0xff]  ;;  %v6386_v32 = vld [vmem:[#allocation157_spill] sm:$0xff] }
  0xd4   :  { %v2870_v3 = vpack.c.bf16 %v675_v18, %v663_v38  ;;  %v2874_v31 = vpack.c.bf16 %v6354_v36, %v6353_v21  ;;  %v3258_v27 = vpack.c.bf16 %v3629_v40, %v3627_v39  ;;  %v3260_v38 = vpack.c.bf16 %v3654_v50, %v3648_v48  ;;  %v6382_v36 = vld [vmem:[#allocation151_spill] sm:$0xff]  ;;  %v6392_v20 = vld [vmem:[#allocation166_spill] sm:$0xff]  ;;  %v6396_v41 = vld [vmem:[#allocation172_spill] sm:$0xff] }
  0xd5   :  { %3253 = vmatprep.subr.bf16.mxu1 %v3252_v2  ;;  %v1959_v1 = vand.u32 4294901760, %v1958_v24  ;;  %v3262_v2 = vpack.c.bf16 %v3683_v4, %v3670_v62  ;;  %v2880_v18 = vpack.c.bf16 %v3699_v10, %v3687_v6  ;;  %v2882_v24 = vpack.c.bf16 %v3717_v34, %v3715_v33  ;;  %v6365_v33 = vld [vmem:[#allocation125_spill] sm:$0xff]  ;;  %v6372_v6 = vld [vmem:[#allocation136_spill] sm:$0xff]  ;;  %v6387_v34 = vld [vmem:[#allocation159_spill] sm:$0xff] }
  0xd6   :  { %2871 = vmatpush1.bf16.msra.mxu0 %v2870_v3  ;;  %v2878_v3 = vpack.c.bf16 %v3668_v61, %v3656_v52  ;;  %v6370_v62 = vld [vmem:[#allocation133_spill] sm:$0xff]  ;;  %v6374_v52 = vld [vmem:[#allocation139_spill] sm:$0xff]  ;;  %v6393_v4 = vld [vmem:[#allocation168_spill] sm:$0xff] }
  0xd7   :  { %v3254_v42 = vpack.c.bf16 %v1959_v1, %v1947_v25  ;;  %2873 = vmatprep.subr.bf16.mxu0 %v2872_v14  ;;  %v3266_v25 = vpack.c.bf16 %v3732_v44, %v3730_v43  ;;  %v2884_v14 = vpack.c.bf16 %v3749_v56, %v3736_v51  ;;  %v3268_v1 = vpack.c.bf16 %v3756_v63, %v3753_v58  ;;  %v6357_v43 = vld [vmem:[#allocation113_spill] sm:$0xff]  ;;  %v6358_v56 = vld [vmem:[#allocation115_spill] sm:$0xff]  ;;  %v6360_v58 = vld [vmem:[#allocation118_spill] sm:$0xff] }
  0xd8   :  { %v6369_v44 = vld [vmem:[#allocation132_spill] sm:$0xff]  ;;  %v6371_v63 = vld [vmem:[#allocation135_spill] sm:$0xff]  ;;  %v6373_v61 = vld [vmem:[#allocation137_spill] sm:$0xff] }
  0xd9   :  { %3255 = vmatpush1.bf16.msra.mxu1 %v3254_v42  ;;  %680 = vmatmul.mubr.f32.vlgmr.msra.gmra.mrb[0].mxu0 %v6355_v55  ;;  %v3264_v42 = vpack.c.bf16 %v3705_v13, %v3703_v12  ;;  %v6366_v13 = vld [vmem:[#allocation127_spill] sm:$0xff]  ;;  %v6368_v12 = vld [vmem:[#allocation130_spill] sm:$0xff]  ;;  %v6385_v51 = vld [vmem:[#allocation156_spill] sm:$0xff] }
  0xda   :  { %3257 = vmatprep.subr.bf16.mxu1 %v3256_v26  ;;  %2875 = vmatpush1.bf16.msra.mxu0 %v2874_v31  ;;  %v2886_v26 = vpack.c.bf16 %v3775_v29, %v3762_v7  ;;  %v2888_v31 = vpack.c.bf16 %v3796_v37, %v3794_v0  ;;  %v6361_v29 = vld [vmem:[#allocation120_spill] sm:$0xff]  ;;  %v6362_v7 = vld [vmem:[#allocation121_spill] sm:$0xff]  ;;  %v6363_v37 = vld [vmem:[#allocation123_spill] sm:$0xff] }
  0xdb   :  { %2877 = vmatprep.subr.bf16.mxu0 %v2876_v47  ;;  %v6364_v0 = vld [vmem:[#allocation124_spill] sm:$0xff]  ;;  %v6390_v50 = vld [vmem:[#allocation163_spill] sm:$0xff]  ;;  %v6394_v47 = vld [vmem:[#allocation169_spill] sm:$0xff]  ;;  %880 = vmatprep.mubr.f32.mxu0 %v6401_v9 }
  0xdc   :  { %1964 = vmatmul.mubr.f32.vlgmr.msra.gmra.mrb[0].mxu1 %v6355_v55  ;;  %v6356_v55 = vld [vmem:[#allocation112_spill] sm:$0xff]  ;;  %v6395_v10 = vld [vmem:[#allocation171_spill] sm:$0xff]  ;;  %v6400_v39 = vld [vmem:[#allocation49_spill] sm:$0xff] }
  0xdd   :  { %3259 = vmatpush1.bf16.msra.mxu1 %v3258_v27  ;;  %v6359_v27 = vld [vmem:[#allocation117_spill] sm:$0xff]  ;;  %v6398_v21 = vld [vmem:[#allocation175_spill] sm:$0xff]  ;;  %v6399_v17 = vld [vmem:[#allocation48_spill] sm:$0xff]  ;;  %2164 = vmatprep.mubr.f32.mxu1 %v6401_v9 }
  0xde   :  { %3261 = vmatprep.subr.bf16.mxu1 %v3260_v38  ;;  %2879 = vmatpush1.bf16.msra.mxu0 %v2878_v3  ;;  %v6367_v38 = vld [vmem:[#allocation129_spill] sm:$0xff]  ;;  %v6403_v48 = vld [vmem:[#allocation55_spill] sm:$0xff]  ;;  %v6405_v40 = vld [vmem:[#allocation58_spill] sm:$0xff] }
  0xdf   :  { %2881 = vmatprep.subr.bf16.mxu0 %v2880_v18  ;;  %v6389_v3 = vld [vmem:[#allocation161_spill] sm:$0xff] }
  0xe0   :  { %v6397_v18 = vld [vmem:[#allocation173_spill] sm:$0xff] }
  0xe1   :  { %3263 = vmatpush1.bf16.msra.mxu1 %v3262_v2  ;;  %v6391_v2 = vld [vmem:[#allocation165_spill] sm:$0xff] }
  0xe2   :  { %3265 = vmatprep.subr.bf16.mxu1 %v3264_v42  ;;  %2883 = vmatpush1.bf16.msra.mxu0 %v2882_v24  ;;  %v3270_v42 = vpack.c.bf16 %v6400_v39, %v6399_v17  ;;  %v6404_v46 = vld [vmem:[#allocation57_spill] sm:$0xff]  ;;  %v6406_v24 = vld [vmem:[#allocation63_spill] sm:$0xff] }
  0xe3   :  { %2885 = vmatprep.subr.bf16.mxu0 %v2884_v14  ;;  %v6402_v14 = vld [vmem:[#allocation53_spill] sm:$0xff]  ;;  %v2890_v22 = vpack.c.bf16 %v6405_v40, %v6404_v46  ;;  %v2892_v15 = vpack.c.bf16 %v6407_v57, %v6406_v24  ;;  %v6419_v24 = vld [vmem:[#allocation79_spill] sm:$0xff] }
  0xe4   :  { %v3272_v19 = vpack.c.bf16 %v6403_v48, %v6402_v14  ;;  %v6409_v11 = vld [vmem:[#allocation61_spill] sm:$0xff]  ;;  %v6413_v14 = vld [vmem:[#allocation70_spill] sm:$0xff] }
  0xe5   :  { %3267 = vmatpush1.bf16.msra.mxu1 %v3266_v25  ;;  %v6408_v25 = vld [vmem:[#allocation60_spill] sm:$0xff]  ;;  %v6410_v17 = vld [vmem:[#allocation65_spill] sm:$0xff] }
  0xe6   :  { %3269 = vmatprep.subr.bf16.mxu1 %v3268_v1  ;;  %2887 = vmatpush1.bf16.msra.mxu0 %v2886_v26  ;;  %v3274_v39 = vpack.c.bf16 %v6409_v11, %v6408_v25  ;;  %v6411_v1 = vld [vmem:[#allocation67_spill] sm:$0xff]  ;;  %v6412_v48 = vld [vmem:[#allocation69_spill] sm:$0xff]  ;;  %v6421_v25 = vld [vmem:[#allocation82_spill] sm:$0xff] }
  0xe7   :  { %2889 = vmatprep.subr.bf16.mxu0 %v2888_v31  ;;  %v3276_v45 = vpack.c.bf16 %v6411_v1, %v6410_v17  ;;  %v2894_v9 = vpack.c.bf16 %v6413_v14, %v6412_v48  ;;  %v6414_v26 = vld [vmem:[#allocation75_spill] sm:$0xff]  ;;  %v6416_v31 = vld [vmem:[#allocation72_spill] sm:$0xff]  ;;  %v6417_v46 = vld [vmem:[#allocation73_spill] sm:$0xff] }
  0xe8   :  { %v2896_v40 = vpack.c.bf16 %v6415_v60, %v6414_v26  ;;  %v3278_v57 = vpack.c.bf16 %v6417_v46, %v6416_v31  ;;  %v6423_v17 = vld [vmem:[#allocation88_spill] sm:$0xff]  ;;  %v6425_v48 = vld [vmem:[#allocation85_spill] sm:$0xff]  ;;  %v6427_v26 = vld [vmem:[#allocation91_spill] sm:$0xff] }
  0xe9   :  { %3271 = vmatpush1.bf16.msra.mxu1 %v3270_v42  ;;  %v6418_v42 = vld [vmem:[#allocation77_spill] sm:$0xff]  ;;  %v6429_v31 = vld [vmem:[#allocation94_spill] sm:$0xff] }
  0xea   :  { %3273 = vmatprep.subr.bf16.mxu1 %v3272_v19  ;;  %2891 = vmatpush1.bf16.msra.mxu0 %v2890_v22  ;;  %v3280_v11 = vpack.c.bf16 %v6419_v24, %v6418_v42  ;;  %v6420_v19 = vld [vmem:[#allocation81_spill] sm:$0xff]  ;;  %v6422_v22 = vld [vmem:[#allocation87_spill] sm:$0xff]  ;;  %v6431_v42 = vld [vmem:[#allocation100_spill] sm:$0xff] }
  0xeb   :  { %2893 = vmatprep.subr.bf16.mxu0 %v2892_v15  ;;  %v2898_v1 = vpack.c.bf16 %v6421_v25, %v6420_v19  ;;  %v2900_v14 = vpack.c.bf16 %v6423_v17, %v6422_v22  ;;  %v6424_v15 = vld [vmem:[#allocation84_spill] sm:$0xff]  ;;  %v6433_v19 = vld [vmem:[#allocation97_spill] sm:$0xff]  ;;  %v6435_v22 = vld [vmem:[#allocation103_spill] sm:$0xff] }
  0xec   :  { %v3282_v60 = vpack.c.bf16 %v6425_v48, %v6424_v15 }
  0xed   :  { %3275 = vmatpush1.bf16.msra.mxu1 %v3274_v39  ;;  %v6426_v39 = vld [vmem:[#allocation89_spill] sm:$0xff] }
  0xee   :  { %3277 = vmatprep.subr.bf16.mxu1 %v3276_v45  ;;  %2895 = vmatpush1.bf16.msra.mxu0 %v2894_v9  ;;  %v3284_v46 = vpack.c.bf16 %v6427_v26, %v6426_v39  ;;  %v6428_v45 = vld [vmem:[#allocation93_spill] sm:$0xff]  ;;  %v6430_v9 = vld [vmem:[#allocation99_spill] sm:$0xff] }
  0xef   :  { %2897 = vmatprep.subr.bf16.mxu0 %v2896_v40  ;;  %v2902_v24 = vpack.c.bf16 %v6429_v31, %v6428_v45  ;;  %v2904_v25 = vpack.c.bf16 %v6431_v42, %v6430_v9  ;;  %v6432_v40 = vld [vmem:[#allocation96_spill] sm:$0xff] }
  0xf0   :  { %v3286_v17 = vpack.c.bf16 %v6433_v19, %v6432_v40 }
  0xf1   :  { %3279 = vmatpush1.bf16.msra.mxu1 %v3278_v57  ;;  %v6434_v57 = vld [vmem:[#allocation101_spill] sm:$0xff] }
  0xf2   :  { %3281 = vmatprep.subr.bf16.mxu1 %v3280_v11  ;;  %2899 = vmatpush1.bf16.msra.mxu0 %v2898_v1  ;;  %v3288_v48 = vpack.c.bf16 %v6435_v22, %v6434_v57  ;;  %v6436_v11 = vpack.c.bf16 %v6300_v28, %v6299_v23  ;;  %v6444_v1 = vpack.c.bf16 %v6368_v12, %v6367_v38  ;;  %v6455_v38 = vld [vmem:[#allocation144_spill] sm:$0xff] }
  0xf3   :  { %2901 = vmatprep.subr.bf16.mxu0 %v2900_v14  ;;  %v6437_v14 = vpack.c.bf16 %v6356_v55, %v6303_v54 }
  0xf5   :  { %3283 = vmatpush1.bf16.msra.mxu1 %v3282_v60  ;;  %v6438_v60 = vpack.c.bf16 %v6302_v8, %v6301_v30 }
  0xf6   :  { %3285 = vmatprep.subr.bf16.mxu1 %v3284_v46  ;;  %2903 = vmatpush1.bf16.msra.mxu0 %v2902_v24  ;;  %v6439_v46 = vpack.c.bf16 %v6358_v56, %v6357_v43  ;;  %v6442_v24 = vpack.c.bf16 %v6362_v7, %v6361_v29 }
  0xf7   :  { %2905 = vmatprep.subr.bf16.mxu0 %v2904_v25  ;;  %v6443_v25 = vpack.c.bf16 %v6366_v13, %v6365_v33 }
  0xf9   :  { %3287 = vmatpush1.bf16.msra.mxu1 %v3286_v17  ;;  %v6440_v17 = vpack.c.bf16 %v6360_v58, %v6359_v27 }
  0xfa   :  { %3289 = vmatprep.subr.bf16.mxu1 %v3288_v48  ;;  %2907 = vmatpush1.bf16.msra.mxu0 %v6436_v11  ;;  %v6441_v48 = vpack.c.bf16 %v6364_v0, %v6363_v37  ;;  %v6445_v11 = vpack.c.bf16 %v6372_v6, %v6371_v63 }
  0xfb   :  { %2909 = vmatprep.subr.bf16.mxu0 %v6437_v14  ;;  %v6446_v14 = vpack.c.bf16 %v6370_v62, %v6369_v44  ;;  %v6460_v44 = vld [vmem:[#allocation153_spill] sm:$0xff] }
  0xfd   :  { %3291 = vmatpush1.bf16.msra.mxu1 %v6438_v60  ;;  %v6447_v60 = vpack.c.bf16 %v6374_v52, %v6373_v61 }
  0xfe   :  { %3293 = vmatprep.subr.bf16.mxu1 %v6439_v46  ;;  %2911 = vmatpush1.bf16.msra.mxu0 %v6440_v17  ;;  %v6448_v46 = vld [vmem:[#allocation142_spill] sm:$0xff]  ;;  %v6449_v17 = vld [vmem:[#allocation141_spill] sm:$0xff] }
  0xff   :  { %2913 = vmatprep.subr.bf16.mxu0 %v6441_v48  ;;  %v6450_v48 = vpack.c.bf16 %v6448_v46, %v6449_v17 }
 0x101   :  { %3295 = vmatpush1.bf16.msra.mxu1 %v6442_v24  ;;  %v6451_v24 = vld [vmem:[#allocation148_spill] sm:$0xff] }
 0x102   :  { %3297 = vmatprep.subr.bf16.mxu1 %v6443_v25  ;;  %2915 = vmatpush1.bf16.msra.mxu0 %v6444_v1  ;;  %v6452_v25 = vld [vmem:[#allocation147_spill] sm:$0xff]  ;;  %v6454_v1 = vld [vmem:[#allocation145_spill] sm:$0xff] }
 0x103   :  { %2917 = vmatprep.subr.bf16.mxu0 %v6445_v11  ;;  %v6453_v12 = vpack.c.bf16 %v6451_v24, %v6452_v25  ;;  %v6456_v6 = vpack.c.bf16 %v6454_v1, %v6455_v38  ;;  %v6457_v11 = vld [vmem:[#allocation149_spill] sm:$0xff] }
 0x104   :  { %v6458_v62 = vpack.c.bf16 %v6382_v36, %v6457_v11 }
 0x105   :  { %3299 = vmatpush1.bf16.msra.mxu1 %v6446_v14  ;;  %v6459_v14 = vld [vmem:[#allocation154_spill] sm:$0xff] }
 0x106   :  { %3301 = vmatprep.subr.bf16.mxu1 %v6447_v60  ;;  %2919 = vmatpush1.bf16.msra.mxu0 %v6450_v48  ;;  %v6461_v52 = vpack.c.bf16 %v6459_v14, %v6460_v44  ;;  %v6462_v60 = vpack.c.bf16 %v6388_v16, %v6387_v34  ;;  %v6463_v48 = vpack.c.bf16 %v6386_v32, %v6385_v51 }
 0x107   :  { %2921 = vmatprep.subr.bf16.mxu0 %v6453_v12  ;;  %v6464_v12 = vpack.c.bf16 %v6390_v50, %v6389_v3  ;;  %v6592_v3 = vld [vmem:[#allocation34_spill] sm:$0xff] }
 0x109   :  { %3303 = vmatpush1.bf16.msra.mxu1 %v6456_v6  ;;  %v6465_v6 = vpack.c.bf16 %v6392_v20, %v6391_v2  ;;  %v6563_v20 = vld [vmem:[#allocation191_spill] sm:$0xff]  ;;  %v6566_v2 = vld [vmem:[#allocation13_spill] sm:$0xff] }
 0x10a   :  { %3305 = vmatprep.subr.bf16.mxu1 %v6458_v62  ;;  %2923 = vmatpush1.bf16.msra.mxu0 %v6461_v52  ;;  %v6466_v62 = vpack.c.bf16 %v6396_v41, %v6395_v10  ;;  %v6467_v52 = vpack.c.bf16 %v6394_v47, %v6393_v4  ;;  %v6477_v4 = vld [vmem:[#allocation189_spill] sm:$0xff] }
 0x10b   :  { %2925 = vmatprep.subr.bf16.mxu0 %v6462_v60  ;;  %v6468_v60 = vpack.c.bf16 %v6398_v21, %v6397_v18  ;;  %v6557_v18 = vld [vmem:[#allocation10_spill] sm:$0xff] }
 0x10d   :  { %3307 = vmatpush1.bf16.msra.mxu1 %v6463_v48  ;;  %v6469_v48 = vld [vmem:[#allocation177_spill] sm:$0xff] }
 0x10e   :  { %3309 = vmatprep.subr.bf16.mxu1 %v6464_v12  ;;  %2927 = vmatpush1.bf16.msra.mxu0 %v6465_v6  ;;  %v6470_v50 = vpack.c.bf16 %v6348_v59, %v6469_v48  ;;  %v6471_v12 = vpack.c.bf16 %v4369_v5, %v4367_v49  ;;  %v6472_v6 = vld [vmem:[#allocation180_spill] sm:$0xff]  ;;  %v6480_v59 = vld [vmem:[#allocation193_spill] sm:$0xff]  ;;  %v6483_v5 = vld [vmem:[#allocation6_spill] sm:$0xff] }
 0x10f   :  { %2929 = vmatprep.subr.bf16.mxu0 %v6466_v62  ;;  %v6473_v41 = vpack.c.bf16 %v6350_v35, %v6472_v6  ;;  %v6474_v62 = vld [vmem:[#allocation185_spill] sm:$0xff]  ;;  %v6485_v35 = vld [vmem:[#allocation8_spill] sm:$0xff] }
 0x110   :  { %v6475_v47 = vpack.c.bf16 %v4378_v53, %v6474_v62  ;;  %v6554_v49 = vld [vmem:[#allocation188_spill] sm:$0xff] }
 0x111   :  { %3311 = vmatpush1.bf16.msra.mxu1 %v6467_v52  ;;  %v6476_v52 = vld [vmem:[#allocation190_spill] sm:$0xff] }
 0x112   :  { %3313 = vmatprep.subr.bf16.mxu1 %v6468_v60  ;;  %2931 = vmatpush1.bf16.msra.mxu0 %v6470_v50  ;;  %v6478_v21 = vpack.c.bf16 %v6476_v52, %v6477_v4  ;;  %v6479_v60 = vld [vmem:[#allocation2_spill] sm:$0xff]  ;;  %v6481_v50 = vld [vmem:[#allocation192_spill] sm:$0xff]  ;;  %v6488_v52 = vld [vmem:[#allocation11_spill] sm:$0xff] }
 0x113   :  { %2933 = vmatprep.subr.bf16.mxu0 %v6471_v12  ;;  %v6482_v48 = vpack.c.bf16 %v6480_v59, %v6481_v50  ;;  %v6484_v12 = vld [vmem:[#allocation198_spill] sm:$0xff]  ;;  %v6493_v59 = vld [vmem:[#allocation29_spill] sm:$0xff]  ;;  %v6546_v4 = vld [vmem:[#allocation4_spill] sm:$0xff] }
 0x114   :  { %v6495_v50 = vld [vmem:[#allocation38_spill] sm:$0xff] }
 0x115   :  { %3315 = vmatpush1.bf16.msra.mxu1 %v6473_v41  ;;  %v6486_v41 = vld [vmem:[#allocation197_spill] sm:$0xff] }
 0x116   :  { %3317 = vmatprep.subr.bf16.mxu1 %v6475_v47  ;;  %2935 = vmatpush1.bf16.msra.mxu0 %v6478_v21  ;;  %v6487_v47 = vld [vmem:[#allocation15_spill] sm:$0xff]  ;;  %v6489_v21 = vld [vmem:[#allocation17_spill] sm:$0xff] }
 0x117   :  { %2937 = vmatprep.subr.bf16.mxu0 %v6479_v60  ;;  %v6490_v60 = vld [vmem:[#allocation21_spill] sm:$0xff] }
 0x119   :  { %3319 = vmatpush1.bf16.msra.mxu1 %v6482_v48  ;;  %883 = vmatmul.mubr.f32.vlgmr.msra.gmra.mrb[0].mxu0 %v6484_v12  ;;  %v6491_v48 = vld [vmem:[#allocation26_spill] sm:$0xff] }
 0x11a   :  { %3321 = vmatprep.subr.bf16.mxu1 %v6483_v5  ;;  %2939 = vmatpush1.bf16.msra.mxu0 %v6485_v35  ;;  %v6492_v5 = vld [vmem:[#allocation24_spill] sm:$0xff] }
 0x11b   :  { %1020 = vmatprep.mubr.f32.mxu0 %v6486_v41  ;;  %2941 = vmatprep.subr.bf16.mxu0 %v6487_v47  ;;  %v6494_v35 = vld [vmem:[#allocation32_spill] sm:$0xff]  ;;  %v6497_v47 = vld [vmem:[#allocation41_spill] sm:$0xff] }
 0x11c   :  { %2167 = vmatmul.mubr.f32.vlgmr.msra.gmra.mrb[0].mxu1 %v6484_v12  ;;  %v6496_v12 = vld [vmem:[#allocation35_spill] sm:$0xff] }
 0x11d   :  { %3323 = vmatpush1.bf16.msra.mxu1 %v6488_v52  ;;  %2304 = vmatprep.mubr.f32.mxu1 %v6486_v41  ;;  %v6498_v52 = vld [vmem:[#allocation45_spill] sm:$0xff]  ;;  %v6499_v41 = vld [vmem:[#allocation50_spill] sm:$0xff] }
 0x11e   :  { %3325 = vmatprep.subr.bf16.mxu1 %v6489_v21  ;;  %2943 = vmatpush1.bf16.msra.mxu0 %v6490_v60  ;;  %v6500_v21 = vld [vmem:[#allocation47_spill] sm:$0xff]  ;;  %v6501_v60 = vld [vmem:[#allocation54_spill] sm:$0xff] }
 0x11f   :  { %2945 = vmatprep.subr.bf16.mxu0 %v6491_v48  ;;  %v6502_v48 = vld [vmem:[#allocation56_spill] sm:$0xff] }
 0x121   :  { %3327 = vmatpush1.bf16.msra.mxu1 %v6492_v5  ;;  %v6503_v5 = vld [vmem:[#allocation62_spill] sm:$0xff] }
 0x122   :  { %3329 = vmatprep.subr.bf16.mxu1 %v6493_v59  ;;  %2947 = vmatpush1.bf16.msra.mxu0 %v6494_v35  ;;  %v6504_v59 = vld [vmem:[#allocation59_spill] sm:$0xff]  ;;  %v6505_v35 = vld [vmem:[#allocation66_spill] sm:$0xff] }
 0x123   :  { %2949 = vmatprep.subr.bf16.mxu0 %v6495_v50  ;;  %v6506_v50 = vld [vmem:[#allocation68_spill] sm:$0xff] }
 0x125   :  { %3331 = vmatpush1.bf16.msra.mxu1 %v6496_v12  ;;  %v6507_v12 = vld [vmem:[#allocation74_spill] sm:$0xff] }
 0x126   :  { %3333 = vmatprep.subr.bf16.mxu1 %v6497_v47  ;;  %2951 = vmatpush1.bf16.msra.mxu0 %v6498_v52  ;;  %v6508_v47 = vld [vmem:[#allocation71_spill] sm:$0xff]  ;;  %v6509_v52 = vld [vmem:[#allocation78_spill] sm:$0xff] }
 0x127   :  { %2953 = vmatprep.subr.bf16.mxu0 %v6499_v41  ;;  %v6510_v41 = vld [vmem:[#allocation80_spill] sm:$0xff] }
 0x129   :  { %3335 = vmatpush1.bf16.msra.mxu1 %v6500_v21  ;;  %v6511_v21 = vld [vmem:[#allocation86_spill] sm:$0xff] }
 0x12a   :  { %3337 = vmatprep.subr.bf16.mxu1 %v6501_v60  ;;  %2955 = vmatpush1.bf16.msra.mxu0 %v6502_v48  ;;  %v6512_v60 = vld [vmem:[#allocation83_spill] sm:$0xff]  ;;  %v6513_v48 = vld [vmem:[#allocation90_spill] sm:$0xff] }
 0x12b   :  { %2957 = vmatprep.subr.bf16.mxu0 %v6503_v5  ;;  %v6514_v5 = vld [vmem:[#allocation92_spill] sm:$0xff] }
 0x12d   :  { %3339 = vmatpush1.bf16.msra.mxu1 %v6504_v59  ;;  %v6515_v59 = vld [vmem:[#allocation98_spill] sm:$0xff] }
 0x12e   :  { %3341 = vmatprep.subr.bf16.mxu1 %v6505_v35  ;;  %2959 = vmatpush1.bf16.msra.mxu0 %v6506_v50  ;;  %v6516_v35 = vld [vmem:[#allocation95_spill] sm:$0xff]  ;;  %v6517_v50 = vld [vmem:[#allocation102_spill] sm:$0xff] }
 0x12f   :  { %2961 = vmatprep.subr.bf16.mxu0 %v6507_v12  ;;  %v6518_v12 = vld [vmem:[#allocation104_spill] sm:$0xff] }
 0x131   :  { %3343 = vmatpush1.bf16.msra.mxu1 %v6508_v47  ;;  %v6519_v47 = vld [vmem:[#allocation110_spill] sm:$0xff] }
 0x132   :  { %3345 = vmatprep.subr.bf16.mxu1 %v6509_v52  ;;  %2963 = vmatpush1.bf16.msra.mxu0 %v6510_v41  ;;  %v6520_v52 = vld [vmem:[#allocation107_spill] sm:$0xff]  ;;  %v6521_v41 = vld [vmem:[#allocation114_spill] sm:$0xff] }
 0x133   :  { %2965 = vmatprep.subr.bf16.mxu0 %v6511_v21  ;;  %v6522_v21 = vld [vmem:[#allocation116_spill] sm:$0xff] }
 0x135   :  { %3347 = vmatpush1.bf16.msra.mxu1 %v6512_v60  ;;  %v6523_v60 = vld [vmem:[#allocation122_spill] sm:$0xff] }
 0x136   :  { %3349 = vmatprep.subr.bf16.mxu1 %v6513_v48  ;;  %2967 = vmatpush1.bf16.msra.mxu0 %v6514_v5  ;;  %v6524_v48 = vld [vmem:[#allocation119_spill] sm:$0xff]  ;;  %v6525_v5 = vld [vmem:[#allocation126_spill] sm:$0xff] }
 0x137   :  { %2969 = vmatprep.subr.bf16.mxu0 %v6515_v59  ;;  %v6526_v59 = vld [vmem:[#allocation128_spill] sm:$0xff] }
 0x139   :  { %3351 = vmatpush1.bf16.msra.mxu1 %v6516_v35  ;;  %v6527_v35 = vld [vmem:[#allocation134_spill] sm:$0xff] }
 0x13a   :  { %3353 = vmatprep.subr.bf16.mxu1 %v6517_v50  ;;  %2971 = vmatpush1.bf16.msra.mxu0 %v6518_v12  ;;  %v6528_v50 = vld [vmem:[#allocation131_spill] sm:$0xff]  ;;  %v6529_v12 = vld [vmem:[#allocation138_spill] sm:$0xff] }
 0x13b   :  { %2973 = vmatprep.subr.bf16.mxu0 %v6519_v47  ;;  %v6530_v47 = vld [vmem:[#allocation140_spill] sm:$0xff] }
 0x13d   :  { %3355 = vmatpush1.bf16.msra.mxu1 %v6520_v52  ;;  %v6531_v52 = vld [vmem:[#allocation146_spill] sm:$0xff] }
 0x13e   :  { %3357 = vmatprep.subr.bf16.mxu1 %v6521_v41  ;;  %2975 = vmatpush1.bf16.msra.mxu0 %v6522_v21  ;;  %v6532_v41 = vld [vmem:[#allocation143_spill] sm:$0xff]  ;;  %v6533_v21 = vld [vmem:[#allocation150_spill] sm:$0xff] }
 0x13f   :  { %2977 = vmatprep.subr.bf16.mxu0 %v6523_v60  ;;  %v6534_v60 = vld [vmem:[#allocation152_spill] sm:$0xff] }
 0x141   :  { %3359 = vmatpush1.bf16.msra.mxu1 %v6524_v48  ;;  %v6535_v48 = vld [vmem:[#allocation158_spill] sm:$0xff] }
 0x142   :  { %3361 = vmatprep.subr.bf16.mxu1 %v6525_v5  ;;  %2979 = vmatpush1.bf16.msra.mxu0 %v6526_v59  ;;  %v6536_v5 = vld [vmem:[#allocation155_spill] sm:$0xff]  ;;  %v6537_v59 = vld [vmem:[#allocation162_spill] sm:$0xff] }
 0x143   :  { %2981 = vmatprep.subr.bf16.mxu0 %v6527_v35  ;;  %v6538_v35 = vld [vmem:[#allocation164_spill] sm:$0xff] }
 0x145   :  { %3363 = vmatpush1.bf16.msra.mxu1 %v6528_v50  ;;  %v6539_v50 = vld [vmem:[#allocation170_spill] sm:$0xff] }
 0x146   :  { %3365 = vmatprep.subr.bf16.mxu1 %v6529_v12  ;;  %2983 = vmatpush1.bf16.msra.mxu0 %v6530_v47  ;;  %v6540_v12 = vld [vmem:[#allocation167_spill] sm:$0xff]  ;;  %v6541_v47 = vld [vmem:[#allocation174_spill] sm:$0xff] }
 0x147   :  { %2985 = vmatprep.subr.bf16.mxu0 %v6531_v52  ;;  %v6542_v52 = vld [vmem:[#allocation176_spill] sm:$0xff] }
 0x149   :  { %3367 = vmatpush1.bf16.msra.mxu1 %v6532_v41  ;;  %v6543_v41 = vld [vmem:[#allocation182_spill] sm:$0xff] }
 0x14a   :  { %3369 = vmatprep.subr.bf16.mxu1 %v6533_v21  ;;  %2987 = vmatpush1.bf16.msra.mxu0 %v6534_v60  ;;  %v6544_v21 = vld [vmem:[#allocation3_spill] sm:$0xff] }
 0x14b   :  { %2989 = vmatprep.subr.bf16.mxu0 %v6535_v48  ;;  %v6545_v60 = vand.u32 4294901760, %v6544_v21  ;;  %v6547_v48 = vand.u32 4294901760, %v6546_v4  ;;  %v6559_v21 = vld [vmem:[#allocation14_spill] sm:$0xff] }
 0x14c   :  { %v6560_v4 = vand.u32 4294901760, %v6559_v21 }
 0x14d   :  { %3371 = vmatpush1.bf16.msra.mxu1 %v6536_v5  ;;  %v3000_v53 = vpack.c.bf16 %v6547_v48, %v6545_v60  ;;  %v6548_v5 = vld [vmem:[#allocation179_spill] sm:$0xff]  ;;  %v6561_v60 = vld [vmem:[#allocation16_spill] sm:$0xff] }
 0x14e   :  { %3373 = vmatprep.subr.bf16.mxu1 %v6537_v59  ;;  %2991 = vmatpush1.bf16.msra.mxu0 %v6538_v35  ;;  %v6549_v59 = vld [vmem:[#allocation186_spill] sm:$0xff]  ;;  %v6550_v35 = vld [vmem:[#allocation5_spill] sm:$0xff]  ;;  %v6562_v48 = vand.u32 4294901760, %v6561_v60 }
 0x14f   :  { %2993 = vmatprep.subr.bf16.mxu0 %v6539_v50  ;;  %v6551_v62 = vand.u32 4294901760, %v6550_v35  ;;  %v6552_v50 = vld [vmem:[#allocation7_spill] sm:$0xff]  ;;  %v6575_v60 = vld [vmem:[#allocation22_spill] sm:$0xff] }
 0x150   :  { %v6553_v6 = vand.u32 4294901760, %v6552_v50  ;;  %v6567_v50 = vand.u32 4294901760, %v6566_v2 }
 0x151   :  { %3375 = vmatpush1.bf16.msra.mxu1 %v6540_v12 }
 0x152   :  { %3377 = vmatprep.subr.bf16.mxu1 %v6541_v47  ;;  %2995 = vmatpush1.bf16.msra.mxu0 %v6542_v52  ;;  %v3384_v12 = vpack.c.bf16 %v6553_v6, %v6551_v62  ;;  %v6555_v47 = vld [vmem:[#allocation9_spill] sm:$0xff]  ;;  %v6568_v62 = vld [vmem:[#allocation199_spill] sm:$0xff] }
 0x153   :  { %2997 = vmatprep.subr.bf16.mxu0 %v6543_v41  ;;  %v6556_v52 = vand.u32 4294901760, %v6555_v47  ;;  %v6558_v41 = vand.u32 4294901760, %v6557_v18  ;;  %v6569_v47 = vld [vmem:[#allocation18_spill] sm:$0xff]  ;;  %v6571_v18 = vld [vmem:[#allocation19_spill] sm:$0xff] }
 0x155   :  { %3379 = vmatpush1.bf16.msra.mxu1 %v6548_v5  ;;  %v3002_v10 = vpack.c.bf16 %v6558_v41, %v6556_v52  ;;  %v3004_v5 = vpack.c.bf16 %v6562_v48, %v6560_v4  ;;  %v6572_v52 = vand.u32 4294901760, %v6571_v18  ;;  %v6573_v41 = vld [vmem:[#allocation20_spill] sm:$0xff]  ;;  %v6576_v4 = vand.u32 4294901760, %v6575_v60  ;;  %v6588_v60 = vld [vmem:[#allocation31_spill] sm:$0xff] }
 0x156   :  { %3381 = vmatprep.subr.bf16.mxu1 %v6549_v59  ;;  %2999 = vmatpush1.bf16.msra.mxu0 %v6554_v49  ;;  %v6564_v59 = vld [vmem:[#allocation12_spill] sm:$0xff]  ;;  %v6570_v49 = vand.u32 4294901760, %v6569_v47  ;;  %v6574_v21 = vand.u32 4294901760, %v6573_v41  ;;  %v6582_v47 = vld [vmem:[#allocation23_spill] sm:$0xff]  ;;  %v6586_v41 = vld [vmem:[#allocation30_spill] sm:$0xff] }
 0x157   :  { %3001 = vmatprep.subr.bf16.mxu0 %v3000_v53  ;;  %v6565_v35 = vand.u32 4294901760, %v6564_v59  ;;  %v6578_v59 = vld [vmem:[#allocation27_spill] sm:$0xff]  ;;  %v6583_v18 = vand.u32 4294901760, %v6582_v47  ;;  %v6596_v47 = vld [vmem:[#allocation40_spill] sm:$0xff] }
 0x158   :  { %v3388_v53 = vpack.c.bf16 %v6572_v52, %v6570_v49  ;;  %v3006_v48 = vpack.c.bf16 %v6576_v4, %v6574_v21  ;;  %v6579_v2 = vand.u32 4294901760, %v6578_v59  ;;  %v6584_v49 = vld [vmem:[#allocation25_spill] sm:$0xff]  ;;  %v6587_v21 = vand.u32 4294901760, %v6586_v41 }
 0x159   :  { %3383 = vmatpush1.bf16.msra.mxu1 %v6563_v20  ;;  %v3386_v6 = vpack.c.bf16 %v6567_v50, %v6565_v35  ;;  %1024 = vmatmul.mubr.f32.vlgmr.msra.gmra.mrb[0].mxu0 %v6568_v62  ;;  %v6577_v20 = vld [vmem:[#allocation194_spill] sm:$0xff]  ;;  %v6589_v4 = vand.u32 4294901760, %v6588_v60  ;;  %v6604_v60 = vld [vmem:[#allocation43_spill] sm:$0xff] }
 0x15a   :  { %3385 = vmatprep.subr.bf16.mxu1 %v3384_v12  ;;  %3003 = vmatpush1.bf16.msra.mxu0 %v3002_v10  ;;  %v6580_v12 = vld [vmem:[#allocation28_spill] sm:$0xff]  ;;  %v6585_v10 = vand.u32 4294901760, %v6584_v49  ;;  %v6597_v49 = vand.u32 4294901760, %v6596_v47 }
 0x15b   :  { %1287 = vmatprep.mubr.f32.mxu0 %v6577_v20  ;;  %3005 = vmatprep.subr.bf16.mxu0 %v3004_v5  ;;  %v6581_v35 = vand.u32 4294901760, %v6580_v12  ;;  %v6590_v5 = vld [vmem:[#allocation33_spill] sm:$0xff]  ;;  %v6593_v12 = vand.u32 4294901760, %v6592_v3  ;;  %v6606_v3 = vld [vmem:[#allocation44_spill] sm:$0xff] }
 0x15c   :  { %2308 = vmatmul.mubr.f32.vlgmr.msra.gmra.mrb[0].mxu1 %v6568_v62  ;;  %v3390_v52 = vpack.c.bf16 %v6585_v10, %v6583_v18  ;;  %v3392_v62 = vpack.c.bf16 %v6589_v4, %v6587_v21  ;;  %v6591_v59 = vand.u32 4294901760, %v6590_v5  ;;  %v6598_v10 = vld [vmem:[#allocation36_spill] sm:$0xff]  ;;  %v6602_v21 = vld [vmem:[#allocation42_spill] sm:$0xff]  ;;  %v6605_v4 = vand.u32 4294901760, %v6604_v60  ;;  %v6620_v60 = vld [vmem:[#allocation55_spill] sm:$0xff] }
 0x15d   :  { %v3008_v50 = vpack.c.bf16 %v6581_v35, %v6579_v2  ;;  %3387 = vmatpush1.bf16.msra.mxu1 %v3386_v6  ;;  %2571 = vmatprep.mubr.f32.mxu1 %v6577_v20  ;;  %v6594_v6 = vld [vmem:[#allocation39_spill] sm:$0xff]  ;;  %v6600_v20 = vld [vmem:[#allocation37_spill] sm:$0xff]  ;;  %v6612_v47 = vld [vmem:[#allocation52_spill] sm:$0xff] }
 0x15e   :  { %3389 = vmatprep.subr.bf16.mxu1 %v3388_v53  ;;  %3007 = vmatpush1.bf16.msra.mxu0 %v3006_v48  ;;  %v3010_v2 = vpack.c.bf16 %v6593_v12, %v6591_v59  ;;  %v6595_v35 = vand.u32 4294901760, %v6594_v6  ;;  %v6599_v53 = vand.u32 4294901760, %v6598_v10  ;;  %v6601_v41 = vand.u32 4294901760, %v6600_v20  ;;  %v6608_v59 = vld [vmem:[#allocation46_spill] sm:$0xff]  ;;  %v6614_v20 = vld [vmem:[#allocation48_spill] sm:$0xff] }
 0x15f   :  { %3009 = vmatprep.subr.bf16.mxu0 %v3008_v50  ;;  %v6603_v48 = vand.u32 4294901760, %v6602_v21  ;;  %v6607_v50 = vand.u32 4294901760, %v6606_v3  ;;  %v6609_v12 = vand.u32 4294901760, %v6608_v59  ;;  %v6624_v59 = vld [vmem:[#allocation58_spill] sm:$0xff] }
 0x160   :  { %v3012_v18 = vpack.c.bf16 %v6597_v49, %v6595_v35  ;;  %v3394_v32 = vpack.c.bf16 %v6601_v41, %v6599_v53  ;;  %v6610_v35 = vld [vmem:[#allocation51_spill] sm:$0xff]  ;;  %v6613_v49 = vand.u32 4294901760, %v6612_v47  ;;  %v6616_v53 = vld [vmem:[#allocation49_spill] sm:$0xff]  ;;  %v6628_v47 = vld [vmem:[#allocation64_spill] sm:$0xff] }
 0x161   :  { %3391 = vmatpush1.bf16.msra.mxu1 %v3390_v52  ;;  %v3396_v5 = vpack.c.bf16 %v6605_v4, %v6603_v48  ;;  %v3014_v6 = vpack.c.bf16 %v6609_v12, %v6607_v50  ;;  %v6611_v52 = vand.u32 4294901760, %v6610_v35  ;;  %v6617_v41 = vand.u32 4294901760, %v6616_v53  ;;  %v6618_v48 = vld [vmem:[#allocation53_spill] sm:$0xff] }
 0x162   :  { %3393 = vmatprep.subr.bf16.mxu1 %v3392_v62  ;;  %3011 = vmatpush1.bf16.msra.mxu0 %v3010_v2  ;;  %v6615_v62 = vand.u32 4294901760, %v6614_v20  ;;  %v6619_v2 = vand.u32 4294901760, %v6618_v48  ;;  %v6621_v4 = vand.u32 4294901760, %v6620_v60  ;;  %v6622_v50 = vld [vmem:[#allocation57_spill] sm:$0xff]  ;;  %v6625_v12 = vand.u32 4294901760, %v6624_v59  ;;  %v6636_v60 = vld [vmem:[#allocation67_spill] sm:$0xff] }
 0x163   :  { %3013 = vmatprep.subr.bf16.mxu0 %v3012_v18  ;;  %v3016_v10 = vpack.c.bf16 %v6613_v49, %v6611_v52  ;;  %v6623_v18 = vand.u32 4294901760, %v6622_v50  ;;  %v6626_v52 = vld [vmem:[#allocation63_spill] sm:$0xff]  ;;  %v6629_v49 = vand.u32 4294901760, %v6628_v47  ;;  %v6632_v53 = vld [vmem:[#allocation61_spill] sm:$0xff]  ;;  %v6640_v59 = vld [vmem:[#allocation70_spill] sm:$0xff] }
 0x164   :  { %v3398_v21 = vpack.c.bf16 %v6617_v41, %v6615_v62  ;;  %v3400_v3 = vpack.c.bf16 %v6621_v4, %v6619_v2  ;;  %v6630_v62 = vld [vmem:[#allocation60_spill] sm:$0xff]  ;;  %v6633_v41 = vand.u32 4294901760, %v6632_v53  ;;  %v6634_v2 = vld [vmem:[#allocation65_spill] sm:$0xff]  ;;  %v6637_v4 = vand.u32 4294901760, %v6636_v60  ;;  %v6652_v60 = vld [vmem:[#allocation79_spill] sm:$0xff] }
 0x165   :  { %3395 = vmatpush1.bf16.msra.mxu1 %v3394_v32  ;;  %v3018_v35 = vpack.c.bf16 %v6625_v12, %v6623_v18  ;;  %v6627_v32 = vand.u32 4294901760, %v6626_v52  ;;  %v6638_v18 = vld [vmem:[#allocation69_spill] sm:$0xff]  ;;  %v6641_v12 = vand.u32 4294901760, %v6640_v59  ;;  %v6644_v47 = vld [vmem:[#allocation76_spill] sm:$0xff]  ;;  %v6656_v59 = vld [vmem:[#allocation82_spill] sm:$0xff] }
 0x166   :  { %3397 = vmatprep.subr.bf16.mxu1 %v3396_v5  ;;  %3015 = vmatpush1.bf16.msra.mxu0 %v3014_v6  ;;  %v6631_v5 = vand.u32 4294901760, %v6630_v62  ;;  %v6635_v6 = vand.u32 4294901760, %v6634_v2  ;;  %v6648_v53 = vld [vmem:[#allocation73_spill] sm:$0xff] }
 0x167   :  { %3017 = vmatprep.subr.bf16.mxu0 %v3016_v10  ;;  %v3020_v20 = vpack.c.bf16 %v6629_v49, %v6627_v32  ;;  %v6639_v10 = vand.u32 4294901760, %v6638_v18  ;;  %v6642_v32 = vld [vmem:[#allocation75_spill] sm:$0xff]  ;;  %v6645_v49 = vand.u32 4294901760, %v6644_v47  ;;  %v6660_v47 = vld [vmem:[#allocation88_spill] sm:$0xff] }
 0x168   :  { %v3402_v48 = vpack.c.bf16 %v6633_v41, %v6631_v5  ;;  %v3404_v50 = vpack.c.bf16 %v6637_v4, %v6635_v6  ;;  %v6646_v5 = vld [vmem:[#allocation72_spill] sm:$0xff]  ;;  %v6649_v41 = vand.u32 4294901760, %v6648_v53  ;;  %v6650_v6 = vld [vmem:[#allocation77_spill] sm:$0xff]  ;;  %v6653_v4 = vand.u32 4294901760, %v6652_v60 }
 0x169   :  { %3399 = vmatpush1.bf16.msra.mxu1 %v3398_v21  ;;  %v3022_v52 = vpack.c.bf16 %v6641_v12, %v6639_v10  ;;  %v6643_v21 = vand.u32 4294901760, %v6642_v32  ;;  %v6654_v10 = vld [vmem:[#allocation81_spill] sm:$0xff]  ;;  %v6657_v12 = vand.u32 4294901760, %v6656_v59  ;;  %v6668_v60 = vand.u32 4294901760, %v6429_v31 }
 0x16a   :  { %3401 = vmatprep.subr.bf16.mxu1 %v3400_v3  ;;  %3019 = vmatpush1.bf16.msra.mxu0 %v3018_v35  ;;  %v6647_v3 = vand.u32 4294901760, %v6646_v5  ;;  %v6651_v35 = vand.u32 4294901760, %v6650_v6  ;;  %v6666_v6 = vand.u32 4294901760, %v6427_v26  ;;  %v6673_v26 = vand.u32 4294901760, %v6434_v57 }
 0x16b   :  { %3021 = vmatprep.subr.bf16.mxu0 %v3020_v20  ;;  %v3024_v62 = vpack.c.bf16 %v6645_v49, %v6643_v21  ;;  %v6655_v20 = vand.u32 4294901760, %v6654_v10  ;;  %v6658_v21 = vld [vmem:[#allocation87_spill] sm:$0xff]  ;;  %v6661_v49 = vand.u32 4294901760, %v6660_v47  ;;  %v6675_v31 = vand.u32 4294901760, %v6299_v23 }
 0x16c   :  { %v3406_v2 = vpack.c.bf16 %v6649_v41, %v6647_v3  ;;  %v3408_v18 = vpack.c.bf16 %v6653_v4, %v6651_v35  ;;  %v6663_v3 = vld [vmem:[#allocation85_spill] sm:$0xff]  ;;  %v6680_v57 = vand.u32 4294901760, %v6302_v8  ;;  %v6682_v23 = vand.u32 4294901760, %v6358_v56 }
 0x16d   :  { %3403 = vmatpush1.bf16.msra.mxu1 %v3402_v48  ;;  %v3026_v32 = vpack.c.bf16 %v6657_v12, %v6655_v20  ;;  %v6659_v48 = vand.u32 4294901760, %v6658_v21  ;;  %v6664_v53 = vand.u32 4294901760, %v6663_v3  ;;  %v6687_v8 = vand.u32 4294901760, %v6361_v29 }
 0x16e   :  { %3405 = vmatprep.subr.bf16.mxu1 %v3404_v50  ;;  %3023 = vmatpush1.bf16.msra.mxu0 %v3022_v52  ;;  %v6662_v50 = vand.u32 4294901760, %v6424_v15  ;;  %v6665_v52 = vand.u32 4294901760, %v6426_v39  ;;  %v6670_v15 = vand.u32 4294901760, %v6431_v42  ;;  %v6672_v39 = vand.u32 4294901760, %v6433_v19 }
 0x16f   :  { %3025 = vmatprep.subr.bf16.mxu0 %v3024_v62  ;;  %v3028_v5 = vpack.c.bf16 %v6661_v49, %v6659_v48  ;;  %v6667_v62 = vand.u32 4294901760, %v6428_v45  ;;  %v6674_v45 = vand.u32 4294901760, %v6435_v22  ;;  %v6677_v42 = vand.u32 4294901760, %v6303_v54 }
 0x170   :  { %v3410_v41 = vpack.c.bf16 %v6664_v53, %v6662_v50  ;;  %v3412_v35 = vpack.c.bf16 %v6666_v6, %v6665_v52  ;;  %v6679_v19 = vand.u32 4294901760, %v6301_v30  ;;  %v6681_v22 = vand.u32 4294901760, %v6357_v43  ;;  %v6693_v53 = vld [vmem:[#allocation130_spill] sm:$0xff]  ;;  %v6696_v52 = vld [vmem:[#allocation136_spill] sm:$0xff] }
 0x171   :  { %3407 = vmatpush1.bf16.msra.mxu1 %v3406_v2  ;;  %v3030_v4 = vpack.c.bf16 %v6668_v60, %v6667_v62  ;;  %v6669_v2 = vand.u32 4294901760, %v6430_v9  ;;  %v3416_v59 = vpack.c.bf16 %v6674_v45, %v6673_v26  ;;  %v6676_v9 = vand.u32 4294901760, %v6300_v28  ;;  %v6700_v62 = vld [vmem:[#allocation133_spill] sm:$0xff] }
 0x172   :  { %3409 = vmatprep.subr.bf16.mxu1 %v3408_v18  ;;  %3027 = vmatpush1.bf16.msra.mxu0 %v3026_v32  ;;  %v6671_v18 = vand.u32 4294901760, %v6432_v40  ;;  %v6678_v40 = vand.u32 4294901760, %v6356_v55  ;;  %v3418_v21 = vpack.c.bf16 %v6680_v57, %v6679_v19  ;;  %v3420_v48 = vpack.c.bf16 %v6682_v23, %v6681_v22  ;;  %v6722_v57 = vld [vmem:[#allocation163_spill] sm:$0xff]  ;;  %v6726_v23 = vld [vmem:[#allocation166_spill] sm:$0xff] }
 0x173   :  { %3029 = vmatprep.subr.bf16.mxu0 %v3028_v5  ;;  %v3032_v10 = vpack.c.bf16 %v6670_v15, %v6669_v2  ;;  %v3034_v12 = vpack.c.bf16 %v6676_v9, %v6675_v31  ;;  %v6683_v28 = vand.u32 4294901760, %v6359_v27  ;;  %v6684_v54 = vand.u32 4294901760, %v6360_v58  ;;  %v6691_v58 = vld [vmem:[#allocation129_spill] sm:$0xff] }
 0x174   :  { %v3414_v20 = vpack.c.bf16 %v6672_v39, %v6671_v18  ;;  %v3036_v32 = vpack.c.bf16 %v6678_v40, %v6677_v42  ;;  %v6685_v55 = vand.u32 4294901760, %v6363_v37  ;;  %v6686_v30 = vand.u32 4294901760, %v6364_v0  ;;  %v6718_v40 = vld [vmem:[#allocation157_spill] sm:$0xff] }
 0x175   :  { %3411 = vmatpush1.bf16.msra.mxu1 %v3410_v41  ;;  %v3038_v47 = vpack.c.bf16 %v6684_v54, %v6683_v28  ;;  %v6688_v43 = vand.u32 4294901760, %v6362_v7  ;;  %v6689_v56 = vand.u32 4294901760, %v6365_v33  ;;  %v6690_v27 = vand.u32 4294901760, %v6366_v13  ;;  %v6698_v7 = vld [vmem:[#allocation132_spill] sm:$0xff] }
 0x176   :  { %3413 = vmatprep.subr.bf16.mxu1 %v3412_v35  ;;  %3031 = vmatpush1.bf16.msra.mxu0 %v3030_v4  ;;  %v3040_v49 = vpack.c.bf16 %v6686_v30, %v6685_v55  ;;  %v6692_v3 = vand.u32 4294901760, %v6691_v58  ;;  %v6694_v37 = vand.u32 4294901760, %v6693_v53  ;;  %v6695_v0 = vand.u32 4294901760, %v6371_v63  ;;  %v6703_v4 = vld [vmem:[#allocation139_spill] sm:$0xff]  ;;  %v6730_v54 = vld [vmem:[#allocation172_spill] sm:$0xff] }
 0x177   :  { %3033 = vmatprep.subr.bf16.mxu0 %v3032_v10  ;;  %v3422_v5 = vpack.c.bf16 %v6688_v43, %v6687_v8  ;;  %v3424_v50 = vpack.c.bf16 %v6690_v27, %v6689_v56  ;;  %v6697_v29 = vand.u32 4294901760, %v6696_v52  ;;  %v6699_v35 = vand.u32 4294901760, %v6698_v7  ;;  %v6732_v55 = vld [vmem:[#allocation168_spill] sm:$0xff]  ;;  %v6738_v27 = vld [vmem:[#allocation175_spill] sm:$0xff] }
 0x178   :  { %v3042_v41 = vpack.c.bf16 %v6694_v37, %v6692_v3  ;;  %v6701_v33 = vand.u32 4294901760, %v6700_v62  ;;  %v6702_v13 = vand.u32 4294901760, %v6373_v61  ;;  %v6704_v2 = vand.u32 4294901760, %v6703_v4  ;;  %v6740_v3 = vld [vmem:[#allocation177_spill] sm:$0xff]  ;;  %v6742_v37 = vld [vmem:[#allocation178_spill] sm:$0xff]  ;;  %v6744_v52 = vld [vmem:[#allocation183_spill] sm:$0xff] }
 0x179   :  { %3415 = vmatpush1.bf16.msra.mxu1 %v3414_v20  ;;  %v3044_v6 = vpack.c.bf16 %v6697_v29, %v6695_v0  ;;  %v6705_v10 = vand.u32 4294901760, %v6449_v17  ;;  %v6706_v63 = vand.u32 4294901760, %v6448_v46  ;;  %v6707_v39 = vand.u32 4294901760, %v6452_v25  ;;  %v6748_v62 = vld [vmem:[#allocation180_spill] sm:$0xff] }
 0x17a   :  { %3417 = vmatprep.subr.bf16.mxu1 %v3416_v59  ;;  %3035 = vmatpush1.bf16.msra.mxu0 %v3034_v12  ;;  %v3426_v60 = vpack.c.bf16 %v6701_v33, %v6699_v35  ;;  %v3428_v15 = vpack.c.bf16 %v6704_v2, %v6702_v13  ;;  %v6708_v20 = vand.u32 4294901760, %v6451_v24  ;;  %v6709_v45 = vand.u32 4294901760, %v6455_v38  ;;  %v6752_v2 = vld [vmem:[#allocation185_spill] sm:$0xff] }
 0x17b   :  { %3037 = vmatprep.subr.bf16.mxu0 %v3036_v32  ;;  %v3046_v18 = vpack.c.bf16 %v6706_v63, %v6705_v10  ;;  %v6710_v61 = vand.u32 4294901760, %v6454_v1  ;;  %v6711_v31 = vand.u32 4294901760, %v6457_v11  ;;  %v6712_v17 = vand.u32 4294901760, %v6382_v36  ;;  %v6720_v36 = vld [vmem:[#allocation161_spill] sm:$0xff]  ;;  %v6754_v10 = vld [vmem:[#allocation187_spill] sm:$0xff] }
 0x17c   :  { %v3048_v26 = vpack.c.bf16 %v6708_v20, %v6707_v39  ;;  %v6713_v46 = vand.u32 4294901760, %v6460_v44  ;;  %v6714_v25 = vand.u32 4294901760, %v6459_v14  ;;  %v6715_v24 = vand.u32 4294901760, %v6387_v34  ;;  %v6724_v14 = vld [vmem:[#allocation165_spill] sm:$0xff] }
 0x17d   :  { %3419 = vmatpush1.bf16.msra.mxu1 %v3418_v21  ;;  %v3430_v59 = vpack.c.bf16 %v6710_v61, %v6709_v45  ;;  %v3432_v9 = vpack.c.bf16 %v6712_v17, %v6711_v31  ;;  %v6716_v38 = vand.u32 4294901760, %v6388_v16  ;;  %v6717_v1 = vand.u32 4294901760, %v6385_v51  ;;  %v6728_v16 = vld [vmem:[#allocation171_spill] sm:$0xff]  ;;  %v6756_v39 = vld [vmem:[#allocation189_spill] sm:$0xff] }
 0x17e   :  { %3421 = vmatprep.subr.bf16.mxu1 %v3420_v48  ;;  %3039 = vmatpush1.bf16.msra.mxu0 %v3038_v47  ;;  %v3050_v12 = vpack.c.bf16 %v6714_v25, %v6713_v46  ;;  %v6719_v11 = vand.u32 4294901760, %v6718_v40  ;;  %v6721_v19 = vand.u32 4294901760, %v6720_v36  ;;  %v6723_v44 = vand.u32 4294901760, %v6722_v57  ;;  %v6762_v17 = vld [vmem:[#allocation193_spill] sm:$0xff]  ;;  %v6764_v25 = vld [vmem:[#allocation2_spill] sm:$0xff]  ;;  %v6770_v40 = vld [vmem:[#allocation11_spill] sm:$0xff] }
 0x17f   :  { %3041 = vmatprep.subr.bf16.mxu0 %v3040_v49  ;;  %v3052_v42 = vpack.c.bf16 %v6716_v38, %v6715_v24  ;;  %v6725_v22 = vand.u32 4294901760, %v6724_v14  ;;  %v6727_v34 = vand.u32 4294901760, %v6726_v23  ;;  %v6729_v28 = vand.u32 4294901760, %v6728_v16  ;;  %v6734_v49 = vld [vmem:[#allocation169_spill] sm:$0xff]  ;;  %v6766_v24 = vld [vmem:[#allocation196_spill] sm:$0xff]  ;;  %v6773_v36 = vld [vmem:[#allocation26_spill] sm:$0xff] }
 0x180   :  { %v3434_v32 = vpack.c.bf16 %v6719_v11, %v6717_v1  ;;  %v3436_v21 = vpack.c.bf16 %v6723_v44, %v6721_v19  ;;  %v6731_v51 = vand.u32 4294901760, %v6730_v54  ;;  %v6733_v30 = vand.u32 4294901760, %v6732_v55  ;;  %v6767_v38 = vld [vmem:[#allocation8_spill] sm:$0xff]  ;;  %v6769_v1 = vld [vmem:[#allocation15_spill] sm:$0xff]  ;;  %v6771_v11 = vld [vmem:[#allocation17_spill] sm:$0xff] }
 0x181   :  { %3423 = vmatpush1.bf16.msra.mxu1 %v3422_v5  ;;  %v3054_v48 = vpack.c.bf16 %v6727_v34, %v6725_v22  ;;  %v6735_v8 = vand.u32 4294901760, %v6734_v49  ;;  %v6736_v5 = vld [vmem:[#allocation173_spill] sm:$0xff]  ;;  %v6741_v53 = vand.u32 4294901760, %v6740_v3  ;;  %v6745_v29 = vand.u32 4294901760, %v6744_v52  ;;  %v6774_v19 = vld [vmem:[#allocation24_spill] sm:$0xff]  ;;  %v6778_v14 = vld [vmem:[#allocation35_spill] sm:$0xff] }
 0x182   :  { %3425 = vmatprep.subr.bf16.mxu1 %v3424_v50  ;;  %3043 = vmatpush1.bf16.msra.mxu0 %v3042_v41  ;;  %v3056_v47 = vpack.c.bf16 %v6731_v51, %v6729_v28  ;;  %v6737_v56 = vand.u32 4294901760, %v6736_v5  ;;  %v6739_v50 = vand.u32 4294901760, %v6738_v27  ;;  %v6743_v41 = vand.u32 4294901760, %v6742_v37  ;;  %v6775_v57 = vld [vmem:[#allocation29_spill] sm:$0xff]  ;;  %v6776_v44 = vld [vmem:[#allocation32_spill] sm:$0xff]  ;;  %v6781_v34 = vld [vmem:[#allocation50_spill] sm:$0xff] }
 0x183   :  { %3045 = vmatprep.subr.bf16.mxu0 %v3044_v6  ;;  %v3438_v43 = vpack.c.bf16 %v6735_v8, %v6733_v30  ;;  %v6746_v6 = vld [vmem:[#allocation184_spill] sm:$0xff]  ;;  %v6749_v33 = vand.u32 4294901760, %v6748_v62  ;;  %v6755_v63 = vand.u32 4294901760, %v6754_v10  ;;  %v6757_v20 = vand.u32 4294901760, %v6756_v39  ;;  %v6779_v22 = vld [vmem:[#allocation41_spill] sm:$0xff]  ;;  %v6783_v16 = vld [vmem:[#allocation54_spill] sm:$0xff] }
 0x184   :  { %v3440_v58 = vpack.c.bf16 %v6739_v50, %v6737_v56  ;;  %v3058_v0 = vpack.c.bf16 %v6743_v41, %v6741_v53  ;;  %v6747_v7 = vand.u32 4294901760, %v6746_v6  ;;  %v6780_v23 = vld [vmem:[#allocation45_spill] sm:$0xff]  ;;  %v6784_v28 = vld [vmem:[#allocation56_spill] sm:$0xff]  ;;  %v6785_v54 = vld [vmem:[#allocation62_spill] sm:$0xff] }
 0x185   :  { %3427 = vmatpush1.bf16.msra.mxu1 %v3426_v60  ;;  %v6750_v60 = vld [vmem:[#allocation181_spill] sm:$0xff]  ;;  %v6786_v51 = vld [vmem:[#allocation59_spill] sm:$0xff]  ;;  %v6788_v55 = vld [vmem:[#allocation68_spill] sm:$0xff] }
 0x186   :  { %3429 = vmatprep.subr.bf16.mxu1 %v3428_v15  ;;  %3047 = vmatpush1.bf16.msra.mxu0 %v3046_v18  ;;  %v3060_v35 = vpack.c.bf16 %v6747_v7, %v6745_v29  ;;  %v6751_v13 = vand.u32 4294901760, %v6750_v60  ;;  %v6753_v15 = vand.u32 4294901760, %v6752_v2  ;;  %v6789_v30 = vld [vmem:[#allocation74_spill] sm:$0xff]  ;;  %v6790_v49 = vld [vmem:[#allocation71_spill] sm:$0xff]  ;;  %v6796_v50 = vld [vmem:[#allocation92_spill] sm:$0xff] }
 0x187   :  { %3049 = vmatprep.subr.bf16.mxu0 %v3048_v26  ;;  %v6758_v26 = vld [vmem:[#allocation190_spill] sm:$0xff]  ;;  %v6794_v56 = vld [vmem:[#allocation83_spill] sm:$0xff]  ;;  %v6800_v37 = vld [vmem:[#allocation104_spill] sm:$0xff] }
 0x188   :  { %v3442_v4 = vpack.c.bf16 %v6751_v13, %v6749_v33  ;;  %v3444_v18 = vpack.c.bf16 %v6755_v63, %v6753_v15  ;;  %v6759_v45 = vand.u32 4294901760, %v6758_v26  ;;  %v6791_v8 = vld [vmem:[#allocation78_spill] sm:$0xff]  ;;  %v6798_v3 = vld [vmem:[#allocation95_spill] sm:$0xff]  ;;  %v6804_v29 = vld [vmem:[#allocation116_spill] sm:$0xff] }
 0x189   :  { %3431 = vmatpush1.bf16.msra.mxu1 %v3430_v59  ;;  %v6760_v59 = vld [vmem:[#allocation192_spill] sm:$0xff]  ;;  %v6793_v5 = vld [vmem:[#allocation86_spill] sm:$0xff]  ;;  %v6806_v7 = vld [vmem:[#allocation119_spill] sm:$0xff] }
 0x18a   :  { %3433 = vmatprep.subr.bf16.mxu1 %v3432_v9  ;;  %3051 = vmatpush1.bf16.msra.mxu0 %v3050_v12  ;;  %v3062_v61 = vpack.c.bf16 %v6759_v45, %v6757_v20  ;;  %v6761_v31 = vand.u32 4294901760, %v6760_v59  ;;  %v6763_v9 = vand.u32 4294901760, %v6762_v17  ;;  %v6765_v12 = vld [vmem:[#allocation6_spill] sm:$0xff]  ;;  %v6808_v62 = vld [vmem:[#allocation128_spill] sm:$0xff]  ;;  %v6810_v60 = vld [vmem:[#allocation131_spill] sm:$0xff] }
 0x18b   :  { %3053 = vmatprep.subr.bf16.mxu0 %v3052_v42  ;;  %v6768_v42 = vld [vmem:[#allocation194_spill] sm:$0xff]  ;;  %v6814_v15 = vld [vmem:[#allocation143_spill] sm:$0xff]  ;;  %v6816_v63 = vld [vmem:[#allocation152_spill] sm:$0xff] }
 0x18c   :  { %v3446_v46 = vpack.c.bf16 %v6763_v9, %v6761_v31  ;;  %v6795_v27 = vld [vmem:[#allocation90_spill] sm:$0xff]  ;;  %v6818_v39 = vld [vmem:[#allocation155_spill] sm:$0xff]  ;;  %v6820_v26 = vld [vmem:[#allocation164_spill] sm:$0xff] }
 0x18d   :  { %3435 = vmatpush1.bf16.msra.mxu1 %v3434_v32  ;;  %v6772_v32 = vld [vmem:[#allocation21_spill] sm:$0xff]  ;;  %v6799_v53 = vld [vmem:[#allocation102_spill] sm:$0xff]  ;;  %v6824_v31 = vld [vmem:[#allocation176_spill] sm:$0xff] }
 0x18e   :  { %3437 = vmatprep.subr.bf16.mxu1 %v3436_v21  ;;  %3055 = vmatpush1.bf16.msra.mxu0 %v3054_v48  ;;  %v6777_v21 = vld [vmem:[#allocation38_spill] sm:$0xff]  ;;  %v6782_v48 = vld [vmem:[#allocation47_spill] sm:$0xff] }
 0x18f   :  { %3057 = vmatprep.subr.bf16.mxu0 %v3056_v47  ;;  %v6787_v47 = vld [vmem:[#allocation66_spill] sm:$0xff]  ;;  %v6826_v9 = vld [vmem:[#allocation179_spill] sm:$0xff] }
 0x190   :  { %v6801_v41 = vld [vmem:[#allocation110_spill] sm:$0xff] }
 0x191   :  { %3439 = vmatpush1.bf16.msra.mxu1 %v3438_v43  ;;  %v6792_v43 = vld [vmem:[#allocation80_spill] sm:$0xff]  ;;  %v6803_v52 = vld [vmem:[#allocation114_spill] sm:$0xff] }
 0x192   :  { %3441 = vmatprep.subr.bf16.mxu1 %v3440_v58  ;;  %3059 = vmatpush1.bf16.msra.mxu0 %v3058_v0  ;;  %v6797_v58 = vld [vmem:[#allocation98_spill] sm:$0xff]  ;;  %v6802_v0 = vld [vmem:[#allocation107_spill] sm:$0xff] }
 0x193   :  { %3061 = vmatprep.subr.bf16.mxu0 %v3060_v35  ;;  %v6805_v6 = vld [vmem:[#allocation122_spill] sm:$0xff] }
 0x194   :  { %v6807_v35 = vld [vmem:[#allocation126_spill] sm:$0xff] }
 0x195   :  { %3443 = vmatpush1.bf16.msra.mxu1 %v3442_v4  ;;  %v6809_v33 = vld [vmem:[#allocation134_spill] sm:$0xff]  ;;  %v6812_v4 = vld [vmem:[#allocation140_spill] sm:$0xff] }
 0x196   :  { %3445 = vmatprep.subr.bf16.mxu1 %v3444_v18  ;;  %3063 = vmatpush1.bf16.msra.mxu0 %v3062_v61  ;;  %v6811_v13 = vld [vmem:[#allocation138_spill] sm:$0xff]  ;;  %v6822_v61 = vld [vmem:[#allocation167_spill] sm:$0xff] }
 0x197   :  { %3065 = vmatprep.subr.bf16.mxu0 %v6764_v25  ;;  %v6813_v2 = vld [vmem:[#allocation146_spill] sm:$0xff]  ;;  %v6828_v25 = vld [vmem:[#allocation188_spill] sm:$0xff] }
 0x198   :  { %v6815_v10 = vld [vmem:[#allocation150_spill] sm:$0xff] }
 0x199   :  { %3447 = vmatpush1.bf16.msra.mxu1 %v3446_v46  ;;  %1289 = vmatmul.mubr.f32.vlgmr.msra.gmra.mrb[0].mxu0 %v6766_v24  ;;  %v6817_v18 = vld [vmem:[#allocation158_spill] sm:$0xff] }
 0x19a   :  { %3449 = vmatprep.subr.bf16.mxu1 %v6765_v12  ;;  %3067 = vmatpush1.bf16.msra.mxu0 %v6767_v38  ;;  %v6819_v20 = vld [vmem:[#allocation162_spill] sm:$0xff]  ;;  %v6829_v12 = vld [vmem:[#allocation191_spill] sm:$0xff] }
 0x19b   :  { %1424 = vmatprep.mubr.f32.mxu0 %v6768_v42  ;;  %3069 = vmatprep.subr.bf16.mxu0 %v6769_v1  ;;  %v6821_v45 = vld [vmem:[#allocation170_spill] sm:$0xff] }
 0x19c   :  { %2573 = vmatmul.mubr.f32.vlgmr.msra.gmra.mrb[0].mxu1 %v6766_v24  ;;  %v6823_v59 = vld [vmem:[#allocation174_spill] sm:$0xff] }
 0x19d   :  { %3451 = vmatpush1.bf16.msra.mxu1 %v6770_v40  ;;  %2708 = vmatprep.mubr.f32.mxu1 %v6768_v42  ;;  %v6825_v17 = vld [vmem:[#allocation182_spill] sm:$0xff] }
 0x19e   :  { %3453 = vmatprep.subr.bf16.mxu1 %v6771_v11  ;;  %3071 = vmatpush1.bf16.msra.mxu0 %v6772_v32  ;;  %v6827_v46 = vld [vmem:[#allocation186_spill] sm:$0xff] }
 0x19f   :  { %3073 = vmatprep.subr.bf16.mxu0 %v6773_v36 }
 0x1a1   :  { %3455 = vmatpush1.bf16.msra.mxu1 %v6774_v19 }
 0x1a2   :  { %3457 = vmatprep.subr.bf16.mxu1 %v6775_v57  ;;  %3075 = vmatpush1.bf16.msra.mxu0 %v6776_v44 }
 0x1a3   :  { %3077 = vmatprep.subr.bf16.mxu0 %v6777_v21 }
 0x1a5   :  { %3459 = vmatpush1.bf16.msra.mxu1 %v6778_v14 }
 0x1a6   :  { %3461 = vmatprep.subr.bf16.mxu1 %v6779_v22  ;;  %3079 = vmatpush1.bf16.msra.mxu0 %v6780_v23 }
 0x1a7   :  { %3081 = vmatprep.subr.bf16.mxu0 %v6781_v34 }
 0x1a9   :  { %3463 = vmatpush1.bf16.msra.mxu1 %v6782_v48 }
 0x1aa   :  { %3465 = vmatprep.subr.bf16.mxu1 %v6783_v16  ;;  %3083 = vmatpush1.bf16.msra.mxu0 %v6784_v28 }
 0x1ab   :  { %3085 = vmatprep.subr.bf16.mxu0 %v6785_v54 }
 0x1ad   :  { %3467 = vmatpush1.bf16.msra.mxu1 %v6786_v51 }
 0x1ae   :  { %3469 = vmatprep.subr.bf16.mxu1 %v6787_v47  ;;  %3087 = vmatpush1.bf16.msra.mxu0 %v6788_v55 }
 0x1af   :  { %3089 = vmatprep.subr.bf16.mxu0 %v6789_v30 }
 0x1b1   :  { %3471 = vmatpush1.bf16.msra.mxu1 %v6790_v49 }
 0x1b2   :  { %3473 = vmatprep.subr.bf16.mxu1 %v6791_v8  ;;  %3091 = vmatpush1.bf16.msra.mxu0 %v6792_v43 }
 0x1b3   :  { %3093 = vmatprep.subr.bf16.mxu0 %v6793_v5 }
 0x1b5   :  { %3475 = vmatpush1.bf16.msra.mxu1 %v6794_v56 }
 0x1b6   :  { %3477 = vmatprep.subr.bf16.mxu1 %v6795_v27  ;;  %3095 = vmatpush1.bf16.msra.mxu0 %v6796_v50 }
 0x1b7   :  { %3097 = vmatprep.subr.bf16.mxu0 %v6797_v58 }
 0x1b9   :  { %3479 = vmatpush1.bf16.msra.mxu1 %v6798_v3 }
 0x1ba   :  { %3481 = vmatprep.subr.bf16.mxu1 %v6799_v53  ;;  %3099 = vmatpush1.bf16.msra.mxu0 %v6800_v37 }
 0x1bb   :  { %3101 = vmatprep.subr.bf16.mxu0 %v6801_v41 }
 0x1bd   :  { %3483 = vmatpush1.bf16.msra.mxu1 %v6802_v0 }
 0x1be   :  { %3485 = vmatprep.subr.bf16.mxu1 %v6803_v52  ;;  %3103 = vmatpush1.bf16.msra.mxu0 %v6804_v29 }
 0x1bf   :  { %3105 = vmatprep.subr.bf16.mxu0 %v6805_v6 }
 0x1c1   :  { %3487 = vmatpush1.bf16.msra.mxu1 %v6806_v7 }
 0x1c2   :  { %3489 = vmatprep.subr.bf16.mxu1 %v6807_v35  ;;  %3107 = vmatpush1.bf16.msra.mxu0 %v6808_v62 }
 0x1c3   :  { %3109 = vmatprep.subr.bf16.mxu0 %v6809_v33 }
 0x1c5   :  { %3491 = vmatpush1.bf16.msra.mxu1 %v6810_v60 }
 0x1c6   :  { %3493 = vmatprep.subr.bf16.mxu1 %v6811_v13  ;;  %3111 = vmatpush1.bf16.msra.mxu0 %v6812_v4 }
 0x1c7   :  { %3113 = vmatprep.subr.bf16.mxu0 %v6813_v2 }
 0x1c9   :  { %3495 = vmatpush1.bf16.msra.mxu1 %v6814_v15 }
 0x1ca   :  { %3497 = vmatprep.subr.bf16.mxu1 %v6815_v10  ;;  %3115 = vmatpush1.bf16.msra.mxu0 %v6816_v63 }
 0x1cb   :  { %3117 = vmatprep.subr.bf16.mxu0 %v6817_v18 }
 0x1cd   :  { %3499 = vmatpush1.bf16.msra.mxu1 %v6818_v39 }
 0x1ce   :  { %3501 = vmatprep.subr.bf16.mxu1 %v6819_v20  ;;  %3119 = vmatpush1.bf16.msra.mxu0 %v6820_v26 }
 0x1cf   :  { %3121 = vmatprep.subr.bf16.mxu0 %v6821_v45 }
 0x1d1   :  { %3503 = vmatpush1.bf16.msra.mxu1 %v6822_v61 }
 0x1d2   :  { %3505 = vmatprep.subr.bf16.mxu1 %v6823_v59  ;;  %3123 = vmatpush1.bf16.msra.mxu0 %v6824_v31 }
 0x1d3   :  { %3125 = vmatprep.subr.bf16.mxu0 %v6825_v17 }
 0x1d5   :  { %3507 = vmatpush1.bf16.msra.mxu1 %v6826_v9 }
 0x1d6   :  { %3509 = vmatprep.subr.bf16.mxu1 %v6827_v46  ;;  %3127 = vmatpush1.bf16.msra.mxu0 %v6828_v25 }
 0x1d9   :  { %3511 = vmatpush1.bf16.msra.mxu1 %v6829_v12  ;;  %1426 = vmatmul.mubr.f32.vlgmr.msra.gmra.mrb[0].mxu0 %v6766_v24 }
 0x1dc   :  { %2710 = vmatmul.mubr.f32.vlgmr.msra.gmra.mrb[0].mxu1 %v6766_v24 }
 0x2ac   :  { %v1427_v38 = vpop.f32.mrb[0].mxu0 }
 0x2ad   :  { %v2716_v42 = vmul.f32 %v1427_v38, %v1427_v38  ;;  %v1429_v1 = vpop.f32.mrb[1].mxu0 }
 0x2ae   :  { %v2717_v11 = vmul.f32 %v1429_v1, %v1429_v1 }
 0x2af   :  { %v2711_v40 = vpop.f32.mrb[0].mxu1 }
 0x2b0   :  { %v2718_v32 = vmul.f32 %v2711_v40, %v2711_v40  ;;  %v2713_v36 = vpop.f32.mrb[1].mxu1 }
 0x2b1   :  { %v2719_v19 = vmul.f32 %v2713_v36, %v2713_v36 }
 0x2b2   :  { %v2720_v57 = vadd.f32 %v2718_v32, %v2716_v42 }
 0x2b3   :  { %v2721_v44 = vadd.f32 %v2719_v19, %v2717_v11 }
 0x2b4   :  { %v2722_v21 = vadd.f32 1e-12, %v2720_v57 }
 0x2b5   :  { %v2723_v14 = vadd.f32 1e-12, %v2721_v44 }
 0x2b6   :  { %3532 = vrsqrt.f32 %v2722_v21  ;;  %vm2726_vm0 = vcmp.eq.f32.partialorder %v2722_v21, inf  ;;  %v2729_v48 = vand.u32 2147483648, %v2722_v21  ;;  %vm2728_vm1 = vcmp.eq.f32.partialorder %v2722_v21, 0.0 }
 0x2b7   :  { %3534 = vrsqrt.f32 %v2723_v14  ;;  %vm2733_vm2 = vcmp.eq.f32.partialorder %v2723_v14, inf  ;;  %v2736_v28 = vand.u32 2147483648, %v2723_v14  ;;  %vm2735_vm3 = vcmp.eq.f32.partialorder %v2723_v14, 0.0 }
 0x2c0   :  { %v3533_v22 = vpop.eup %3532 }
 0x2c1   :  { %v3535_v23 = vpop.eup %3534  ;;  %v2725_v34 = vmul.f32 %v3533_v22, %v2722_v21 }
 0x2c2   :  { %v2732_v24 = vmul.f32 %v3535_v23, %v2723_v14 }
 0x2c3   :  { %v2727_v16 = vsel %vm2726_vm0, %v2722_v21, %v2725_v34 }
 0x2c4   :  { %v2730_v54 = vsel %vm2728_vm1, %v2729_v48, %v2727_v16  ;;  %v2734_v51 = vsel %vm2733_vm2, %v2723_v14, %v2732_v24 }
 0x2c5   :  { %2738 = vst [vmem:[%s5563_s3] sm:$0xff] %v2730_v54  ;;  %v2737_v47 = vsel %vm2735_vm3, %v2736_v28, %v2734_v51 }
 0x2c6   :  { %2739 = vst [vmem:[%s5563_s3 + $0x8] sm:$0xff] %v2737_v47 }

</bundles_post_ra>
